<compile_context>
chip_gen: v5e
topology: v5e:2x2
jax: 0.10.0
libtpu: 0.0.40
codegen_flags: <defaults>
</compile_context>

<pallas_src>
import math
import functools

import jax
import jax.numpy as jnp
from jax.experimental import pallas as pl
from jax.experimental.pallas import tpu as pltpu


# ----------------------------------------------------------------------------- kernel
def _spatial_attention_kernel(w_ref, x_ref, o_ref, avg_pad, max_pad, *, k, H, W, pad):
    """One block of TB images per grid step.

    w_ref   : SMEM (2*k*k,) f32     conv weight raveled (in_ch, kh, kw); in_ch0=avg (pre-scaled
                                    by 1/C), in_ch1=max
    x_ref   : VMEM (TB, C, H, W)    input block, native dtype
    o_ref   : VMEM (TB, H, W)       output block (channel dim squeezed), native dtype
    avg_pad : VMEM (TB, H+2p, W+2p) scratch: zero-padded sum-over-C map (f32)
    max_pad : VMEM (TB, H+2p, W+2p) scratch: zero-padded max-over-C map (f32)
    """
    # Per-block up-cast; all arithmetic in f32 (required on v5e, harmless elsewhere).
    x = x_ref[...].astype(jnp.float32)              # (TB, C, H, W)
    sum_map = jnp.sum(x, axis=1)                    # (TB, H, W)  (1/C folded into weights)
    max_map = jnp.max(x, axis=1)                    # (TB, H, W)

    # Zero the padded scratch only once: the interior is fully overwritten every
    # step and the zero border persists across grid iterations (scratch is
    # persistent; batch axis is "arbitrary" so step 0 always runs first).
    @pl.when(pl.program_id(0) == 0)
    def _init_border():
        avg_pad[...] = jnp.zeros(avg_pad.shape, avg_pad.dtype)
        max_pad[...] = jnp.zeros(max_pad.shape, max_pad.dtype)

    avg_pad[:, pad:pad + H, pad:pad + W] = sum_map
    max_pad[:, pad:pad + H, pad:pad + W] = max_map

    TB = sum_map.shape[0]
    acc = jnp.zeros((TB, H, W), jnp.float32)
    # 2-in-channel k x k conv as shifted multiply-accumulates on the VPU.
    # The lane (kw) shift is hoisted out of the kh loop: 2*k lane-offset slices
    # total instead of 2*k*k; the inner loop is sublane slices + MACs only.
    for c, pref in ((0, avg_pad), (1, max_pad)):
        pmap = pref[...]                            # (TB, H+2p, W+2p) f32
        for kw in range(k):
            col_band = pmap[:, :, kw:kw + W]        # lane shift, once per (c, kw)
            for kh in range(k):
                wv = w_ref[c * k * k + kh * k + kw]  # SMEM scalar read
                acc = acc + wv * col_band[:, kh:kh + H, :]   # sublane slice + VPU MAC

    # Fused sigmoid epilogue (EUP) and down-cast to the output dtype.
    o_ref[...] = jax.nn.sigmoid(acc).astype(o_ref.dtype)


# ----------------------------------------------------------------------------- wrapper
def spatial_attention(x, w, *, kernel_size=7, vmem_block_budget_bytes=8 << 20):
    """x: (B, C, H, W) any float dtype; w: (1, 2, k, k) (PyTorch OIHW layout, bias-free)."""
    assert kernel_size in (3, 7), "kernel size must be 3 or 7"
    B, C, H, W = x.shape
    k = kernel_size
    pad = 3 if k == 7 else 1

    # Fold the 1/C mean scale into the avg-channel weights (channel 0).
    w_f32 = w.astype(jnp.float32)
    w_f32 = w_f32.at[:, 0].multiply(1.0 / C)
    w_flat = w_f32.reshape(-1)                       # (2*k*k,) in (c, kh, kw) order

    # Multi-image blocks: TB = largest divisor of B whose double-buffered input
    # block stays under the VMEM budget (conservative enough for v7x's 32 MiB
    # default scoped VMEM).  For small problems the whole batch is one step.
    itemsize = jnp.dtype(x.dtype).itemsize
    per_img = 2 * C * H * W * itemsize               # double-buffered input bytes / image
    tb = int(max(1, min(B, vmem_block_budget_bytes // max(per_img, 1))))
    while B % tb:
        tb -= 1
    grid = (B // tb,)

    kernel = functools.partial(_spatial_attention_kernel, k=k, H=H, W=W, pad=pad)
    return pl.pallas_call(
        kernel,
        grid=grid,
        in_specs=[
            pl.BlockSpec(memory_space=pltpu.MemorySpace.SMEM),        # weight scalar table
            pl.BlockSpec((tb, C, H, W), lambda b: (b, 0, 0, 0)),      # TB images / step
        ],
        out_specs=pl.BlockSpec((tb, pl.Squeezed(), H, W), lambda b: (b, 0, 0, 0)),
        out_shape=jax.ShapeDtypeStruct((B, 1, H, W), x.dtype),        # native output dtype
        scratch_shapes=[
            pltpu.VMEM((tb, H + 2 * pad, W + 2 * pad), jnp.float32),
            pltpu.VMEM((tb, H + 2 * pad, W + 2 * pad), jnp.float32),
        ],
        compiler_params=pltpu.CompilerParams(
            # "arbitrary": sequential single-core execution keeps the first-step
            # scratch-border zeroing valid on megacore parts (per-core scratch).
            dimension_semantics=("arbitrary",),
        ),
    )(w_flat, x)


# ----------------------------------------------------------------------------- reference
def spatial_attention_ref(x, w, *, kernel_size=7):
    pad = 3 if kernel_size == 7 else 1
    x = x.astype(jnp.float32)
    avg = jnp.mean(x, axis=1, keepdims=True)
    mx = jnp.max(x, axis=1, keepdims=True)
    cat = jnp.concatenate([avg, mx], axis=1)
    y = jax.lax.conv_general_dilated(
        cat, w.astype(jnp.float32), window_strides=(1, 1),
        padding=((pad, pad), (pad, pad)),
        dimension_numbers=("NCHW", "OIHW", "NCHW"))
    return jax.nn.sigmoid(y)


# ----------------------------------------------------------------------------- main
if __name__ == "__main__":
    key = jax.random.PRNGKey(0)
    kx, kw_key = jax.random.split(key)

    B, C, H, W = 2, 4, 16, 16
    k = 7
    x = jax.random.normal(kx, (B, C, H, W), jnp.float32)

    # PyTorch Conv2d default init (kaiming_uniform, a=sqrt(5)) -> bound = 1/sqrt(fan_in)
    fan_in = 2 * k * k
    bound = 1.0 / math.sqrt(fan_in)
    w = jax.random.uniform(kw_key, (1, 2, k, k), jnp.float32, -bound, bound)

    # f32 path
    out = jax.block_until_ready(spatial_attention(x, w, kernel_size=k))
    assert out.shape == (B, 1, H, W), out.shape
    assert bool(jnp.all(jnp.isfinite(out)))
    ref = spatial_attention_ref(x, w, kernel_size=k)
    assert bool(jnp.allclose(out, ref, atol=1e-4, rtol=1e-4)), \
        float(jnp.max(jnp.abs(out - ref)))

    # bf16 path (native-dtype I/O: no wrapper-side cast, bf16 in / bf16 out)
    x_bf16 = x.astype(jnp.bfloat16)
    out_bf16 = jax.block_until_ready(spatial_attention(x_bf16, w, kernel_size=k))
    assert out_bf16.dtype == jnp.bfloat16
    ref_bf16 = spatial_attention_ref(x_bf16.astype(jnp.float32), w, kernel_size=k)
    assert bool(jnp.allclose(out_bf16.astype(jnp.float32), ref_bf16, atol=2e-2)), \
        float(jnp.max(jnp.abs(out_bf16.astype(jnp.float32) - ref_bf16)))

    print("KERNEL_OK")
</pallas_src>

<mosaic_0001>
module attributes {stable_mosaic.version = 11 : i64} {
  func.func @_spatial_attention_kernel(%arg0: i32, %arg1: memref<98xf32, #tpu.memory_space<smem>>, %arg2: memref<2x4x16x16xf32, #tpu.memory_space<vmem>>, %arg3: memref<2x1x16x16xf32, #tpu.memory_space<vmem>>, %arg4: memref<2x22x22xf32, #tpu.memory_space<vmem>>, %arg5: memref<2x22x22xf32, #tpu.memory_space<vmem>>) attributes {dimension_semantics = [#tpu.dimension_semantics<arbitrary>], iteration_bounds = array<i64: 1>, scalar_prefetch = 0 : i64, scratch_operands = 2 : i64, tpu.core_type = #tpu.core_type<tc>, window_params = [{transform_indices = @transform_0, window_bounds = array<i64: 98>}, {transform_indices = @transform_1, window_bounds = array<i64: 2, 4, 16, 16>}, {transform_indices = @transform_2, window_bounds = array<i64: 2, 1, 16, 16>}]} {
    %c0 = arith.constant 0 : index
    %c0_0 = arith.constant 0 : index
    %c0_1 = arith.constant 0 : index
    %c0_2 = arith.constant 0 : index
    %0 = vector.load %arg2[%c0, %c0_0, %c0_1, %c0_2] : memref<2x4x16x16xf32, #tpu.memory_space<vmem>>, vector<2x4x16x16xf32>
    %cst = arith.constant dense<0.000000e+00> : vector<2x16x16xf32>
    %1 = vector.multi_reduction <add>, %0, %cst [1] : vector<2x4x16x16xf32> to vector<2x16x16xf32>
    %cst_3 = arith.constant dense<0xFF800000> : vector<2x16x16xf32>
    %2 = vector.multi_reduction <maximumf>, %0, %cst_3 [1] : vector<2x4x16x16xf32> to vector<2x16x16xf32>
    %c0_i32 = arith.constant 0 : i32
    %3 = arith.cmpi eq, %arg0, %c0_i32 : i32
    %4 = arith.extui %3 : i1 to i32
    %c0_i32_4 = arith.constant 0 : i32
    %5 = arith.cmpi ne, %4, %c0_i32_4 : i32
    scf.if %5 {
      %cst_24 = arith.constant 0.000000e+00 : f32
      %523 = vector.broadcast %cst_24 : f32 to vector<2x22x22xf32>
      %c0_25 = arith.constant 0 : index
      %c0_26 = arith.constant 0 : index
      %c0_27 = arith.constant 0 : index
      %524 = vector.load %arg4[%c0_25, %c0_26, %c0_27] : memref<2x22x22xf32, #tpu.memory_space<vmem>>, vector<2x22x22xf32>
      tpu.vector_store %arg4[%c0_25, %c0_26, %c0_27], %523 {strides = array<i32>} : memref<2x22x22xf32, #tpu.memory_space<vmem>>, vector<2x22x22xf32>,
      %cst_28 = arith.constant 0.000000e+00 : f32
      %525 = vector.broadcast %cst_28 : f32 to vector<2x22x22xf32>
      %c0_29 = arith.constant 0 : index
      %c0_30 = arith.constant 0 : index
      %c0_31 = arith.constant 0 : index
      %526 = vector.load %arg5[%c0_29, %c0_30, %c0_31] : memref<2x22x22xf32, #tpu.memory_space<vmem>>, vector<2x22x22xf32>
      tpu.vector_store %arg5[%c0_29, %c0_30, %c0_31], %525 {strides = array<i32>} : memref<2x22x22xf32, #tpu.memory_space<vmem>>, vector<2x22x22xf32>,
    } else {
    }
    %c0_5 = arith.constant 0 : index
    %c3 = arith.constant 3 : index
    %c3_6 = arith.constant 3 : index
    %6 = vector.load %arg4[%c0_5, %c3, %c3_6] : memref<2x22x22xf32, #tpu.memory_space<vmem>>, vector<2x16x16xf32>
    tpu.vector_store %arg4[%c0_5, %c3, %c3_6], %1 {strides = array<i32>} : memref<2x22x22xf32, #tpu.memory_space<vmem>>, vector<2x16x16xf32>,
    %c0_7 = arith.constant 0 : index
    %c3_8 = arith.constant 3 : index
    %c3_9 = arith.constant 3 : index
    %7 = vector.load %arg5[%c0_7, %c3_8, %c3_9] : memref<2x22x22xf32, #tpu.memory_space<vmem>>, vector<2x16x16xf32>
    tpu.vector_store %arg5[%c0_7, %c3_8, %c3_9], %2 {strides = array<i32>} : memref<2x22x22xf32, #tpu.memory_space<vmem>>, vector<2x16x16xf32>,
    %cst_10 = arith.constant 0.000000e+00 : f32
    %8 = vector.broadcast %cst_10 : f32 to vector<2x16x16xf32>
    %c0_11 = arith.constant 0 : index
    %c0_12 = arith.constant 0 : index
    %c0_13 = arith.constant 0 : index
    %9 = vector.load %arg4[%c0_11, %c0_12, %c0_13] : memref<2x22x22xf32, #tpu.memory_space<vmem>>, vector<2x22x22xf32>
    %10 = vector.extract_strided_slice %9 {offsets = [0, 0, 0], sizes = [2, 22, 16], strides = [1, 1, 1]} : vector<2x22x22xf32> to vector<2x22x16xf32>
    %c0_14 = arith.constant 0 : index
    %11 = memref.load %arg1[%c0_14] : memref<98xf32, #tpu.memory_space<smem>>
    %12 = vector.extract_strided_slice %10 {offsets = [0, 0, 0], sizes = [2, 16, 16], strides = [1, 1, 1]} : vector<2x22x16xf32> to vector<2x16x16xf32>
    %13 = vector.broadcast %11 : f32 to vector<2x16x16xf32>
    %14 = arith.mulf %13, %12 : vector<2x16x16xf32>
    %15 = arith.addf %8, %14 : vector<2x16x16xf32>
    %c7 = arith.constant 7 : index
    %16 = memref.load %arg1[%c7] : memref<98xf32, #tpu.memory_space<smem>>
    %17 = vector.extract_strided_slice %10 {offsets = [0, 1, 0], sizes = [2, 16, 16], strides = [1, 1, 1]} : vector<2x22x16xf32> to vector<2x16x16xf32>
    %18 = vector.broadcast %16 : f32 to vector<2x16x16xf32>
    %19 = arith.mulf %18, %17 : vector<2x16x16xf32>
    %20 = arith.addf %15, %19 : vector<2x16x16xf32>
    %c14 = arith.constant 14 : index
    %21 = memref.load %arg1[%c14] : memref<98xf32, #tpu.memory_space<smem>>
    %22 = vector.extract_strided_slice %10 {offsets = [0, 2, 0], sizes = [2, 16, 16], strides = [1, 1, 1]} : vector<2x22x16xf32> to vector<2x16x16xf32>
    %23 = vector.broadcast %21 : f32 to vector<2x16x16xf32>
    %24 = arith.mulf %23, %22 : vector<2x16x16xf32>
    %25 = arith.addf %20, %24 : vector<2x16x16xf32>
    %c21 = arith.constant 21 : index
    %26 = memref.load %arg1[%c21] : memref<98xf32, #tpu.memory_space<smem>>
    %27 = vector.extract_strided_slice %10 {offsets = [0, 3, 0], sizes = [2, 16, 16], strides = [1, 1, 1]} : vector<2x22x16xf32> to vector<2x16x16xf32>
    %28 = vector.broadcast %26 : f32 to vector<2x16x16xf32>
    %29 = arith.mulf %28, %27 : vector<2x16x16xf32>
    %30 = arith.addf %25, %29 : vector<2x16x16xf32>
    %c28 = arith.constant 28 : index
    %31 = memref.load %arg1[%c28] : memref<98xf32, #tpu.memory_space<smem>>
    %32 = vector.extract_strided_slice %10 {offsets = [0, 4, 0], sizes = [2, 16, 16], strides = [1, 1, 1]} : vector<2x22x16xf32> to vector<2x16x16xf32>
    %33 = vector.broadcast %31 : f32 to vector<2x16x16xf32>
    %34 = arith.mulf %33, %32 : vector<2x16x16xf32>
    %35 = arith.addf %30, %34 : vector<2x16x16xf32>
    %c35 = arith.constant 35 : index
    %36 = memref.load %arg1[%c35] : memref<98xf32, #tpu.memory_space<smem>>
    %37 = vector.extract_strided_slice %10 {offsets = [0, 5, 0], sizes = [2, 16, 16], strides = [1, 1, 1]} : vector<2x22x16xf32> to vector<2x16x16xf32>
    %38 = vector.broadcast %36 : f32 to vector<2x16x16xf32>
    %39 = arith.mulf %38, %37 : vector<2x16x16xf32>
    %40 = arith.addf %35, %39 : vector<2x16x16xf32>
    %c42 = arith.constant 42 : index
    %41 = memref.load %arg1[%c42] : memref<98xf32, #tpu.memory_space<smem>>
    %42 = vector.extract_strided_slice %10 {offsets = [0, 6, 0], sizes = [2, 16, 16], strides = [1, 1, 1]} : vector<2x22x16xf32> to vector<2x16x16xf32>
    %43 = vector.broadcast %41 : f32 to vector<2x16x16xf32>
    %44 = arith.mulf %43, %42 : vector<2x16x16xf32>
    %45 = arith.addf %40, %44 : vector<2x16x16xf32>
    %46 = vector.extract_strided_slice %9 {offsets = [0, 0, 1], sizes = [2, 22, 16], strides = [1, 1, 1]} : vector<2x22x22xf32> to vector<2x22x16xf32>
    %c1 = arith.constant 1 : index
    %47 = memref.load %arg1[%c1] : memref<98xf32, #tpu.memory_space<smem>>
    %48 = vector.extract_strided_slice %46 {offsets = [0, 0, 0], sizes = [2, 16, 16], strides = [1, 1, 1]} : vector<2x22x16xf32> to vector<2x16x16xf32>
    %49 = vector.broadcast %47 : f32 to vector<2x16x16xf32>
    %50 = arith.mulf %49, %48 : vector<2x16x16xf32>
    %51 = arith.addf %45, %50 : vector<2x16x16xf32>
    %c8 = arith.constant 8 : index
    %52 = memref.load %arg1[%c8] : memref<98xf32, #tpu.memory_space<smem>>
    %53 = vector.extract_strided_slice %46 {offsets = [0, 1, 0], sizes = [2, 16, 16], strides = [1, 1, 1]} : vector<2x22x16xf32> to vector<2x16x16xf32>
    %54 = vector.broadcast %52 : f32 to vector<2x16x16xf32>
    %55 = arith.mulf %54, %53 : vector<2x16x16xf32>
    %56 = arith.addf %51, %55 : vector<2x16x16xf32>
    %c15 = arith.constant 15 : index
    %57 = memref.load %arg1[%c15] : memref<98xf32, #tpu.memory_space<smem>>
    %58 = vector.extract_strided_slice %46 {offsets = [0, 2, 0], sizes = [2, 16, 16], strides = [1, 1, 1]} : vector<2x22x16xf32> to vector<2x16x16xf32>
    %59 = vector.broadcast %57 : f32 to vector<2x16x16xf32>
    %60 = arith.mulf %59, %58 : vector<2x16x16xf32>
    %61 = arith.addf %56, %60 : vector<2x16x16xf32>
    %c22 = arith.constant 22 : index
    %62 = memref.load %arg1[%c22] : memref<98xf32, #tpu.memory_space<smem>>
    %63 = vector.extract_strided_slice %46 {offsets = [0, 3, 0], sizes = [2, 16, 16], strides = [1, 1, 1]} : vector<2x22x16xf32> to vector<2x16x16xf32>
    %64 = vector.broadcast %62 : f32 to vector<2x16x16xf32>
    %65 = arith.mulf %64, %63 : vector<2x16x16xf32>
    %66 = arith.addf %61, %65 : vector<2x16x16xf32>
    %c29 = arith.constant 29 : index
    %67 = memref.load %arg1[%c29] : memref<98xf32, #tpu.memory_space<smem>>
    %68 = vector.extract_strided_slice %46 {offsets = [0, 4, 0], sizes = [2, 16, 16], strides = [1, 1, 1]} : vector<2x22x16xf32> to vector<2x16x16xf32>
    %69 = vector.broadcast %67 : f32 to vector<2x16x16xf32>
    %70 = arith.mulf %69, %68 : vector<2x16x16xf32>
    %71 = arith.addf %66, %70 : vector<2x16x16xf32>
    %c36 = arith.constant 36 : index
    %72 = memref.load %arg1[%c36] : memref<98xf32, #tpu.memory_space<smem>>
    %73 = vector.extract_strided_slice %46 {offsets = [0, 5, 0], sizes = [2, 16, 16], strides = [1, 1, 1]} : vector<2x22x16xf32> to vector<2x16x16xf32>
    %74 = vector.broadcast %72 : f32 to vector<2x16x16xf32>
    %75 = arith.mulf %74, %73 : vector<2x16x16xf32>
    %76 = arith.addf %71, %75 : vector<2x16x16xf32>
    %c43 = arith.constant 43 : index
    %77 = memref.load %arg1[%c43] : memref<98xf32, #tpu.memory_space<smem>>
    %78 = vector.extract_strided_slice %46 {offsets = [0, 6, 0], sizes = [2, 16, 16], strides = [1, 1, 1]} : vector<2x22x16xf32> to vector<2x16x16xf32>
    %79 = vector.broadcast %77 : f32 to vector<2x16x16xf32>
    %80 = arith.mulf %79, %78 : vector<2x16x16xf32>
    %81 = arith.addf %76, %80 : vector<2x16x16xf32>
    %82 = vector.extract_strided_slice %9 {offsets = [0, 0, 2], sizes = [2, 22, 16], strides = [1, 1, 1]} : vector<2x22x22xf32> to vector<2x22x16xf32>
    %c2 = arith.constant 2 : index
    %83 = memref.load %arg1[%c2] : memref<98xf32, #tpu.memory_space<smem>>
    %84 = vector.extract_strided_slice %82 {offsets = [0, 0, 0], sizes = [2, 16, 16], strides = [1, 1, 1]} : vector<2x22x16xf32> to vector<2x16x16xf32>
    %85 = vector.broadcast %83 : f32 to vector<2x16x16xf32>
    %86 = arith.mulf %85, %84 : vector<2x16x16xf32>
    %87 = arith.addf %81, %86 : vector<2x16x16xf32>
    %c9 = arith.constant 9 : index
    %88 = memref.load %arg1[%c9] : memref<98xf32, #tpu.memory_space<smem>>
    %89 = vector.extract_strided_slice %82 {offsets = [0, 1, 0], sizes = [2, 16, 16], strides = [1, 1, 1]} : vector<2x22x16xf32> to vector<2x16x16xf32>
    %90 = vector.broadcast %88 : f32 to vector<2x16x16xf32>
    %91 = arith.mulf %90, %89 : vector<2x16x16xf32>
    %92 = arith.addf %87, %91 : vector<2x16x16xf32>
    %c16 = arith.constant 16 : index
    %93 = memref.load %arg1[%c16] : memref<98xf32, #tpu.memory_space<smem>>
    %94 = vector.extract_strided_slice %82 {offsets = [0, 2, 0], sizes = [2, 16, 16], strides = [1, 1, 1]} : vector<2x22x16xf32> to vector<2x16x16xf32>
    %95 = vector.broadcast %93 : f32 to vector<2x16x16xf32>
    %96 = arith.mulf %95, %94 : vector<2x16x16xf32>
    %97 = arith.addf %92, %96 : vector<2x16x16xf32>
    %c23 = arith.constant 23 : index
    %98 = memref.load %arg1[%c23] : memref<98xf32, #tpu.memory_space<smem>>
    %99 = vector.extract_strided_slice %82 {offsets = [0, 3, 0], sizes = [2, 16, 16], strides = [1, 1, 1]} : vector<2x22x16xf32> to vector<2x16x16xf32>
    %100 = vector.broadcast %98 : f32 to vector<2x16x16xf32>
    %101 = arith.mulf %100, %99 : vector<2x16x16xf32>
    %102 = arith.addf %97, %101 : vector<2x16x16xf32>
    %c30 = arith.constant 30 : index
    %103 = memref.load %arg1[%c30] : memref<98xf32, #tpu.memory_space<smem>>
    %104 = vector.extract_strided_slice %82 {offsets = [0, 4, 0], sizes = [2, 16, 16], strides = [1, 1, 1]} : vector<2x22x16xf32> to vector<2x16x16xf32>
    %105 = vector.broadcast %103 : f32 to vector<2x16x16xf32>
    %106 = arith.mulf %105, %104 : vector<2x16x16xf32>
    %107 = arith.addf %102, %106 : vector<2x16x16xf32>
    %c37 = arith.constant 37 : index
    %108 = memref.load %arg1[%c37] : memref<98xf32, #tpu.memory_space<smem>>
    %109 = vector.extract_strided_slice %82 {offsets = [0, 5, 0], sizes = [2, 16, 16], strides = [1, 1, 1]} : vector<2x22x16xf32> to vector<2x16x16xf32>
    %110 = vector.broadcast %108 : f32 to vector<2x16x16xf32>
    %111 = arith.mulf %110, %109 : vector<2x16x16xf32>
    %112 = arith.addf %107, %111 : vector<2x16x16xf32>
    %c44 = arith.constant 44 : index
    %113 = memref.load %arg1[%c44] : memref<98xf32, #tpu.memory_space<smem>>
    %114 = vector.extract_strided_slice %82 {offsets = [0, 6, 0], sizes = [2, 16, 16], strides = [1, 1, 1]} : vector<2x22x16xf32> to vector<2x16x16xf32>
    %115 = vector.broadcast %113 : f32 to vector<2x16x16xf32>
    %116 = arith.mulf %115, %114 : vector<2x16x16xf32>
    %117 = arith.addf %112, %116 : vector<2x16x16xf32>
    %118 = vector.extract_strided_slice %9 {offsets = [0, 0, 3], sizes = [2, 22, 16], strides = [1, 1, 1]} : vector<2x22x22xf32> to vector<2x22x16xf32>
    %c3_15 = arith.constant 3 : index
    %119 = memref.load %arg1[%c3_15] : memref<98xf32, #tpu.memory_space<smem>>
    %120 = vector.extract_strided_slice %118 {offsets = [0, 0, 0], sizes = [2, 16, 16], strides = [1, 1, 1]} : vector<2x22x16xf32> to vector<2x16x16xf32>
    %121 = vector.broadcast %119 : f32 to vector<2x16x16xf32>
    %122 = arith.mulf %121, %120 : vector<2x16x16xf32>
    %123 = arith.addf %117, %122 : vector<2x16x16xf32>
    %c10 = arith.constant 10 : index
    %124 = memref.load %arg1[%c10] : memref<98xf32, #tpu.memory_space<smem>>
    %125 = vector.extract_strided_slice %118 {offsets = [0, 1, 0], sizes = [2, 16, 16], strides = [1, 1, 1]} : vector<2x22x16xf32> to vector<2x16x16xf32>
    %126 = vector.broadcast %124 : f32 to vector<2x16x16xf32>
    %127 = arith.mulf %126, %125 : vector<2x16x16xf32>
    %128 = arith.addf %123, %127 : vector<2x16x16xf32>
    %c17 = arith.constant 17 : index
    %129 = memref.load %arg1[%c17] : memref<98xf32, #tpu.memory_space<smem>>
    %130 = vector.extract_strided_slice %118 {offsets = [0, 2, 0], sizes = [2, 16, 16], strides = [1, 1, 1]} : vector<2x22x16xf32> to vector<2x16x16xf32>
    %131 = vector.broadcast %129 : f32 to vector<2x16x16xf32>
    %132 = arith.mulf %131, %130 : vector<2x16x16xf32>
    %133 = arith.addf %128, %132 : vector<2x16x16xf32>
    %c24 = arith.constant 24 : index
    %134 = memref.load %arg1[%c24] : memref<98xf32, #tpu.memory_space<smem>>
    %135 = vector.extract_strided_slice %118 {offsets = [0, 3, 0], sizes = [2, 16, 16], strides = [1, 1, 1]} : vector<2x22x16xf32> to vector<2x16x16xf32>
    %136 = vector.broadcast %134 : f32 to vector<2x16x16xf32>
    %137 = arith.mulf %136, %135 : vector<2x16x16xf32>
    %138 = arith.addf %133, %137 : vector<2x16x16xf32>
    %c31 = arith.constant 31 : index
    %139 = memref.load %arg1[%c31] : memref<98xf32, #tpu.memory_space<smem>>
    %140 = vector.extract_strided_slice %118 {offsets = [0, 4, 0], sizes = [2, 16, 16], strides = [1, 1, 1]} : vector<2x22x16xf32> to vector<2x16x16xf32>
    %141 = vector.broadcast %139 : f32 to vector<2x16x16xf32>
    %142 = arith.mulf %141, %140 : vector<2x16x16xf32>
    %143 = arith.addf %138, %142 : vector<2x16x16xf32>
    %c38 = arith.constant 38 : index
    %144 = memref.load %arg1[%c38] : memref<98xf32, #tpu.memory_space<smem>>
    %145 = vector.extract_strided_slice %118 {offsets = [0, 5, 0], sizes = [2, 16, 16], strides = [1, 1, 1]} : vector<2x22x16xf32> to vector<2x16x16xf32>
    %146 = vector.broadcast %144 : f32 to vector<2x16x16xf32>
    %147 = arith.mulf %146, %145 : vector<2x16x16xf32>
    %148 = arith.addf %143, %147 : vector<2x16x16xf32>
    %c45 = arith.constant 45 : index
    %149 = memref.load %arg1[%c45] : memref<98xf32, #tpu.memory_space<smem>>
    %150 = vector.extract_strided_slice %118 {offsets = [0, 6, 0], sizes = [2, 16, 16], strides = [1, 1, 1]} : vector<2x22x16xf32> to vector<2x16x16xf32>
    %151 = vector.broadcast %149 : f32 to vector<2x16x16xf32>
    %152 = arith.mulf %151, %150 : vector<2x16x16xf32>
    %153 = arith.addf %148, %152 : vector<2x16x16xf32>
    %154 = vector.extract_strided_slice %9 {offsets = [0, 0, 4], sizes = [2, 22, 16], strides = [1, 1, 1]} : vector<2x22x22xf32> to vector<2x22x16xf32>
    %c4 = arith.constant 4 : index
    %155 = memref.load %arg1[%c4] : memref<98xf32, #tpu.memory_space<smem>>
    %156 = vector.extract_strided_slice %154 {offsets = [0, 0, 0], sizes = [2, 16, 16], strides = [1, 1, 1]} : vector<2x22x16xf32> to vector<2x16x16xf32>
    %157 = vector.broadcast %155 : f32 to vector<2x16x16xf32>
    %158 = arith.mulf %157, %156 : vector<2x16x16xf32>
    %159 = arith.addf %153, %158 : vector<2x16x16xf32>
    %c11 = arith.constant 11 : index
    %160 = memref.load %arg1[%c11] : memref<98xf32, #tpu.memory_space<smem>>
    %161 = vector.extract_strided_slice %154 {offsets = [0, 1, 0], sizes = [2, 16, 16], strides = [1, 1, 1]} : vector<2x22x16xf32> to vector<2x16x16xf32>
    %162 = vector.broadcast %160 : f32 to vector<2x16x16xf32>
    %163 = arith.mulf %162, %161 : vector<2x16x16xf32>
    %164 = arith.addf %159, %163 : vector<2x16x16xf32>
    %c18 = arith.constant 18 : index
    %165 = memref.load %arg1[%c18] : memref<98xf32, #tpu.memory_space<smem>>
    %166 = vector.extract_strided_slice %154 {offsets = [0, 2, 0], sizes = [2, 16, 16], strides = [1, 1, 1]} : vector<2x22x16xf32> to vector<2x16x16xf32>
    %167 = vector.broadcast %165 : f32 to vector<2x16x16xf32>
    %168 = arith.mulf %167, %166 : vector<2x16x16xf32>
    %169 = arith.addf %164, %168 : vector<2x16x16xf32>
    %c25 = arith.constant 25 : index
    %170 = memref.load %arg1[%c25] : memref<98xf32, #tpu.memory_space<smem>>
    %171 = vector.extract_strided_slice %154 {offsets = [0, 3, 0], sizes = [2, 16, 16], strides = [1, 1, 1]} : vector<2x22x16xf32> to vector<2x16x16xf32>
    %172 = vector.broadcast %170 : f32 to vector<2x16x16xf32>
    %173 = arith.mulf %172, %171 : vector<2x16x16xf32>
    %174 = arith.addf %169, %173 : vector<2x16x16xf32>
    %c32 = arith.constant 32 : index
    %175 = memref.load %arg1[%c32] : memref<98xf32, #tpu.memory_space<smem>>
    %176 = vector.extract_strided_slice %154 {offsets = [0, 4, 0], sizes = [2, 16, 16], strides = [1, 1, 1]} : vector<2x22x16xf32> to vector<2x16x16xf32>
    %177 = vector.broadcast %175 : f32 to vector<2x16x16xf32>
    %178 = arith.mulf %177, %176 : vector<2x16x16xf32>
    %179 = arith.addf %174, %178 : vector<2x16x16xf32>
    %c39 = arith.constant 39 : index
    %180 = memref.load %arg1[%c39] : memref<98xf32, #tpu.memory_space<smem>>
    %181 = vector.extract_strided_slice %154 {offsets = [0, 5, 0], sizes = [2, 16, 16], strides = [1, 1, 1]} : vector<2x22x16xf32> to vector<2x16x16xf32>
    %182 = vector.broadcast %180 : f32 to vector<2x16x16xf32>
    %183 = arith.mulf %182, %181 : vector<2x16x16xf32>
    %184 = arith.addf %179, %183 : vector<2x16x16xf32>
    %c46 = arith.constant 46 : index
    %185 = memref.load %arg1[%c46] : memref<98xf32, #tpu.memory_space<smem>>
    %186 = vector.extract_strided_slice %154 {offsets = [0, 6, 0], sizes = [2, 16, 16], strides = [1, 1, 1]} : vector<2x22x16xf32> to vector<2x16x16xf32>
    %187 = vector.broadcast %185 : f32 to vector<2x16x16xf32>
    %188 = arith.mulf %187, %186 : vector<2x16x16xf32>
    %189 = arith.addf %184, %188 : vector<2x16x16xf32>
    %190 = vector.extract_strided_slice %9 {offsets = [0, 0, 5], sizes = [2, 22, 16], strides = [1, 1, 1]} : vector<2x22x22xf32> to vector<2x22x16xf32>
    %c5 = arith.constant 5 : index
    %191 = memref.load %arg1[%c5] : memref<98xf32, #tpu.memory_space<smem>>
    %192 = vector.extract_strided_slice %190 {offsets = [0, 0, 0], sizes = [2, 16, 16], strides = [1, 1, 1]} : vector<2x22x16xf32> to vector<2x16x16xf32>
    %193 = vector.broadcast %191 : f32 to vector<2x16x16xf32>
    %194 = arith.mulf %193, %192 : vector<2x16x16xf32>
    %195 = arith.addf %189, %194 : vector<2x16x16xf32>
    %c12 = arith.constant 12 : index
    %196 = memref.load %arg1[%c12] : memref<98xf32, #tpu.memory_space<smem>>
    %197 = vector.extract_strided_slice %190 {offsets = [0, 1, 0], sizes = [2, 16, 16], strides = [1, 1, 1]} : vector<2x22x16xf32> to vector<2x16x16xf32>
    %198 = vector.broadcast %196 : f32 to vector<2x16x16xf32>
    %199 = arith.mulf %198, %197 : vector<2x16x16xf32>
    %200 = arith.addf %195, %199 : vector<2x16x16xf32>
    %c19 = arith.constant 19 : index
    %201 = memref.load %arg1[%c19] : memref<98xf32, #tpu.memory_space<smem>>
    %202 = vector.extract_strided_slice %190 {offsets = [0, 2, 0], sizes = [2, 16, 16], strides = [1, 1, 1]} : vector<2x22x16xf32> to vector<2x16x16xf32>
    %203 = vector.broadcast %201 : f32 to vector<2x16x16xf32>
    %204 = arith.mulf %203, %202 : vector<2x16x16xf32>
    %205 = arith.addf %200, %204 : vector<2x16x16xf32>
    %c26 = arith.constant 26 : index
    %206 = memref.load %arg1[%c26] : memref<98xf32, #tpu.memory_space<smem>>
    %207 = vector.extract_strided_slice %190 {offsets = [0, 3, 0], sizes = [2, 16, 16], strides = [1, 1, 1]} : vector<2x22x16xf32> to vector<2x16x16xf32>
    %208 = vector.broadcast %206 : f32 to vector<2x16x16xf32>
    %209 = arith.mulf %208, %207 : vector<2x16x16xf32>
    %210 = arith.addf %205, %209 : vector<2x16x16xf32>
    %c33 = arith.constant 33 : index
    %211 = memref.load %arg1[%c33] : memref<98xf32, #tpu.memory_space<smem>>
    %212 = vector.extract_strided_slice %190 {offsets = [0, 4, 0], sizes = [2, 16, 16], strides = [1, 1, 1]} : vector<2x22x16xf32> to vector<2x16x16xf32>
    %213 = vector.broadcast %211 : f32 to vector<2x16x16xf32>
    %214 = arith.mulf %213, %212 : vector<2x16x16xf32>
    %215 = arith.addf %210, %214 : vector<2x16x16xf32>
    %c40 = arith.constant 40 : index
    %216 = memref.load %arg1[%c40] : memref<98xf32, #tpu.memory_space<smem>>
    %217 = vector.extract_strided_slice %190 {offsets = [0, 5, 0], sizes = [2, 16, 16], strides = [1, 1, 1]} : vector<2x22x16xf32> to vector<2x16x16xf32>
    %218 = vector.broadcast %216 : f32 to vector<2x16x16xf32>
    %219 = arith.mulf %218, %217 : vector<2x16x16xf32>
    %220 = arith.addf %215, %219 : vector<2x16x16xf32>
    %c47 = arith.constant 47 : index
    %221 = memref.load %arg1[%c47] : memref<98xf32, #tpu.memory_space<smem>>
    %222 = vector.extract_strided_slice %190 {offsets = [0, 6, 0], sizes = [2, 16, 16], strides = [1, 1, 1]} : vector<2x22x16xf32> to vector<2x16x16xf32>
    %223 = vector.broadcast %221 : f32 to vector<2x16x16xf32>
    %224 = arith.mulf %223, %222 : vector<2x16x16xf32>
    %225 = arith.addf %220, %224 : vector<2x16x16xf32>
    %226 = vector.extract_strided_slice %9 {offsets = [0, 0, 6], sizes = [2, 22, 16], strides = [1, 1, 1]} : vector<2x22x22xf32> to vector<2x22x16xf32>
    %c6 = arith.constant 6 : index
    %227 = memref.load %arg1[%c6] : memref<98xf32, #tpu.memory_space<smem>>
    %228 = vector.extract_strided_slice %226 {offsets = [0, 0, 0], sizes = [2, 16, 16], strides = [1, 1, 1]} : vector<2x22x16xf32> to vector<2x16x16xf32>
    %229 = vector.broadcast %227 : f32 to vector<2x16x16xf32>
    %230 = arith.mulf %229, %228 : vector<2x16x16xf32>
    %231 = arith.addf %225, %230 : vector<2x16x16xf32>
    %c13 = arith.constant 13 : index
    %232 = memref.load %arg1[%c13] : memref<98xf32, #tpu.memory_space<smem>>
    %233 = vector.extract_strided_slice %226 {offsets = [0, 1, 0], sizes = [2, 16, 16], strides = [1, 1, 1]} : vector<2x22x16xf32> to vector<2x16x16xf32>
    %234 = vector.broadcast %232 : f32 to vector<2x16x16xf32>
    %235 = arith.mulf %234, %233 : vector<2x16x16xf32>
    %236 = arith.addf %231, %235 : vector<2x16x16xf32>
    %c20 = arith.constant 20 : index
    %237 = memref.load %arg1[%c20] : memref<98xf32, #tpu.memory_space<smem>>
    %238 = vector.extract_strided_slice %226 {offsets = [0, 2, 0], sizes = [2, 16, 16], strides = [1, 1, 1]} : vector<2x22x16xf32> to vector<2x16x16xf32>
    %239 = vector.broadcast %237 : f32 to vector<2x16x16xf32>
    %240 = arith.mulf %239, %238 : vector<2x16x16xf32>
    %241 = arith.addf %236, %240 : vector<2x16x16xf32>
    %c27 = arith.constant 27 : index
    %242 = memref.load %arg1[%c27] : memref<98xf32, #tpu.memory_space<smem>>
    %243 = vector.extract_strided_slice %226 {offsets = [0, 3, 0], sizes = [2, 16, 16], strides = [1, 1, 1]} : vector<2x22x16xf32> to vector<2x16x16xf32>
    %244 = vector.broadcast %242 : f32 to vector<2x16x16xf32>
    %245 = arith.mulf %244, %243 : vector<2x16x16xf32>
    %246 = arith.addf %241, %245 : vector<2x16x16xf32>
    %c34 = arith.constant 34 : index
    %247 = memref.load %arg1[%c34] : memref<98xf32, #tpu.memory_space<smem>>
    %248 = vector.extract_strided_slice %226 {offsets = [0, 4, 0], sizes = [2, 16, 16], strides = [1, 1, 1]} : vector<2x22x16xf32> to vector<2x16x16xf32>
    %249 = vector.broadcast %247 : f32 to vector<2x16x16xf32>
    %250 = arith.mulf %249, %248 : vector<2x16x16xf32>
    %251 = arith.addf %246, %250 : vector<2x16x16xf32>
    %c41 = arith.constant 41 : index
    %252 = memref.load %arg1[%c41] : memref<98xf32, #tpu.memory_space<smem>>
    %253 = vector.extract_strided_slice %226 {offsets = [0, 5, 0], sizes = [2, 16, 16], strides = [1, 1, 1]} : vector<2x22x16xf32> to vector<2x16x16xf32>
    %254 = vector.broadcast %252 : f32 to vector<2x16x16xf32>
    %255 = arith.mulf %254, %253 : vector<2x16x16xf32>
    %256 = arith.addf %251, %255 : vector<2x16x16xf32>
    %c48 = arith.constant 48 : index
    %257 = memref.load %arg1[%c48] : memref<98xf32, #tpu.memory_space<smem>>
    %258 = vector.extract_strided_slice %226 {offsets = [0, 6, 0], sizes = [2, 16, 16], strides = [1, 1, 1]} : vector<2x22x16xf32> to vector<2x16x16xf32>
    %259 = vector.broadcast %257 : f32 to vector<2x16x16xf32>
    %260 = arith.mulf %259, %258 : vector<2x16x16xf32>
    %261 = arith.addf %256, %260 : vector<2x16x16xf32>
    %c0_16 = arith.constant 0 : index
    %c0_17 = arith.constant 0 : index
    %c0_18 = arith.constant 0 : index
    %262 = vector.load %arg5[%c0_16, %c0_17, %c0_18] : memref<2x22x22xf32, #tpu.memory_space<vmem>>, vector<2x22x22xf32>
    %263 = vector.extract_strided_slice %262 {offsets = [0, 0, 0], sizes = [2, 22, 16], strides = [1, 1, 1]} : vector<2x22x22xf32> to vector<2x22x16xf32>
    %c49 = arith.constant 49 : index
    %264 = memref.load %arg1[%c49] : memref<98xf32, #tpu.memory_space<smem>>
    %265 = vector.extract_strided_slice %263 {offsets = [0, 0, 0], sizes = [2, 16, 16], strides = [1, 1, 1]} : vector<2x22x16xf32> to vector<2x16x16xf32>
    %266 = vector.broadcast %264 : f32 to vector<2x16x16xf32>
    %267 = arith.mulf %266, %265 : vector<2x16x16xf32>
    %268 = arith.addf %261, %267 : vector<2x16x16xf32>
    %c56 = arith.constant 56 : index
    %269 = memref.load %arg1[%c56] : memref<98xf32, #tpu.memory_space<smem>>
    %270 = vector.extract_strided_slice %263 {offsets = [0, 1, 0], sizes = [2, 16, 16], strides = [1, 1, 1]} : vector<2x22x16xf32> to vector<2x16x16xf32>
    %271 = vector.broadcast %269 : f32 to vector<2x16x16xf32>
    %272 = arith.mulf %271, %270 : vector<2x16x16xf32>
    %273 = arith.addf %268, %272 : vector<2x16x16xf32>
    %c63 = arith.constant 63 : index
    %274 = memref.load %arg1[%c63] : memref<98xf32, #tpu.memory_space<smem>>
    %275 = vector.extract_strided_slice %263 {offsets = [0, 2, 0], sizes = [2, 16, 16], strides = [1, 1, 1]} : vector<2x22x16xf32> to vector<2x16x16xf32>
    %276 = vector.broadcast %274 : f32 to vector<2x16x16xf32>
    %277 = arith.mulf %276, %275 : vector<2x16x16xf32>
    %278 = arith.addf %273, %277 : vector<2x16x16xf32>
    %c70 = arith.constant 70 : index
    %279 = memref.load %arg1[%c70] : memref<98xf32, #tpu.memory_space<smem>>
    %280 = vector.extract_strided_slice %263 {offsets = [0, 3, 0], sizes = [2, 16, 16], strides = [1, 1, 1]} : vector<2x22x16xf32> to vector<2x16x16xf32>
    %281 = vector.broadcast %279 : f32 to vector<2x16x16xf32>
    %282 = arith.mulf %281, %280 : vector<2x16x16xf32>
    %283 = arith.addf %278, %282 : vector<2x16x16xf32>
    %c77 = arith.constant 77 : index
    %284 = memref.load %arg1[%c77] : memref<98xf32, #tpu.memory_space<smem>>
    %285 = vector.extract_strided_slice %263 {offsets = [0, 4, 0], sizes = [2, 16, 16], strides = [1, 1, 1]} : vector<2x22x16xf32> to vector<2x16x16xf32>
    %286 = vector.broadcast %284 : f32 to vector<2x16x16xf32>
    %287 = arith.mulf %286, %285 : vector<2x16x16xf32>
    %288 = arith.addf %283, %287 : vector<2x16x16xf32>
    %c84 = arith.constant 84 : index
    %289 = memref.load %arg1[%c84] : memref<98xf32, #tpu.memory_space<smem>>
    %290 = vector.extract_strided_slice %263 {offsets = [0, 5, 0], sizes = [2, 16, 16], strides = [1, 1, 1]} : vector<2x22x16xf32> to vector<2x16x16xf32>
    %291 = vector.broadcast %289 : f32 to vector<2x16x16xf32>
    %292 = arith.mulf %291, %290 : vector<2x16x16xf32>
    %293 = arith.addf %288, %292 : vector<2x16x16xf32>
    %c91 = arith.constant 91 : index
    %294 = memref.load %arg1[%c91] : memref<98xf32, #tpu.memory_space<smem>>
    %295 = vector.extract_strided_slice %263 {offsets = [0, 6, 0], sizes = [2, 16, 16], strides = [1, 1, 1]} : vector<2x22x16xf32> to vector<2x16x16xf32>
    %296 = vector.broadcast %294 : f32 to vector<2x16x16xf32>
    %297 = arith.mulf %296, %295 : vector<2x16x16xf32>
    %298 = arith.addf %293, %297 : vector<2x16x16xf32>
    %299 = vector.extract_strided_slice %262 {offsets = [0, 0, 1], sizes = [2, 22, 16], strides = [1, 1, 1]} : vector<2x22x22xf32> to vector<2x22x16xf32>
    %c50 = arith.constant 50 : index
    %300 = memref.load %arg1[%c50] : memref<98xf32, #tpu.memory_space<smem>>
    %301 = vector.extract_strided_slice %299 {offsets = [0, 0, 0], sizes = [2, 16, 16], strides = [1, 1, 1]} : vector<2x22x16xf32> to vector<2x16x16xf32>
    %302 = vector.broadcast %300 : f32 to vector<2x16x16xf32>
    %303 = arith.mulf %302, %301 : vector<2x16x16xf32>
    %304 = arith.addf %298, %303 : vector<2x16x16xf32>
    %c57 = arith.constant 57 : index
    %305 = memref.load %arg1[%c57] : memref<98xf32, #tpu.memory_space<smem>>
    %306 = vector.extract_strided_slice %299 {offsets = [0, 1, 0], sizes = [2, 16, 16], strides = [1, 1, 1]} : vector<2x22x16xf32> to vector<2x16x16xf32>
    %307 = vector.broadcast %305 : f32 to vector<2x16x16xf32>
    %308 = arith.mulf %307, %306 : vector<2x16x16xf32>
    %309 = arith.addf %304, %308 : vector<2x16x16xf32>
    %c64 = arith.constant 64 : index
    %310 = memref.load %arg1[%c64] : memref<98xf32, #tpu.memory_space<smem>>
    %311 = vector.extract_strided_slice %299 {offsets = [0, 2, 0], sizes = [2, 16, 16], strides = [1, 1, 1]} : vector<2x22x16xf32> to vector<2x16x16xf32>
    %312 = vector.broadcast %310 : f32 to vector<2x16x16xf32>
    %313 = arith.mulf %312, %311 : vector<2x16x16xf32>
    %314 = arith.addf %309, %313 : vector<2x16x16xf32>
    %c71 = arith.constant 71 : index
    %315 = memref.load %arg1[%c71] : memref<98xf32, #tpu.memory_space<smem>>
    %316 = vector.extract_strided_slice %299 {offsets = [0, 3, 0], sizes = [2, 16, 16], strides = [1, 1, 1]} : vector<2x22x16xf32> to vector<2x16x16xf32>
    %317 = vector.broadcast %315 : f32 to vector<2x16x16xf32>
    %318 = arith.mulf %317, %316 : vector<2x16x16xf32>
    %319 = arith.addf %314, %318 : vector<2x16x16xf32>
    %c78 = arith.constant 78 : index
    %320 = memref.load %arg1[%c78] : memref<98xf32, #tpu.memory_space<smem>>
    %321 = vector.extract_strided_slice %299 {offsets = [0, 4, 0], sizes = [2, 16, 16], strides = [1, 1, 1]} : vector<2x22x16xf32> to vector<2x16x16xf32>
    %322 = vector.broadcast %320 : f32 to vector<2x16x16xf32>
    %323 = arith.mulf %322, %321 : vector<2x16x16xf32>
    %324 = arith.addf %319, %323 : vector<2x16x16xf32>
    %c85 = arith.constant 85 : index
    %325 = memref.load %arg1[%c85] : memref<98xf32, #tpu.memory_space<smem>>
    %326 = vector.extract_strided_slice %299 {offsets = [0, 5, 0], sizes = [2, 16, 16], strides = [1, 1, 1]} : vector<2x22x16xf32> to vector<2x16x16xf32>
    %327 = vector.broadcast %325 : f32 to vector<2x16x16xf32>
    %328 = arith.mulf %327, %326 : vector<2x16x16xf32>
    %329 = arith.addf %324, %328 : vector<2x16x16xf32>
    %c92 = arith.constant 92 : index
    %330 = memref.load %arg1[%c92] : memref<98xf32, #tpu.memory_space<smem>>
    %331 = vector.extract_strided_slice %299 {offsets = [0, 6, 0], sizes = [2, 16, 16], strides = [1, 1, 1]} : vector<2x22x16xf32> to vector<2x16x16xf32>
    %332 = vector.broadcast %330 : f32 to vector<2x16x16xf32>
    %333 = arith.mulf %332, %331 : vector<2x16x16xf32>
    %334 = arith.addf %329, %333 : vector<2x16x16xf32>
    %335 = vector.extract_strided_slice %262 {offsets = [0, 0, 2], sizes = [2, 22, 16], strides = [1, 1, 1]} : vector<2x22x22xf32> to vector<2x22x16xf32>
    %c51 = arith.constant 51 : index
    %336 = memref.load %arg1[%c51] : memref<98xf32, #tpu.memory_space<smem>>
    %337 = vector.extract_strided_slice %335 {offsets = [0, 0, 0], sizes = [2, 16, 16], strides = [1, 1, 1]} : vector<2x22x16xf32> to vector<2x16x16xf32>
    %338 = vector.broadcast %336 : f32 to vector<2x16x16xf32>
    %339 = arith.mulf %338, %337 : vector<2x16x16xf32>
    %340 = arith.addf %334, %339 : vector<2x16x16xf32>
    %c58 = arith.constant 58 : index
    %341 = memref.load %arg1[%c58] : memref<98xf32, #tpu.memory_space<smem>>
    %342 = vector.extract_strided_slice %335 {offsets = [0, 1, 0], sizes = [2, 16, 16], strides = [1, 1, 1]} : vector<2x22x16xf32> to vector<2x16x16xf32>
    %343 = vector.broadcast %341 : f32 to vector<2x16x16xf32>
    %344 = arith.mulf %343, %342 : vector<2x16x16xf32>
    %345 = arith.addf %340, %344 : vector<2x16x16xf32>
    %c65 = arith.constant 65 : index
    %346 = memref.load %arg1[%c65] : memref<98xf32, #tpu.memory_space<smem>>
    %347 = vector.extract_strided_slice %335 {offsets = [0, 2, 0], sizes = [2, 16, 16], strides = [1, 1, 1]} : vector<2x22x16xf32> to vector<2x16x16xf32>
    %348 = vector.broadcast %346 : f32 to vector<2x16x16xf32>
    %349 = arith.mulf %348, %347 : vector<2x16x16xf32>
    %350 = arith.addf %345, %349 : vector<2x16x16xf32>
    %c72 = arith.constant 72 : index
    %351 = memref.load %arg1[%c72] : memref<98xf32, #tpu.memory_space<smem>>
    %352 = vector.extract_strided_slice %335 {offsets = [0, 3, 0], sizes = [2, 16, 16], strides = [1, 1, 1]} : vector<2x22x16xf32> to vector<2x16x16xf32>
    %353 = vector.broadcast %351 : f32 to vector<2x16x16xf32>
    %354 = arith.mulf %353, %352 : vector<2x16x16xf32>
    %355 = arith.addf %350, %354 : vector<2x16x16xf32>
    %c79 = arith.constant 79 : index
    %356 = memref.load %arg1[%c79] : memref<98xf32, #tpu.memory_space<smem>>
    %357 = vector.extract_strided_slice %335 {offsets = [0, 4, 0], sizes = [2, 16, 16], strides = [1, 1, 1]} : vector<2x22x16xf32> to vector<2x16x16xf32>
    %358 = vector.broadcast %356 : f32 to vector<2x16x16xf32>
    %359 = arith.mulf %358, %357 : vector<2x16x16xf32>
    %360 = arith.addf %355, %359 : vector<2x16x16xf32>
    %c86 = arith.constant 86 : index
    %361 = memref.load %arg1[%c86] : memref<98xf32, #tpu.memory_space<smem>>
    %362 = vector.extract_strided_slice %335 {offsets = [0, 5, 0], sizes = [2, 16, 16], strides = [1, 1, 1]} : vector<2x22x16xf32> to vector<2x16x16xf32>
    %363 = vector.broadcast %361 : f32 to vector<2x16x16xf32>
    %364 = arith.mulf %363, %362 : vector<2x16x16xf32>
    %365 = arith.addf %360, %364 : vector<2x16x16xf32>
    %c93 = arith.constant 93 : index
    %366 = memref.load %arg1[%c93] : memref<98xf32, #tpu.memory_space<smem>>
    %367 = vector.extract_strided_slice %335 {offsets = [0, 6, 0], sizes = [2, 16, 16], strides = [1, 1, 1]} : vector<2x22x16xf32> to vector<2x16x16xf32>
    %368 = vector.broadcast %366 : f32 to vector<2x16x16xf32>
    %369 = arith.mulf %368, %367 : vector<2x16x16xf32>
    %370 = arith.addf %365, %369 : vector<2x16x16xf32>
    %371 = vector.extract_strided_slice %262 {offsets = [0, 0, 3], sizes = [2, 22, 16], strides = [1, 1, 1]} : vector<2x22x22xf32> to vector<2x22x16xf32>
    %c52 = arith.constant 52 : index
    %372 = memref.load %arg1[%c52] : memref<98xf32, #tpu.memory_space<smem>>
    %373 = vector.extract_strided_slice %371 {offsets = [0, 0, 0], sizes = [2, 16, 16], strides = [1, 1, 1]} : vector<2x22x16xf32> to vector<2x16x16xf32>
    %374 = vector.broadcast %372 : f32 to vector<2x16x16xf32>
    %375 = arith.mulf %374, %373 : vector<2x16x16xf32>
    %376 = arith.addf %370, %375 : vector<2x16x16xf32>
    %c59 = arith.constant 59 : index
    %377 = memref.load %arg1[%c59] : memref<98xf32, #tpu.memory_space<smem>>
    %378 = vector.extract_strided_slice %371 {offsets = [0, 1, 0], sizes = [2, 16, 16], strides = [1, 1, 1]} : vector<2x22x16xf32> to vector<2x16x16xf32>
    %379 = vector.broadcast %377 : f32 to vector<2x16x16xf32>
    %380 = arith.mulf %379, %378 : vector<2x16x16xf32>
    %381 = arith.addf %376, %380 : vector<2x16x16xf32>
    %c66 = arith.constant 66 : index
    %382 = memref.load %arg1[%c66] : memref<98xf32, #tpu.memory_space<smem>>
    %383 = vector.extract_strided_slice %371 {offsets = [0, 2, 0], sizes = [2, 16, 16], strides = [1, 1, 1]} : vector<2x22x16xf32> to vector<2x16x16xf32>
    %384 = vector.broadcast %382 : f32 to vector<2x16x16xf32>
    %385 = arith.mulf %384, %383 : vector<2x16x16xf32>
    %386 = arith.addf %381, %385 : vector<2x16x16xf32>
    %c73 = arith.constant 73 : index
    %387 = memref.load %arg1[%c73] : memref<98xf32, #tpu.memory_space<smem>>
    %388 = vector.extract_strided_slice %371 {offsets = [0, 3, 0], sizes = [2, 16, 16], strides = [1, 1, 1]} : vector<2x22x16xf32> to vector<2x16x16xf32>
    %389 = vector.broadcast %387 : f32 to vector<2x16x16xf32>
    %390 = arith.mulf %389, %388 : vector<2x16x16xf32>
    %391 = arith.addf %386, %390 : vector<2x16x16xf32>
    %c80 = arith.constant 80 : index
    %392 = memref.load %arg1[%c80] : memref<98xf32, #tpu.memory_space<smem>>
    %393 = vector.extract_strided_slice %371 {offsets = [0, 4, 0], sizes = [2, 16, 16], strides = [1, 1, 1]} : vector<2x22x16xf32> to vector<2x16x16xf32>
    %394 = vector.broadcast %392 : f32 to vector<2x16x16xf32>
    %395 = arith.mulf %394, %393 : vector<2x16x16xf32>
    %396 = arith.addf %391, %395 : vector<2x16x16xf32>
    %c87 = arith.constant 87 : index
    %397 = memref.load %arg1[%c87] : memref<98xf32, #tpu.memory_space<smem>>
    %398 = vector.extract_strided_slice %371 {offsets = [0, 5, 0], sizes = [2, 16, 16], strides = [1, 1, 1]} : vector<2x22x16xf32> to vector<2x16x16xf32>
    %399 = vector.broadcast %397 : f32 to vector<2x16x16xf32>
    %400 = arith.mulf %399, %398 : vector<2x16x16xf32>
    %401 = arith.addf %396, %400 : vector<2x16x16xf32>
    %c94 = arith.constant 94 : index
    %402 = memref.load %arg1[%c94] : memref<98xf32, #tpu.memory_space<smem>>
    %403 = vector.extract_strided_slice %371 {offsets = [0, 6, 0], sizes = [2, 16, 16], strides = [1, 1, 1]} : vector<2x22x16xf32> to vector<2x16x16xf32>
    %404 = vector.broadcast %402 : f32 to vector<2x16x16xf32>
    %405 = arith.mulf %404, %403 : vector<2x16x16xf32>
    %406 = arith.addf %401, %405 : vector<2x16x16xf32>
    %407 = vector.extract_strided_slice %262 {offsets = [0, 0, 4], sizes = [2, 22, 16], strides = [1, 1, 1]} : vector<2x22x22xf32> to vector<2x22x16xf32>
    %c53 = arith.constant 53 : index
    %408 = memref.load %arg1[%c53] : memref<98xf32, #tpu.memory_space<smem>>
    %409 = vector.extract_strided_slice %407 {offsets = [0, 0, 0], sizes = [2, 16, 16], strides = [1, 1, 1]} : vector<2x22x16xf32> to vector<2x16x16xf32>
    %410 = vector.broadcast %408 : f32 to vector<2x16x16xf32>
    %411 = arith.mulf %410, %409 : vector<2x16x16xf32>
    %412 = arith.addf %406, %411 : vector<2x16x16xf32>
    %c60 = arith.constant 60 : index
    %413 = memref.load %arg1[%c60] : memref<98xf32, #tpu.memory_space<smem>>
    %414 = vector.extract_strided_slice %407 {offsets = [0, 1, 0], sizes = [2, 16, 16], strides = [1, 1, 1]} : vector<2x22x16xf32> to vector<2x16x16xf32>
    %415 = vector.broadcast %413 : f32 to vector<2x16x16xf32>
    %416 = arith.mulf %415, %414 : vector<2x16x16xf32>
    %417 = arith.addf %412, %416 : vector<2x16x16xf32>
    %c67 = arith.constant 67 : index
    %418 = memref.load %arg1[%c67] : memref<98xf32, #tpu.memory_space<smem>>
    %419 = vector.extract_strided_slice %407 {offsets = [0, 2, 0], sizes = [2, 16, 16], strides = [1, 1, 1]} : vector<2x22x16xf32> to vector<2x16x16xf32>
    %420 = vector.broadcast %418 : f32 to vector<2x16x16xf32>
    %421 = arith.mulf %420, %419 : vector<2x16x16xf32>
    %422 = arith.addf %417, %421 : vector<2x16x16xf32>
    %c74 = arith.constant 74 : index
    %423 = memref.load %arg1[%c74] : memref<98xf32, #tpu.memory_space<smem>>
    %424 = vector.extract_strided_slice %407 {offsets = [0, 3, 0], sizes = [2, 16, 16], strides = [1, 1, 1]} : vector<2x22x16xf32> to vector<2x16x16xf32>
    %425 = vector.broadcast %423 : f32 to vector<2x16x16xf32>
    %426 = arith.mulf %425, %424 : vector<2x16x16xf32>
    %427 = arith.addf %422, %426 : vector<2x16x16xf32>
    %c81 = arith.constant 81 : index
    %428 = memref.load %arg1[%c81] : memref<98xf32, #tpu.memory_space<smem>>
    %429 = vector.extract_strided_slice %407 {offsets = [0, 4, 0], sizes = [2, 16, 16], strides = [1, 1, 1]} : vector<2x22x16xf32> to vector<2x16x16xf32>
    %430 = vector.broadcast %428 : f32 to vector<2x16x16xf32>
    %431 = arith.mulf %430, %429 : vector<2x16x16xf32>
    %432 = arith.addf %427, %431 : vector<2x16x16xf32>
    %c88 = arith.constant 88 : index
    %433 = memref.load %arg1[%c88] : memref<98xf32, #tpu.memory_space<smem>>
    %434 = vector.extract_strided_slice %407 {offsets = [0, 5, 0], sizes = [2, 16, 16], strides = [1, 1, 1]} : vector<2x22x16xf32> to vector<2x16x16xf32>
    %435 = vector.broadcast %433 : f32 to vector<2x16x16xf32>
    %436 = arith.mulf %435, %434 : vector<2x16x16xf32>
    %437 = arith.addf %432, %436 : vector<2x16x16xf32>
    %c95 = arith.constant 95 : index
    %438 = memref.load %arg1[%c95] : memref<98xf32, #tpu.memory_space<smem>>
    %439 = vector.extract_strided_slice %407 {offsets = [0, 6, 0], sizes = [2, 16, 16], strides = [1, 1, 1]} : vector<2x22x16xf32> to vector<2x16x16xf32>
    %440 = vector.broadcast %438 : f32 to vector<2x16x16xf32>
    %441 = arith.mulf %440, %439 : vector<2x16x16xf32>
    %442 = arith.addf %437, %441 : vector<2x16x16xf32>
    %443 = vector.extract_strided_slice %262 {offsets = [0, 0, 5], sizes = [2, 22, 16], strides = [1, 1, 1]} : vector<2x22x22xf32> to vector<2x22x16xf32>
    %c54 = arith.constant 54 : index
    %444 = memref.load %arg1[%c54] : memref<98xf32, #tpu.memory_space<smem>>
    %445 = vector.extract_strided_slice %443 {offsets = [0, 0, 0], sizes = [2, 16, 16], strides = [1, 1, 1]} : vector<2x22x16xf32> to vector<2x16x16xf32>
    %446 = vector.broadcast %444 : f32 to vector<2x16x16xf32>
    %447 = arith.mulf %446, %445 : vector<2x16x16xf32>
    %448 = arith.addf %442, %447 : vector<2x16x16xf32>
    %c61 = arith.constant 61 : index
    %449 = memref.load %arg1[%c61] : memref<98xf32, #tpu.memory_space<smem>>
    %450 = vector.extract_strided_slice %443 {offsets = [0, 1, 0], sizes = [2, 16, 16], strides = [1, 1, 1]} : vector<2x22x16xf32> to vector<2x16x16xf32>
    %451 = vector.broadcast %449 : f32 to vector<2x16x16xf32>
    %452 = arith.mulf %451, %450 : vector<2x16x16xf32>
    %453 = arith.addf %448, %452 : vector<2x16x16xf32>
    %c68 = arith.constant 68 : index
    %454 = memref.load %arg1[%c68] : memref<98xf32, #tpu.memory_space<smem>>
    %455 = vector.extract_strided_slice %443 {offsets = [0, 2, 0], sizes = [2, 16, 16], strides = [1, 1, 1]} : vector<2x22x16xf32> to vector<2x16x16xf32>
    %456 = vector.broadcast %454 : f32 to vector<2x16x16xf32>
    %457 = arith.mulf %456, %455 : vector<2x16x16xf32>
    %458 = arith.addf %453, %457 : vector<2x16x16xf32>
    %c75 = arith.constant 75 : index
    %459 = memref.load %arg1[%c75] : memref<98xf32, #tpu.memory_space<smem>>
    %460 = vector.extract_strided_slice %443 {offsets = [0, 3, 0], sizes = [2, 16, 16], strides = [1, 1, 1]} : vector<2x22x16xf32> to vector<2x16x16xf32>
    %461 = vector.broadcast %459 : f32 to vector<2x16x16xf32>
    %462 = arith.mulf %461, %460 : vector<2x16x16xf32>
    %463 = arith.addf %458, %462 : vector<2x16x16xf32>
    %c82 = arith.constant 82 : index
    %464 = memref.load %arg1[%c82] : memref<98xf32, #tpu.memory_space<smem>>
    %465 = vector.extract_strided_slice %443 {offsets = [0, 4, 0], sizes = [2, 16, 16], strides = [1, 1, 1]} : vector<2x22x16xf32> to vector<2x16x16xf32>
    %466 = vector.broadcast %464 : f32 to vector<2x16x16xf32>
    %467 = arith.mulf %466, %465 : vector<2x16x16xf32>
    %468 = arith.addf %463, %467 : vector<2x16x16xf32>
    %c89 = arith.constant 89 : index
    %469 = memref.load %arg1[%c89] : memref<98xf32, #tpu.memory_space<smem>>
    %470 = vector.extract_strided_slice %443 {offsets = [0, 5, 0], sizes = [2, 16, 16], strides = [1, 1, 1]} : vector<2x22x16xf32> to vector<2x16x16xf32>
    %471 = vector.broadcast %469 : f32 to vector<2x16x16xf32>
    %472 = arith.mulf %471, %470 : vector<2x16x16xf32>
    %473 = arith.addf %468, %472 : vector<2x16x16xf32>
    %c96 = arith.constant 96 : index
    %474 = memref.load %arg1[%c96] : memref<98xf32, #tpu.memory_space<smem>>
    %475 = vector.extract_strided_slice %443 {offsets = [0, 6, 0], sizes = [2, 16, 16], strides = [1, 1, 1]} : vector<2x22x16xf32> to vector<2x16x16xf32>
    %476 = vector.broadcast %474 : f32 to vector<2x16x16xf32>
    %477 = arith.mulf %476, %475 : vector<2x16x16xf32>
    %478 = arith.addf %473, %477 : vector<2x16x16xf32>
    %479 = vector.extract_strided_slice %262 {offsets = [0, 0, 6], sizes = [2, 22, 16], strides = [1, 1, 1]} : vector<2x22x22xf32> to vector<2x22x16xf32>
    %c55 = arith.constant 55 : index
    %480 = memref.load %arg1[%c55] : memref<98xf32, #tpu.memory_space<smem>>
    %481 = vector.extract_strided_slice %479 {offsets = [0, 0, 0], sizes = [2, 16, 16], strides = [1, 1, 1]} : vector<2x22x16xf32> to vector<2x16x16xf32>
    %482 = vector.broadcast %480 : f32 to vector<2x16x16xf32>
    %483 = arith.mulf %482, %481 : vector<2x16x16xf32>
    %484 = arith.addf %478, %483 : vector<2x16x16xf32>
    %c62 = arith.constant 62 : index
    %485 = memref.load %arg1[%c62] : memref<98xf32, #tpu.memory_space<smem>>
    %486 = vector.extract_strided_slice %479 {offsets = [0, 1, 0], sizes = [2, 16, 16], strides = [1, 1, 1]} : vector<2x22x16xf32> to vector<2x16x16xf32>
    %487 = vector.broadcast %485 : f32 to vector<2x16x16xf32>
    %488 = arith.mulf %487, %486 : vector<2x16x16xf32>
    %489 = arith.addf %484, %488 : vector<2x16x16xf32>
    %c69 = arith.constant 69 : index
    %490 = memref.load %arg1[%c69] : memref<98xf32, #tpu.memory_space<smem>>
    %491 = vector.extract_strided_slice %479 {offsets = [0, 2, 0], sizes = [2, 16, 16], strides = [1, 1, 1]} : vector<2x22x16xf32> to vector<2x16x16xf32>
    %492 = vector.broadcast %490 : f32 to vector<2x16x16xf32>
    %493 = arith.mulf %492, %491 : vector<2x16x16xf32>
    %494 = arith.addf %489, %493 : vector<2x16x16xf32>
    %c76 = arith.constant 76 : index
    %495 = memref.load %arg1[%c76] : memref<98xf32, #tpu.memory_space<smem>>
    %496 = vector.extract_strided_slice %479 {offsets = [0, 3, 0], sizes = [2, 16, 16], strides = [1, 1, 1]} : vector<2x22x16xf32> to vector<2x16x16xf32>
    %497 = vector.broadcast %495 : f32 to vector<2x16x16xf32>
    %498 = arith.mulf %497, %496 : vector<2x16x16xf32>
    %499 = arith.addf %494, %498 : vector<2x16x16xf32>
    %c83 = arith.constant 83 : index
    %500 = memref.load %arg1[%c83] : memref<98xf32, #tpu.memory_space<smem>>
    %501 = vector.extract_strided_slice %479 {offsets = [0, 4, 0], sizes = [2, 16, 16], strides = [1, 1, 1]} : vector<2x22x16xf32> to vector<2x16x16xf32>
    %502 = vector.broadcast %500 : f32 to vector<2x16x16xf32>
    %503 = arith.mulf %502, %501 : vector<2x16x16xf32>
    %504 = arith.addf %499, %503 : vector<2x16x16xf32>
    %c90 = arith.constant 90 : index
    %505 = memref.load %arg1[%c90] : memref<98xf32, #tpu.memory_space<smem>>
    %506 = vector.extract_strided_slice %479 {offsets = [0, 5, 0], sizes = [2, 16, 16], strides = [1, 1, 1]} : vector<2x22x16xf32> to vector<2x16x16xf32>
    %507 = vector.broadcast %505 : f32 to vector<2x16x16xf32>
    %508 = arith.mulf %507, %506 : vector<2x16x16xf32>
    %509 = arith.addf %504, %508 : vector<2x16x16xf32>
    %c97 = arith.constant 97 : index
    %510 = memref.load %arg1[%c97] : memref<98xf32, #tpu.memory_space<smem>>
    %511 = vector.extract_strided_slice %479 {offsets = [0, 6, 0], sizes = [2, 16, 16], strides = [1, 1, 1]} : vector<2x22x16xf32> to vector<2x16x16xf32>
    %512 = vector.broadcast %510 : f32 to vector<2x16x16xf32>
    %513 = arith.mulf %512, %511 : vector<2x16x16xf32>
    %514 = arith.addf %509, %513 : vector<2x16x16xf32>
    %515 = arith.negf %514 : vector<2x16x16xf32>
    %516 = math.exp %515 : vector<2x16x16xf32>
    %cst_19 = arith.constant 1.000000e+00 : f32
    %517 = vector.broadcast %cst_19 : f32 to vector<2x16x16xf32>
    %518 = arith.addf %517, %516 : vector<2x16x16xf32>
    %519 = arith.divf %517, %518 : vector<2x16x16xf32>
    %c0_20 = arith.constant 0 : index
    %c0_21 = arith.constant 0 : index
    %c0_22 = arith.constant 0 : index
    %c0_23 = arith.constant 0 : index
    %520 = vector.load %arg3[%c0_20, %c0_21, %c0_22, %c0_23] : memref<2x1x16x16xf32, #tpu.memory_space<vmem>>, vector<2x1x16x16xf32>
    %521 = vector.shape_cast %520 : vector<2x1x16x16xf32> to vector<2x16x16xf32>
    %522 = vector.shape_cast %519 : vector<2x16x16xf32> to vector<2x1x16x16xf32>
    tpu.vector_store %arg3[%c0_20, %c0_21, %c0_22, %c0_23], %522 {strides = array<i32>} : memref<2x1x16x16xf32, #tpu.memory_space<vmem>>, vector<2x1x16x16xf32>,
    return
  }
  func.func @transform_0(%arg0: i32) -> i32 {
    %c0_i32 = arith.constant 0 : i32
    %c0_i32_0 = arith.constant 0 : i32
    return %c0_i32 : i32
  }
  func.func @transform_1(%arg0: i32) -> (i32, i32, i32, i32) {
    %c0_i32 = arith.constant 0 : i32
    %c0_i32_0 = arith.constant 0 : i32
    %c0_i32_1 = arith.constant 0 : i32
    %c0_i32_2 = arith.constant 0 : i32
    return %arg0, %c0_i32, %c0_i32_0, %c0_i32_1 : i32, i32, i32, i32
  }
  func.func @transform_2(%arg0: i32) -> (i32, i32, i32, i32) {
    %c0_i32 = arith.constant 0 : i32
    %c0_i32_0 = arith.constant 0 : i32
    %c0_i32_1 = arith.constant 0 : i32
    %c0_i32_2 = arith.constant 0 : i32
    return %arg0, %c0_i32, %c0_i32_0, %c0_i32_1 : i32, i32, i32, i32
  }
}

</mosaic_0001>

<bundles_post_ra>
// kernel: tpu_custom_call.1
= control target key start
LH: loop header
LB: loop body
LE: loop exit
PB: predicated region body
PF: predicated region fallthrough
CT: control target
= control target key end

     0   :  { %7 = vsyncpa [#allocation7], 0  ;;  %s6827_s0 = inlined_call_operand.hbm [shape: f32[98], index: 0, kind: input, shape index: {}]   ;;  %s6828_s1 = inlined_call_operand.hbm [shape: f32[2,4,16,16], index: 1, kind: input, shape index: {}]   ;;  %s6829_s2 = inlined_call_operand.hbm [shape: f32[2,1,16,16], index: 2, kind: output, shape index: {}]  }
   0x1   :  { %8 = vsyncpa [#allocation5], 0 }
   0x2   :  { %9 = vsyncpa [#allocation6], 0  ;;  %s15_s11 = sshll.u32 %s6827_s0, 4  ;;  %s23_s14 = sshll.u32 %s6828_s1, 4  ;;  %s16_s11 = int_to_ptr.hbm [resolvable:$true] %s15_s11  ;;  %s24_s14 = int_to_ptr.hbm [resolvable:$true] %s23_s14 }
   0x3   :  { %s4106_s15 = smov [#allocation4]   ;;  %s4107_s16 = smov [#allocation8]  }
   0x4   :  { %18 = dma.hbm_to_smem %s16_s11, 16, %s4106_s15, [#allocation7]  }
   0x5   :  { %s25_s17 = sshll.u32 %s4107_s16, 4  ;;  %s4108_s18 = smov 128   ;;  %s26_s17 = int_to_ptr.vmem [resolvable:$true] %s25_s17 }
   0x6   :  { %s4109_s19 = smov 8  }
   0x7   :  { %31 = dma.hbm_to_vmem [thread:$0]  %s24_s14, 2048, %s26_s17, [#allocation5], %s4108_s18, %s4108_s18, %s4109_s19  }
   0x8   :  { %4100 = dma.done.wait [#allocation7], 16  }
   0x9   :  { %4101 = vsyncadd [#allocation7], 4294967280 }
   0xa   :  { %4102 = dma.done.wait [#allocation5], 2048  }
   0xb   :  { %4103 = vsyncadd [#allocation5], 4294965248 }
   0xc   :  { %40 = sfence }
   0xd   :  { %v4143_v0 = vld [vmem:[#allocation8 + $0x40] sm:$0xff]  ;;  %v4145_v1 = vld [vmem:[#allocation8 + $0x50] sm:$0xff]  ;;  %vm57_vm0 = vcmask 130048   ;;  %v50_v16 = vld [vmem:[#allocation8 + $0x48] sm:$0xff]  ;;  %vm118_vm1 = vcmask 179200   ;;  %s4110_s0 = smov 3  }
   0xe   :  { %v4147_v2 = vld [vmem:[#allocation8 + $0x60] sm:$0xff]  ;;  %v4149_v3 = vld [vmem:[#allocation8 + $0x70] sm:$0xff]  ;;  %v72_v4 = vsel %vm57_vm0, %v4143_v0, 0.0  ;;  %v73_v5 = vsel %vm57_vm0, %v4145_v1, 0.0  ;;  %v52_v17 = vld [vmem:[#allocation8 + $0x58] sm:$0xff]  ;;  %v79_v21 = vsel %vm57_vm0, %v50_v16, 0.0 }
   0xf   :  { %v75_v6 = vsel %vm57_vm0, %v4147_v2, 0.0  ;;  %v41_v7 = vld [vmem:[#allocation8] sm:$0xff]  ;;  %v74_v8 = vadd.f32 %v73_v5, %v72_v4  ;;  %v43_v9 = vld [vmem:[#allocation8 + $0x10] sm:$0xff]  ;;  %v77_v12 = vsel %vm57_vm0, %v4149_v3, 0.0  ;;  %v54_v20 = vld [vmem:[#allocation8 + $0x68] sm:$0xff]  ;;  %v80_v24 = vsel %vm57_vm0, %v52_v17, 0.0 }
  0x10   :  { %v45_v10 = vld [vmem:[#allocation8 + $0x20] sm:$0xff]  ;;  %v47_v11 = vld [vmem:[#allocation8 + $0x30] sm:$0xff]  ;;  %v58_v13 = vsel %vm57_vm0, %v41_v7, 0.0  ;;  %v59_v14 = vsel %vm57_vm0, %v43_v9, 0.0  ;;  %v42_v22 = vld [vmem:[#allocation8 + $0x8] sm:$0xff]  ;;  %v82_v25 = vsel %vm57_vm0, %v54_v20, 0.0  ;;  %v81_v31 = vadd.f32 %v80_v24, %v79_v21 }
  0x11   :  { %v61_v15 = vsel %vm57_vm0, %v45_v10, 0.0  ;;  %v76_v18 = vadd.f32 %v75_v6, %v74_v8  ;;  %v60_v19 = vadd.f32 %v59_v14, %v58_v13  ;;  %v63_v23 = vsel %vm57_vm0, %v47_v11, 0.0  ;;  %v44_v26 = vld [vmem:[#allocation8 + $0x18] sm:$0xff]  ;;  %v46_v27 = vld [vmem:[#allocation8 + $0x28] sm:$0xff]  ;;  %s3893_s1 = sld [smem:[#allocation4 + $0x1]]  ;;  %s4112_s21 = smov 127  }
  0x12   :  { %v56_v30 = vld [vmem:[#allocation8 + $0x78] sm:$0xff]  ;;  %v65_v32 = vsel %vm57_vm0, %v42_v22, 0.0  ;;  %v66_v33 = vsel %vm57_vm0, %v44_v26, 0.0  ;;  %v68_v34 = vsel %vm57_vm0, %v46_v27, 0.0  ;;  %v86_v35 = vsel %vm57_vm0, %v41_v7, -inf  ;;  %s3900_s20 = sld [smem:[#allocation4 + $0x2]] }
  0x13   :  { %v78_v28 = vadd.f32 %v77_v12, %v76_v18  ;;  %v62_v29 = vadd.f32 %v61_v15, %v60_v19  ;;  %v83_v37 = vadd.f32 %v82_v25, %v81_v31  ;;  %v48_v38 = vld [vmem:[#allocation8 + $0x38] sm:$0xff]  ;;  %v67_v39 = vadd.f32 %v66_v33, %v65_v32  ;;  %s3894_s22 = sld [smem:[#allocation4 + $0x8]]  ;;  %s4113_s24 = smov 126  }
  0x14   :  { %v87_v40 = vsel %vm57_vm0, %v43_v9, -inf  ;;  %v84_v41 = vsel %vm57_vm0, %v56_v30, 0.0  ;;  %v89_v43 = vsel %vm57_vm0, %v45_v10, -inf  ;;  %v91_v45 = vsel %vm57_vm0, %v47_v11, -inf  ;;  %s3895_s23 = sld [smem:[#allocation4 + $0xf]]  ;;  %s4114_s9 = smov 125  }
  0x15   :  { %140 = vrot.lane.b32.xlu1 %v78_v28, %s4110_s0  ;;  %v64_v36 = vadd.f32 %v63_v23, %v62_v29  ;;  %v88_v42 = vmax.f32 %v86_v35, %v87_v40  ;;  %v69_v44 = vadd.f32 %v68_v34, %v67_v39  ;;  %v4111_v46 = vmov 0.0   ;;  %s3896_s25 = sld [smem:[#allocation4 + $0x16]] }
  0x16   :  { %123 = vst.msk [vmem:[#allocation2 + $0x18] sm:$0xff] %vm118_vm1, %v4111_v46  ;;  %v70_v47 = vsel %vm57_vm0, %v48_v38, 0.0  ;;  %v85_v49 = vadd.f32 %v84_v41, %v83_v37  ;;  %v107_v52 = vsel %vm57_vm0, %v50_v16, -inf  ;;  %v108_v53 = vsel %vm57_vm0, %v52_v17, -inf  ;;  %s3897_s26 = sld [smem:[#allocation4 + $0x1d]] }
  0x17   :  { %136 = vrot.lane.b32.xlu0 %v64_v36, %s4110_s0  ;;  %v90_v48 = vmax.f32 %v88_v42, %v89_v43  ;;  %124 = vst.msk [vmem:[#allocation2 + $0x20] sm:$0xff] %vm118_vm1, %v4111_v46  ;;  %v71_v51 = vadd.f32 %v70_v47, %v69_v44  ;;  %v93_v54 = vsel %vm57_vm0, %v42_v22, -inf  ;;  %v94_v55 = vsel %vm57_vm0, %v44_v26, -inf  ;;  %s3898_s27 = sld [smem:[#allocation4 + $0x24]] }
  0x18   :  { %119 = vst.msk [vmem:[#allocation2] sm:$0xff] %vm118_vm1, %v4111_v46  ;;  %v109_v56 = vmax.f32 %v107_v52, %v108_v53  ;;  %v95_v57 = vmax.f32 %v93_v54, %v94_v55  ;;  %v110_v58 = vsel %vm57_vm0, %v54_v20, -inf  ;;  %v96_v59 = vsel %vm57_vm0, %v46_v27, -inf  ;;  %s3899_s28 = sld [smem:[#allocation4 + $0x2b]] }
  0x19   :  { %v92_v50 = vmax.f32 %v90_v48, %v91_v45  ;;  %120 = vst.msk [vmem:[#allocation2 + $0x8] sm:$0xff] %vm118_vm1, %v4111_v46  ;;  %v112_v62 = vsel %vm57_vm0, %v56_v30, -inf  ;;  %v98_v63 = vsel %vm57_vm0, %v48_v38, -inf  ;;  %v100_v6 = vsel %vm57_vm0, %v4143_v0, -inf  ;;  %s3901_s29 = sld [smem:[#allocation4 + $0x9]] }
  0x1a   :  { %126 = vst.msk [vmem:[#allocation3] sm:$0xff] %vm118_vm1, %v4111_v46  ;;  %v111_v60 = vmax.f32 %v109_v56, %v110_v58  ;;  %v97_v61 = vmax.f32 %v95_v57, %v96_v59  ;;  %v101_v7 = vsel %vm57_vm0, %v4145_v1, -inf  ;;  %v103_v8 = vsel %vm57_vm0, %v4147_v2, -inf  ;;  %s3902_s30 = sld [smem:[#allocation4 + $0x10]] }
  0x1b   :  { %157 = vrot.lane.b32.xlu2 %v92_v50, %s4110_s0  ;;  %127 = vst.msk [vmem:[#allocation3 + $0x8] sm:$0xff] %vm118_vm1, %v4111_v46  ;;  %v102_v9 = vmax.f32 %v100_v6, %v101_v7  ;;  %v105_v10 = vsel %vm57_vm0, %v4149_v3, -inf  ;;  %vm121_vm2 = vcmask 177152   ;;  %vm148_vm3 = vcmask 154648   ;;  %s3903_s3 = sld [smem:[#allocation4 + $0x17]] }
  0x1c   :  { %129 = vst.msk [vmem:[#allocation3 + $0x18] sm:$0xff] %vm118_vm1, %v4111_v46  ;;  %v113_v4 = vmax.f32 %v111_v60, %v112_v62  ;;  %v99_v5 = vmax.f32 %v97_v61, %v98_v63  ;;  %v388_v2 = vstv %s3893_s1  ;;  %v654_v22 = vstv %s3900_s20  ;;  %s3904_s4 = sld [smem:[#allocation4 + $0x1e]] }
  0x1d   :  { %142 = vrot.lane.b32.xlu1 %v85_v49, %s4110_s0  ;;  %130 = vst.msk [vmem:[#allocation3 + $0x20] sm:$0xff] %vm118_vm1, %v4111_v46  ;;  %v104_v11 = vmax.f32 %v102_v9, %v103_v8  ;;  %v414_v25 = vstv %s3894_s22  ;;  %vm203_vm4 = vcmask 1046528   ;;  %v454_v32 = vstv %s3895_s23  ;;  %s3905_s5 = sld [smem:[#allocation4 + $0x25]] }
  0x1e   :  { %125 = vst.msk [vmem:[#allocation2 + $0x28] sm:$0x3f] %vm121_vm2, %v4111_v46  ;;  %vm236_vm5 = vcmask 1045504   ;;  %v494_v53 = vstv %s3896_s25  ;;  %vm269_vm6 = vcmask 1044480   ;;  %v4270_v9 = vstv %s3897_s26  ;;  %s3906_s6 = sld [smem:[#allocation4 + $0x2c]] }
  0x1f   :  { %138 = vrot.lane.b32.xlu0 %v71_v51, %s4110_s0  ;;  %122 = vst.msk [vmem:[#allocation2 + $0x10] sm:$0x3f] %vm121_vm2, %v4111_v46  ;;  %v106_v12 = vmax.f32 %v104_v11, %v105_v10  ;;  %vm302_vm7 = vcmask 1043456   ;;  %vm335_vm8 = vcmask 1042432   ;;  %vm368_vm9 = vcmask 1041408   ;;  %s3907_s7 = sld [smem:[#allocation4 + $0x3]] }
  0x20   :  { %128 = vst.msk [vmem:[#allocation3 + $0x10] sm:$0x3f] %vm121_vm2, %v4111_v46  ;;  %s3908_s8 = sld [smem:[#allocation4 + $0xa]] }
  0x21   :  { %131 = vst.msk [vmem:[#allocation3 + $0x28] sm:$0x3f] %vm121_vm2, %v4111_v46  ;;  %s3909_s10 = sld [smem:[#allocation4 + $0x11]] }
  0x22   :  { %s3910_s11 = sld [smem:[#allocation4 + $0x18]] }
  0x23   :  { %159 = vrot.lane.b32.xlu2 %v99_v5, %s4110_s0  ;;  %s3911_s12 = sld [smem:[#allocation4 + $0x1f]] }
  0x24   :  { %s3912_s13 = sld [smem:[#allocation4 + $0x26]] }
  0x25   :  { %163 = vrot.lane.b32.xlu1 %v113_v4, %s4110_s0  ;;  %s3913_s14 = sld [smem:[#allocation4 + $0x2d]] }
  0x26   :  { %s3914_s15 = sld [smem:[#allocation4 + $0x4]] }
  0x27   :  { %161 = vrot.lane.b32.xlu0 %v106_v12, %s4110_s0  ;;  %s3915_s16 = sld [smem:[#allocation4 + $0xb]]  ;;  %s4115_s0 = smov 124  }
  0x28   :  { %s3916_s17 = sld [smem:[#allocation4 + $0x12]] }
  0x29   :  { %s3917_s1 = sld [smem:[#allocation4 + $0x19]] }
  0x2a   :  { %s3918_s20 = sld [smem:[#allocation4 + $0x20]] }
  0x2b   :  { %s3919_s22 = sld [smem:[#allocation4 + $0x27]] }
  0x2c   :  { %s3920_s23 = sld [smem:[#allocation4 + $0x2e]] }
  0x2d   :  { %s3921_s25 = sld [smem:[#allocation4 + $0x5]] }
  0x2e   :  { %s3922_s26 = sld [smem:[#allocation4 + $0xc]] }
  0x87   :  { %v141_v0 = vpop.permute.xlu1 %140 }
  0x88   :  { %151 = vst.msk [vmem:[#allocation2 + $0x1b] sm:$0xff] %vm148_vm3, %v141_v0 }
  0x89   :  { %v137_v1 = vpop.permute.xlu0 %136 }
  0x8a   :  { %149 = vst.msk [vmem:[#allocation2 + $0x3] sm:$0xff] %vm148_vm3, %v137_v1 }
  0x8f   :  { %v4209_v13 = vld [vmem:[#allocation2 + $0x18] sm:$0xff]  ;;  %v143_v3 = vpop.permute.xlu1 %142 }
  0x90   :  { %152 = vst.msk [vmem:[#allocation2 + $0x23] sm:$0xff] %vm148_vm3, %v143_v3  ;;  %v391_v14 = vmul.f32 %v388_v2, %v4209_v13  ;;  %v657_v30 = vmul.f32 %v654_v22, %v4209_v13  ;;  %v418_v31 = vmul.f32 %v414_v25, %v4209_v13  ;;  %v498_v55 = vmul.f32 %v494_v53, %v4209_v13  ;;  %v158_v3 = vpop.permute.xlu2 %157 }
  0x91   :  { %v4213_v15 = vld [vmem:[#allocation2] sm:$0xff]  ;;  %v139_v16 = vpop.permute.xlu0 %138  ;;  %169 = vst.msk [vmem:[#allocation3 + $0x3] sm:$0xff] %vm148_vm3, %v158_v3 }
  0x92   :  { %150 = vst.msk [vmem:[#allocation2 + $0xb] sm:$0xff] %vm148_vm3, %v139_v16  ;;  %401 = vrot.lane.b32.xlu1 %v391_v14, %s4112_s21  ;;  %v389_v17 = vmul.f32 %v388_v2, %v4213_v15  ;;  %v655_v34 = vmul.f32 %v654_v22, %v4213_v15  ;;  %v455_v37 = vmul.f32 %v454_v32, %v4213_v15  ;;  %v432_v38 = vrot.slane %v418_v31, 1 }
  0x93   :  { %v415_v49 = vmul.f32 %v414_v25, %v4213_v15  ;;  %v495_v62 = vmul.f32 %v494_v53, %v4213_v15  ;;  %v512_v4 = vrot.slane %v498_v55, 3 }
  0x94   :  { %397 = vrot.lane.b32.xlu2 %v389_v17, %s4112_s21  ;;  %v467_v42 = vrot.slane %v455_v37, 2 }
  0x95   :  { %v427_v54 = vrot.slane %v415_v49, 1  ;;  %v507_v7 = vrot.slane %v495_v62, 3 }
  0x97   :  { %v4219_v18 = vld [vmem:[#allocation2 + $0x20] sm:$0xff]  ;;  %v4243_v41 = vld [vmem:[#allocation2 + $0x28] sm:$0x3f] }
  0x98   :  { %v392_v19 = vmul.f32 %v388_v2, %v4219_v18  ;;  %v419_v35 = vmul.f32 %v414_v25, %v4219_v18  ;;  %v658_v43 = vmul.f32 %v654_v22, %v4219_v18  ;;  %v459_v44 = vmul.f32 %v454_v32, %v4219_v18  ;;  %v160_v31 = vpop.permute.xlu2 %159 }
  0x99   :  { %v4222_v20 = vld [vmem:[#allocation2 + $0x8] sm:$0xff]  ;;  %v4224_v21 = vld [vmem:[#allocation2 + $0x10] sm:$0x3f]  ;;  %v460_v48 = vmul.f32 %v454_v32, %v4243_v41  ;;  %v499_v59 = vmul.f32 %v494_v53, %v4219_v18  ;;  %v420_v61 = vmul.f32 %v414_v25, %v4243_v41  ;;  %v500_v8 = vmul.f32 %v494_v53, %v4243_v41  ;;  %170 = vst.msk [vmem:[#allocation3 + $0xb] sm:$0xff] %vm148_vm3, %v160_v31 }
  0x9a   :  { %v656_v23 = vmul.f32 %v654_v22, %v4222_v20  ;;  %v390_v24 = vmul.f32 %v388_v2, %v4222_v20  ;;  %v416_v26 = vmul.f32 %v414_v25, %v4222_v20  ;;  %v417_v27 = vmul.f32 %v414_v25, %v4224_v21 }
  0x9b   :  { %v456_v36 = vmul.f32 %v454_v32, %v4222_v20  ;;  %v433_v39 = vrot.slane %v419_v35, 1  ;;  %v457_v47 = vmul.f32 %v454_v32, %v4224_v21  ;;  %v473_v51 = vrot.slane %v459_v44, 2 }
  0x9c   :  { %403 = vrot.lane.b32.xlu2 %v392_v19, %s4112_s21  ;;  %665 = vrot.lane.b32.xlu1 %v656_v23, %s4113_s24  ;;  %v428_v28 = vrot.slane %v416_v26, 1  ;;  %v430_v29 = vrot.slane %v417_v27, 1  ;;  %v475_v52 = vrot.slane %v460_v48, 2  ;;  %v4259_v58 = vmul.f32 %v494_v53, %v4222_v20 }
  0x9d   :  { %399 = vrot.lane.b32.xlu0 %v390_v24, %s4112_s21  ;;  %v468_v40 = vrot.slane %v456_v36, 2  ;;  %v434_v45 = vsel %vm203_vm4, %v432_v38, %v433_v39  ;;  %v470_v50 = vrot.slane %v457_v47, 2  ;;  %v513_v5 = vrot.slane %v499_v59, 3 }
  0x9e   :  { %v431_v33 = vsel %vm203_vm4, %v428_v28, %v430_v29  ;;  %v476_v57 = vsel %vm236_vm5, %v473_v51, %v475_v52  ;;  %v429_v60 = vsel %vm203_vm4, %v427_v54, %v428_v28  ;;  %v508_v63 = vrot.slane %v4259_v58, 3 }
  0x9f   :  { %v469_v46 = vsel %vm236_vm5, %v467_v42, %v468_v40  ;;  %v471_v56 = vsel %vm236_vm5, %v468_v40, %v470_v50  ;;  %v435_v6 = vrot.slane %v420_v61, 1  ;;  %v514_v11 = vsel %vm269_vm6, %v512_v4, %v513_v5 }
  0xa0   :  { %v509_v10 = vsel %vm269_vm6, %v507_v7, %v508_v63  ;;  %v536_v12 = vmul.f32 %v4270_v9, %v4222_v20  ;;  %v537_v0 = vmul.f32 %v4270_v9, %v4224_v21  ;;  %v458_v2 = vmul.f32 %v454_v32, %v4209_v13 }
  0xa1   :  { %v436_v1 = vsel %vm203_vm4, %v433_v39, %v435_v6  ;;  %v515_v14 = vrot.slane %v500_v8, 3  ;;  %v538_v22 = vmul.f32 %v4270_v9, %v4209_v13  ;;  %v574_v23 = vstv %s3898_s27  ;;  %s4116_s27 = smov 123  }
  0xa2   :  { %v548_v16 = vrot.slane %v536_v12, 4  ;;  %v550_v17 = vrot.slane %v537_v0, 4  ;;  %v472_v19 = vrot.slane %v458_v2, 2  ;;  %v539_v26 = vmul.f32 %v4270_v9, %v4219_v18 }
  0xa3   :  { %v516_v24 = vsel %vm269_vm6, %v513_v5, %v515_v14  ;;  %v576_v27 = vmul.f32 %v574_v23, %v4222_v20  ;;  %v497_v29 = vmul.f32 %v494_v53, %v4224_v21  ;;  %v552_v32 = vrot.slane %v538_v22, 4 }
  0xa4   :  { %667 = vrot.lane.b32.xlu2 %v657_v30, %s4113_s24  ;;  %439 = vrot.lane.b32.xlu1 %v431_v33, %s4112_s21  ;;  %v551_v25 = vsel %vm302_vm7, %v548_v16, %v550_v17  ;;  %v474_v28 = vsel %vm236_vm5, %v472_v19, %v473_v51  ;;  %v575_v30 = vmul.f32 %v574_v23, %v4213_v15  ;;  %v553_v33 = vrot.slane %v539_v26, 4 }
  0xa5   :  { %663 = vrot.lane.b32.xlu0 %v655_v34, %s4113_s24  ;;  %v588_v34 = vrot.slane %v576_v27, 5  ;;  %v510_v35 = vrot.slane %v497_v29, 3  ;;  %v577_v37 = vmul.f32 %v574_v23, %v4224_v21  ;;  %v579_v40 = vmul.f32 %v574_v23, %v4219_v18  ;;  %v162_v27 = vpop.permute.xlu0 %161 }
  0xa6   :  { %v587_v36 = vrot.slane %v575_v30, 5  ;;  %v554_v38 = vsel %vm302_vm7, %v552_v32, %v553_v33  ;;  %v580_v42 = vmul.f32 %v574_v23, %v4243_v41  ;;  %v535_v44 = vmul.f32 %v4270_v9, %v4213_v15  ;;  %171 = vst.msk [vmem:[#allocation3 + $0x1b] sm:$0xff] %vm148_vm3, %v162_v27 }
  0xa7   :  { %v614_v48 = vstv %s3899_s28  ;;  %v720_v29 = vstv %s3902_s30  ;;  %s3923_s28 = sld [smem:[#allocation4 + $0x13]] }
  0xa8   :  { %v589_v39 = vsel %vm335_vm8, %v587_v36, %v588_v34  ;;  %v595_v47 = vrot.slane %v580_v42, 5  ;;  %v547_v49 = vrot.slane %v535_v44, 4  ;;  %v618_v50 = vmul.f32 %v614_v48, %v4209_v13  ;;  %s3925_s30 = sld [smem:[#allocation4 + $0x21]] }
  0xa9   :  { %v616_v53 = vmul.f32 %v614_v48, %v4222_v20  ;;  %v619_v54 = vmul.f32 %v614_v48, %v4219_v18  ;;  %v620_v6 = vmul.f32 %v614_v48, %v4243_v41  ;;  %v722_v30 = vmul.f32 %v720_v29, %v4222_v20 }
  0xaa   :  { %v549_v55 = vsel %vm302_vm7, %v547_v49, %v548_v16  ;;  %v632_v59 = vrot.slane %v618_v50, 6  ;;  %v721_v36 = vmul.f32 %v720_v29, %v4213_v15 }
  0xab   :  { %v628_v58 = vrot.slane %v616_v53, 6  ;;  %v635_v12 = vrot.slane %v620_v6, 6 }
  0xac   :  { %441 = vrot.lane.b32.xlu2 %v434_v45, %s4112_s21  ;;  %477 = vrot.lane.b32.xlu1 %v469_v46, %s4112_s21  ;;  %v590_v45 = vrot.slane %v577_v37, 5  ;;  %v593_v46 = vrot.slane %v579_v40, 5 }
  0xad   :  { %669 = vrot.lane.b32.xlu0 %v658_v43, %s4113_s24  ;;  %v511_v43 = vsel %vm269_vm6, %v508_v63, %v510_v35  ;;  %v680_v63 = vstv %s3901_s29  ;;  %s3924_s29 = sld [smem:[#allocation4 + $0x1a]] }
  0xae   :  { %v591_v51 = vsel %vm335_vm8, %v588_v34, %v590_v45  ;;  %v596_v52 = vsel %vm335_vm8, %v593_v46, %v595_v47  ;;  %v682_v7 = vmul.f32 %v680_v63, %v4222_v20  ;;  %v683_v3 = vmul.f32 %v680_v63, %v4224_v21 }
  0xaf   :  { %v685_v17 = vmul.f32 %v680_v63, %v4219_v18  ;;  %v686_v19 = vmul.f32 %v680_v63, %v4243_v41  ;;  %v725_v34 = vmul.f32 %v720_v29, %v4219_v18  ;;  %v684_v37 = vmul.f32 %v680_v63, %v4209_v13 }
  0xb0   :  { %v694_v0 = vrot.slane %v682_v7, 1 }
  0xb1   :  { %v701_v26 = vrot.slane %v686_v19, 1  ;;  %v739_v42 = vrot.slane %v725_v34, 2  ;;  %v698_v44 = vrot.slane %v684_v37, 1 }
  0xb4   :  { %479 = vrot.lane.b32.xlu2 %v471_v56, %s4112_s21  ;;  %483 = vrot.lane.b32.xlu1 %v476_v57, %s4112_s21  ;;  %v540_v56 = vmul.f32 %v4270_v9, %v4243_v41  ;;  %v615_v57 = vmul.f32 %v614_v48, %v4213_v15  ;;  %v578_v9 = vmul.f32 %v574_v23, %v4209_v13 }
  0xb5   :  { %437 = vrot.lane.b32.xlu0 %v429_v60, %s4112_s21  ;;  %v633_v60 = vrot.slane %v619_v54, 6  ;;  %v617_v23 = vmul.f32 %v614_v48, %v4224_v21  ;;  %v726_v48 = vmul.f32 %v720_v29, %v4243_v41 }
  0xb6   :  { %v555_v61 = vrot.slane %v540_v56, 4  ;;  %v627_v62 = vrot.slane %v615_v57, 6 }
  0xb7   :  { %v634_v5 = vsel %vm368_vm9, %v632_v59, %v633_v60  ;;  %v636_v14 = vsel %vm368_vm9, %v633_v60, %v635_v12  ;;  %v741_v54 = vrot.slane %v726_v48, 2  ;;  %v800_v59 = vstv %s3904_s4  ;;  %s3927_s4 = sld [smem:[#allocation4 + $0x2f]] }
  0xb8   :  { %v629_v4 = vsel %vm368_vm9, %v627_v62, %v628_v58  ;;  %v556_v8 = vsel %vm302_vm7, %v553_v33, %v555_v61  ;;  %v724_v33 = vmul.f32 %v720_v29, %v4209_v13  ;;  %v804_v34 = vmul.f32 %v800_v59, %v4209_v13 }
  0xb9   :  { %v742_v60 = vsel %vm236_vm5, %v739_v42, %v741_v54 }
  0xba   :  { %v738_v40 = vrot.slane %v724_v33, 2 }
  0xbc   :  { %517 = vrot.lane.b32.xlu2 %v509_v10, %s4112_s21  ;;  %521 = vrot.lane.b32.xlu1 %v514_v11, %s4112_s21  ;;  %v681_v10 = vmul.f32 %v680_v63, %v4213_v15  ;;  %v164_v11 = vpop.permute.xlu1 %163  ;;  %v740_v47 = vsel %vm236_vm5, %v738_v40, %v739_v42  ;;  %v802_v63 = vmul.f32 %v800_v59, %v4222_v20 }
  0xbd   :  { %443 = vrot.lane.b32.xlu0 %v436_v1, %s4112_s21  ;;  %172 = vst.msk [vmem:[#allocation3 + $0x23] sm:$0xff] %vm148_vm3, %v164_v11  ;;  %v592_v1 = vrot.slane %v578_v9, 5 }
  0xbe   :  { %v693_v2 = vrot.slane %v681_v10, 1  ;;  %v814_v10 = vrot.slane %v802_v63, 4 }
  0xbf   :  { %v594_v22 = vsel %vm335_vm8, %v592_v1, %v593_v46  ;;  %v760_v46 = vstv %s3903_s3  ;;  %s3926_s3 = sld [smem:[#allocation4 + $0x28]] }
  0xc0   :  { %v695_v16 = vsel %vm203_vm4, %v693_v2, %v694_v0  ;;  %v762_v49 = vmul.f32 %v760_v46, %v4222_v20  ;;  %v763_v50 = vmul.f32 %v760_v46, %v4224_v21  ;;  %v765_v62 = vmul.f32 %v760_v46, %v4219_v18 }
  0xc1   :  { %v761_v7 = vmul.f32 %v760_v46, %v4213_v15  ;;  %v766_v19 = vmul.f32 %v760_v46, %v4243_v41 }
  0xc2   :  { %v776_v56 = vrot.slane %v763_v50, 3  ;;  %v779_v9 = vrot.slane %v765_v62, 3 }
  0xc3   :  { %v773_v12 = vrot.slane %v761_v7, 3 }
  0xc4   :  { %523 = vrot.lane.b32.xlu2 %v516_v24, %s4112_s21  ;;  %559 = vrot.lane.b32.xlu1 %v551_v25, %s4112_s21  ;;  %v696_v24 = vrot.slane %v683_v3, 1  ;;  %v699_v25 = vrot.slane %v685_v17, 1  ;;  %v805_v3 = vmul.f32 %v800_v59, %v4219_v18 }
  0xc5   :  { %481 = vrot.lane.b32.xlu0 %v474_v28, %s4112_s21  ;;  %v630_v28 = vrot.slane %v617_v23, 6 }
  0xc6   :  { %v697_v31 = vsel %vm203_vm4, %v694_v0, %v696_v24  ;;  %v702_v32 = vsel %vm203_vm4, %v699_v25, %v701_v26  ;;  %v803_v0 = vmul.f32 %v800_v59, %v4224_v21  ;;  %v819_v24 = vrot.slane %v805_v3, 4 }
  0xc7   :  { %v631_v35 = vsel %vm368_vm9, %v628_v58, %v630_v28  ;;  %v764_v58 = vmul.f32 %v760_v46, %v4209_v13  ;;  %v781_v26 = vrot.slane %v766_v19, 3  ;;  %v840_v28 = vstv %s3905_s5  ;;  %s3928_s5 = sld [smem:[#allocation4 + $0x6]] }
  0xc8   :  { %v816_v23 = vrot.slane %v803_v0, 4  ;;  %v846_v46 = vmul.f32 %v840_v28, %v4243_v41  ;;  %v843_v54 = vmul.f32 %v840_v28, %v4224_v21 }
  0xc9   :  { %v782_v33 = vsel %vm269_vm6, %v779_v9, %v781_v26 }
  0xca   :  { %v817_v27 = vsel %vm302_vm7, %v814_v10, %v816_v23 }
  0xcc   :  { %561 = vrot.lane.b32.xlu2 %v554_v38, %s4112_s21  ;;  %597 = vrot.lane.b32.xlu1 %v589_v39, %s4112_s21  ;;  %v734_v39 = vrot.slane %v722_v30, 2  ;;  %v842_v30 = vmul.f32 %v840_v28, %v4222_v20 }
  0xcd   :  { %519 = vrot.lane.b32.xlu0 %v511_v43, %s4112_s21  ;;  %v733_v43 = vrot.slane %v721_v36, 2 }
  0xce   :  { %v854_v40 = vrot.slane %v842_v30, 5 }
  0xcf   :  { %v735_v45 = vsel %vm236_vm5, %v733_v43, %v734_v39 }
  0xd4   :  { %599 = vrot.lane.b32.xlu2 %v591_v51, %s4112_s21  ;;  %603 = vrot.lane.b32.xlu1 %v596_v52, %s4112_s21  ;;  %v700_v51 = vsel %vm203_vm4, %v698_v44, %v699_v25  ;;  %v723_v52 = vmul.f32 %v720_v29, %v4224_v21  ;;  %v818_v44 = vrot.slane %v804_v34, 4 }
  0xd5   :  { %557 = vrot.lane.b32.xlu0 %v549_v55, %s4112_s21  ;;  %v774_v55 = vrot.slane %v762_v49, 3 }
  0xd6   :  { %v736_v57 = vrot.slane %v723_v52, 2  ;;  %v820_v52 = vsel %vm302_vm7, %v818_v44, %v819_v24 }
  0xd7   :  { %v777_v61 = vsel %vm269_vm6, %v774_v55, %v776_v56 }
  0xdc   :  { %637 = vrot.lane.b32.xlu2 %v629_v4, %s4112_s21  ;;  %641 = vrot.lane.b32.xlu1 %v634_v5, %s4112_s21  ;;  %v737_v4 = vsel %vm236_vm5, %v734_v39, %v736_v57  ;;  %v801_v5 = vmul.f32 %v800_v59, %v4213_v15 }
  0xdd   :  { %563 = vrot.lane.b32.xlu0 %v556_v8, %s4112_s21  ;;  %v778_v8 = vrot.slane %v764_v58, 3  ;;  %v861_v58 = vrot.slane %v846_v46, 5 }
  0xde   :  { %v813_v11 = vrot.slane %v801_v5, 4 }
  0xdf   :  { %v780_v1 = vsel %vm269_vm6, %v778_v8, %v779_v9 }
  0xe0   :  { %v815_v2 = vsel %vm302_vm7, %v813_v11, %v814_v10 }
  0xe4   :  { %643 = vrot.lane.b32.xlu2 %v636_v14, %s4112_s21  ;;  %703 = vrot.lane.b32.xlu1 %v695_v16, %s4113_s24  ;;  %v806_v14 = vmul.f32 %v800_v59, %v4243_v41  ;;  %v775_v16 = vsel %vm269_vm6, %v773_v12, %v774_v55 }
  0xe5   :  { %601 = vrot.lane.b32.xlu0 %v594_v22, %s4112_s21 }
  0xe6   :  { %v821_v25 = vrot.slane %v806_v14, 4 }
  0xe8   :  { %v822_v29 = vsel %vm302_vm7, %v819_v24, %v821_v25 }
  0xec   :  { %705 = vrot.lane.b32.xlu2 %v697_v31, %s4113_s24  ;;  %709 = vrot.lane.b32.xlu1 %v702_v32, %s4113_s24  ;;  %v844_v31 = vmul.f32 %v840_v28, %v4209_v13  ;;  %v845_v32 = vmul.f32 %v840_v28, %v4219_v18 }
  0xed   :  { %639 = vrot.lane.b32.xlu0 %v631_v35, %s4112_s21  ;;  %v841_v35 = vmul.f32 %v840_v28, %v4213_v15 }
  0xee   :  { %v4354_v38 = vpop.permute.xlu2 %397  ;;  %v858_v42 = vrot.slane %v844_v31, 5  ;;  %v859_v43 = vrot.slane %v845_v32, 5 }
  0xf0   :  { %v860_v49 = vsel %vm335_vm8, %v858_v42, %v859_v43  ;;  %v862_v62 = vsel %vm335_vm8, %v859_v43, %v861_v58 }
  0xf4   :  { %743 = vrot.lane.b32.xlu2 %v735_v45, %s4113_s24  ;;  %747 = vrot.lane.b32.xlu1 %v740_v47, %s4113_s24  ;;  %v853_v45 = vrot.slane %v841_v35, 5  ;;  %v880_v47 = vstv %s3906_s6  ;;  %s3929_s6 = sld [smem:[#allocation4 + $0xd]] }
  0xf5   :  { %707 = vrot.lane.b32.xlu0 %v700_v51, %s4113_s24  ;;  %v882_v50 = vmul.f32 %v880_v47, %v4222_v20  ;;  %v883_v51 = vmul.f32 %v880_v47, %v4224_v21  ;;  %v885_v5 = vmul.f32 %v880_v47, %v4219_v18  ;;  %v881_v10 = vmul.f32 %v880_v47, %v4213_v15 }
  0xf6   :  { %v4366_v53 = vpop.permute.xlu2 %403  ;;  %v855_v48 = vsel %vm335_vm8, %v853_v45, %v854_v40  ;;  %v886_v19 = vmul.f32 %v880_v47, %v4243_v41 }
  0xf7   :  { %v894_v59 = vrot.slane %v882_v50, 6  ;;  %v899_v0 = vrot.slane %v885_v5, 6  ;;  %v893_v3 = vrot.slane %v881_v10, 6  ;;  %v1026_v10 = vstv %s3910_s11  ;;  %s3888_s11 = sld [smem:[#allocation4 + $0xe]] }
  0xf8   :  { %v901_v26 = vrot.slane %v886_v19, 6 }
  0xfc   :  { %749 = vrot.lane.b32.xlu2 %v742_v60, %s4113_s24  ;;  %785 = vrot.lane.b32.xlu1 %v777_v61, %s4113_s24  ;;  %v896_v60 = vrot.slane %v883_v51, 6  ;;  %v856_v61 = vrot.slane %v843_v54, 5 }
  0xfd   :  { %745 = vrot.lane.b32.xlu0 %v737_v4, %s4113_s24  ;;  %v884_v4 = vmul.f32 %v880_v47, %v4209_v13 }
  0xfe   :  { %v4378_v6 = vpop.permute.xlu2 %667  ;;  %v897_v63 = vsel %vm368_vm9, %v894_v59, %v896_v60  ;;  %v857_v7 = vsel %vm335_vm8, %v854_v40, %v856_v61 }
  0xff   :  { %6832 = vst [vmem:[#allocation13_spill] sm:$0xff] %v4378_v6  ;;  %v898_v12 = vrot.slane %v884_v4, 6 }
 0x101   :  { %v900_v14 = vsel %vm368_vm9, %v898_v12, %v899_v0 }
 0x104   :  { %787 = vrot.lane.b32.xlu2 %v780_v1, %s4113_s24  ;;  %823 = vrot.lane.b32.xlu1 %v815_v2, %s4113_s24  ;;  %v4389_v17 = vpop.permute.xlu1 %401  ;;  %v920_v1 = vstv %s3907_s7  ;;  %s4117_s7 = smov 122  }
 0x105   :  { %783 = vrot.lane.b32.xlu0 %v775_v16, %s4113_s24  ;;  %v921_v2 = vmul.f32 %v920_v1, %v4213_v15  ;;  %v895_v16 = vsel %vm368_vm9, %v893_v3, %v894_v59  ;;  %v924_v28 = vmul.f32 %v920_v1, %v4219_v18  ;;  %v923_v47 = vmul.f32 %v920_v1, %v4209_v13 }
 0x106   :  { %v4393_v22 = vpop.permute.xlu2 %441 }
 0x10c   :  { %825 = vrot.lane.b32.xlu2 %v817_v27, %s4113_s24  ;;  %829 = vrot.lane.b32.xlu1 %v822_v29, %s4113_s24  ;;  %v922_v27 = vmul.f32 %v920_v1, %v4222_v20  ;;  %v946_v29 = vstv %s3908_s8  ;;  %s3887_s8 = sld [smem:[#allocation4 + $0x7]] }
 0x10d   :  { %789 = vrot.lane.b32.xlu0 %v782_v33, %s4113_s24  ;;  %v948_v30 = vmul.f32 %v946_v29, %v4222_v20  ;;  %v950_v31 = vmul.f32 %v946_v29, %v4209_v13  ;;  %v951_v32 = vmul.f32 %v946_v29, %v4219_v18  ;;  %v902_v33 = vsel %vm368_vm9, %v899_v0, %v901_v26 }
 0x10e   :  { %v4406_v36 = vpop.permute.xlu1 %665  ;;  %v4408_v37 = vpop.permute.xlu2 %479  ;;  %v947_v34 = vmul.f32 %v946_v29, %v4213_v15  ;;  %v949_v58 = vmul.f32 %v946_v29, %v4224_v21 }
 0x10f   :  { %6833 = vst [vmem:[#allocation14_spill] sm:$0xff] %v4406_v36  ;;  %v4410_v39 = vpop.permute.xlu0 %399  ;;  %v960_v43 = vrot.slane %v948_v30, 1  ;;  %v964_v44 = vrot.slane %v950_v31, 1  ;;  %v965_v45 = vrot.slane %v951_v32, 1 }
 0x110   :  { %6834 = vst [vmem:[#allocation15_spill] sm:$0xff] %v4408_v37  ;;  %v959_v46 = vrot.slane %v947_v34, 1  ;;  %v962_v5 = vrot.slane %v949_v58, 1 }
 0x111   :  { %v966_v51 = vsel %vm203_vm4, %v964_v44, %v965_v45  ;;  %v1031_v44 = vmul.f32 %v1026_v10, %v4219_v18 }
 0x112   :  { %v961_v50 = vsel %vm203_vm4, %v959_v46, %v960_v43  ;;  %v963_v3 = vsel %vm203_vm4, %v960_v43, %v962_v5  ;;  %v1066_v5 = vstv %s3911_s12  ;;  %s179_s12 = sld [smem:[#allocation4]] }
 0x114   :  { %863 = vrot.lane.b32.xlu2 %v855_v48, %s4113_s24  ;;  %867 = vrot.lane.b32.xlu1 %v860_v49, %s4113_s24  ;;  %v952_v48 = vmul.f32 %v946_v29, %v4243_v41  ;;  %v986_v49 = vstv %s3909_s10  ;;  %s3930_s10 = sld [smem:[#allocation4 + $0x14]] }
 0x115   :  { %827 = vrot.lane.b32.xlu0 %v820_v52, %s4113_s24  ;;  %v988_v52 = vmul.f32 %v986_v49, %v4222_v20  ;;  %v989_v54 = vmul.f32 %v986_v49, %v4224_v21  ;;  %v991_v1 = vmul.f32 %v986_v49, %v4219_v18  ;;  %v987_v26 = vmul.f32 %v986_v49, %v4213_v15 }
 0x116   :  { %v4422_v55 = vpop.permute.xlu2 %517  ;;  %v4424_v56 = vpop.permute.xlu1 %439 }
 0x117   :  { %6835 = vst [vmem:[#allocation16_spill] sm:$0xff] %v4422_v55  ;;  %v4426_v57 = vpop.permute.xlu0 %663  ;;  %v1002_v4 = vrot.slane %v989_v54, 2  ;;  %v1005_v29 = vrot.slane %v991_v1, 2  ;;  %v999_v32 = vrot.slane %v987_v26, 2  ;;  %v1045_v54 = vrot.slane %v1031_v44, 3 }
 0x118   :  { %6836 = vst [vmem:[#allocation17_spill] sm:$0xff] %v4426_v57  ;;  %v1030_v1 = vmul.f32 %v1026_v10, %v4209_v13 }
 0x11c   :  { %869 = vrot.lane.b32.xlu2 %v862_v62, %s4113_s24  ;;  %905 = vrot.lane.b32.xlu1 %v897_v63, %s4113_s24  ;;  %v967_v62 = vrot.slane %v952_v48, 1  ;;  %v1000_v63 = vrot.slane %v988_v52, 2 }
 0x11d   :  { %865 = vrot.lane.b32.xlu0 %v857_v7, %s4113_s24  ;;  %v990_v7 = vmul.f32 %v986_v49, %v4209_v13 }
 0x11e   :  { %v4436_v8 = vpop.permute.xlu2 %523  ;;  %v4438_v9 = vpop.permute.xlu1 %477  ;;  %v968_v12 = vsel %vm203_vm4, %v965_v45, %v967_v62  ;;  %v1003_v0 = vsel %vm236_vm5, %v1000_v63, %v1002_v4  ;;  %v1032_v45 = vmul.f32 %v1026_v10, %v4243_v41  ;;  %v1001_v46 = vsel %vm236_vm5, %v999_v32, %v1000_v63 }
 0x11f   :  { %6837 = vst [vmem:[#allocation18_spill] sm:$0xff] %v4438_v9  ;;  %v4441_v11 = vpop.permute.xlu0 %669  ;;  %v1044_v32 = vrot.slane %v1030_v1, 3 }
 0x120   :  { %6838 = vst [vmem:[#allocation19_spill] sm:$0xff] %v4441_v11  ;;  %v1047_v58 = vrot.slane %v1032_v45, 3 }
 0x122   :  { %v1048_v63 = vsel %vm269_vm6, %v1045_v54, %v1047_v58 }
 0x124   :  { %907 = vrot.lane.b32.xlu2 %v900_v14, %s4113_s24  ;;  %929 = vrot.lane.b32.xlu1 %v921_v2, %s4114_s9  ;;  %v1028_v2 = vmul.f32 %v1026_v10, %v4222_v20  ;;  %v1027_v14 = vmul.f32 %v1026_v10, %v4213_v15 }
 0x125   :  { %903 = vrot.lane.b32.xlu0 %v895_v16, %s4113_s24 }
 0x126   :  { %v4450_v23 = vpop.permute.xlu2 %561  ;;  %v4452_v24 = vpop.permute.xlu1 %483  ;;  %v1040_v30 = vrot.slane %v1028_v2, 3  ;;  %v1039_v31 = vrot.slane %v1027_v14, 3  ;;  %v1067_v2 = vmul.f32 %v1066_v5, %v4213_v15 }
 0x127   :  { %6839 = vst [vmem:[#allocation20_spill] sm:$0xff] %v4450_v23  ;;  %v4454_v25 = vpop.permute.xlu0 %437 }
 0x128   :  { %v1041_v43 = vsel %vm269_vm6, %v1039_v31, %v1040_v30 }
 0x12c   :  { %931 = vrot.lane.b32.xlu2 %v922_v27, %s4114_s9  ;;  %935 = vrot.lane.b32.xlu1 %v924_v28, %s4114_s9  ;;  %v1004_v28 = vrot.slane %v990_v7, 2  ;;  %v1070_v7 = vmul.f32 %v1066_v5, %v4209_v13 }
 0x12d   :  { %909 = vrot.lane.b32.xlu0 %v902_v33, %s4113_s24  ;;  %v1029_v33 = vmul.f32 %v1026_v10, %v4224_v21 }
 0x12e   :  { %v4466_v35 = vpop.permute.xlu2 %599  ;;  %v4468_v40 = vpop.permute.xlu1 %521  ;;  %v1006_v34 = vsel %vm236_vm5, %v1004_v28, %v1005_v29 }
 0x12f   :  { %6840 = vst [vmem:[#allocation21_spill] sm:$0xff] %v4466_v35  ;;  %v4470_v42 = vpop.permute.xlu0 %443 }
 0x130   :  { %6841 = vst [vmem:[#allocation22_spill] sm:$0xff] %v4468_v40 }
 0x134   :  { %969 = vrot.lane.b32.xlu2 %v961_v50, %s4114_s9  ;;  %973 = vrot.lane.b32.xlu1 %v966_v51, %s4114_s9  ;;  %v1042_v51 = vrot.slane %v1029_v33, 3  ;;  %v1079_v33 = vrot.slane %v1067_v2, 4 }
 0x135   :  { %933 = vrot.lane.b32.xlu0 %v923_v47, %s4114_s9  ;;  %v992_v47 = vmul.f32 %v986_v49, %v4243_v41  ;;  %v1068_v49 = vmul.f32 %v1066_v5, %v4222_v20 }
 0x136   :  { %v4482_v59 = vpop.permute.xlu2 %637  ;;  %v4484_v60 = vpop.permute.xlu1 %559  ;;  %v1043_v4 = vsel %vm269_vm6, %v1040_v30, %v1042_v51  ;;  %v1084_v30 = vrot.slane %v1070_v7, 4 }
 0x137   :  { %6842 = vst [vmem:[#allocation23_spill] sm:$0xff] %v4482_v59  ;;  %v4486_v61 = vpop.permute.xlu0 %481  ;;  %v1007_v62 = vrot.slane %v992_v47, 2  ;;  %v1080_v28 = vrot.slane %v1068_v49, 4  ;;  %v1069_v47 = vmul.f32 %v1066_v5, %v4224_v21 }
 0x138   :  { %6843 = vst [vmem:[#allocation24_spill] sm:$0xff] %v4484_v60 }
 0x139   :  { %v1081_v10 = vsel %vm302_vm7, %v1079_v33, %v1080_v28  ;;  %v1082_v7 = vrot.slane %v1069_v47, 4 }
 0x13c   :  { %975 = vrot.lane.b32.xlu2 %v968_v12, %s4114_s9  ;;  %1011 = vrot.lane.b32.xlu1 %v1003_v0, %s4114_s9  ;;  %v1071_v12 = vmul.f32 %v1066_v5, %v4219_v18  ;;  %v1008_v0 = vsel %vm236_vm5, %v1005_v29, %v1007_v62  ;;  %v1106_v29 = vstv %s3912_s13  ;;  %s3889_s13 = sld [smem:[#allocation4 + $0x15]] }
 0x13d   :  { %971 = vrot.lane.b32.xlu0 %v963_v3, %s4114_s9  ;;  %v1108_v44 = vmul.f32 %v1106_v29, %v4222_v20  ;;  %v1109_v45 = vmul.f32 %v1106_v29, %v4224_v21 }
 0x13e   :  { %v4498_v16 = vpop.permute.xlu2 %643  ;;  %v4500_v19 = vpop.permute.xlu1 %597  ;;  %v1085_v31 = vrot.slane %v1071_v12, 4 }
 0x13f   :  { %6844 = vst [vmem:[#allocation25_spill] sm:$0xff] %v4498_v16  ;;  %v4503_v27 = vpop.permute.xlu0 %519  ;;  %v1122_v49 = vrot.slane %v1109_v45, 5 }
 0x140   :  { %6845 = vst [vmem:[#allocation26_spill] sm:$0xff] %v4500_v19 }
 0x141   :  { %6846 = vst [vmem:[#allocation27_spill] sm:$0xff] %v4503_v27 }
 0x144   :  { %1013 = vrot.lane.b32.xlu2 %v1006_v34, %s4114_s9  ;;  %1049 = vrot.lane.b32.xlu1 %v1041_v43, %s4114_s9  ;;  %v1072_v34 = vmul.f32 %v1066_v5, %v4243_v41  ;;  %v1086_v43 = vsel %vm302_vm7, %v1084_v30, %v1085_v31  ;;  %v1111_v5 = vmul.f32 %v1106_v29, %v4219_v18 }
 0x145   :  { %1009 = vrot.lane.b32.xlu0 %v1001_v46, %s4114_s9  ;;  %v1046_v46 = vsel %vm269_vm6, %v1044_v32, %v1045_v54  ;;  %v1110_v54 = vmul.f32 %v1106_v29, %v4209_v13  ;;  %v1083_v30 = vsel %vm302_vm7, %v1080_v28, %v1082_v7 }
 0x146   :  { %v4515_v48 = vpop.permute.xlu2 %705  ;;  %v4517_v50 = vpop.permute.xlu1 %603  ;;  %v1087_v62 = vrot.slane %v1072_v34, 4  ;;  %v1107_v34 = vmul.f32 %v1106_v29, %v4213_v15 }
 0x147   :  { %6847 = vst [vmem:[#allocation28_spill] sm:$0xff] %v4515_v48  ;;  %v4519_v52 = vpop.permute.xlu0 %557 }
 0x148   :  { %6848 = vst [vmem:[#allocation29_spill] sm:$0xff] %v4517_v50  ;;  %v1088_v12 = vsel %vm302_vm7, %v1085_v31, %v1087_v62  ;;  %v1119_v47 = vrot.slane %v1107_v34, 5 }
 0x149   :  { %6849 = vst [vmem:[#allocation30_spill] sm:$0xff] %v4519_v52 }
 0x14c   :  { %1051 = vrot.lane.b32.xlu2 %v1043_v4, %s4114_s9  ;;  %1055 = vrot.lane.b32.xlu1 %v1048_v63, %s4114_s9  ;;  %v1120_v63 = vrot.slane %v1108_v44, 5  ;;  %v1125_v44 = vrot.slane %v1111_v5, 5 }
 0x14d   :  { %1015 = vrot.lane.b32.xlu0 %v1008_v0, %s4114_s9  ;;  %v1146_v0 = vstv %s3913_s14  ;;  %s4943_s14 = sld [smem:[#allocation4 + $0x1b]] }
 0x14e   :  { %v4532_v3 = vpop.permute.xlu2 %743  ;;  %v4534_v14 = vpop.permute.xlu1 %641  ;;  %v1123_v1 = vsel %vm335_vm8, %v1120_v63, %v1122_v49  ;;  %v1148_v2 = vmul.f32 %v1146_v0, %v4222_v20  ;;  %v1147_v32 = vmul.f32 %v1146_v0, %v4213_v15  ;;  %v1149_v62 = vmul.f32 %v1146_v0, %v4224_v21 }
 0x14f   :  { %6850 = vst [vmem:[#allocation31_spill] sm:$0xff] %v4532_v3  ;;  %v4536_v26 = vpop.permute.xlu0 %563  ;;  %v1151_v7 = vmul.f32 %v1146_v0, %v4219_v18 }
 0x150   :  { %6851 = vst [vmem:[#allocation32_spill] sm:$0xff] %v4534_v14  ;;  %v1160_v45 = vrot.slane %v1148_v2, 6 }
 0x151   :  { %6852 = vst [vmem:[#allocation33_spill] sm:$0xff] %v4536_v26  ;;  %v1165_v34 = vrot.slane %v1151_v7, 6 }
 0x154   :  { %1089 = vrot.lane.b32.xlu2 %v1081_v10, %s4114_s9  ;;  %1093 = vrot.lane.b32.xlu1 %v1086_v43, %s4114_s9  ;;  %v1124_v43 = vrot.slane %v1110_v54, 5  ;;  %v1112_v54 = vmul.f32 %v1106_v29, %v4243_v41 }
 0x155   :  { %1053 = vrot.lane.b32.xlu0 %v1046_v46, %s4114_s9  ;;  %v1159_v46 = vrot.slane %v1147_v32, 6  ;;  %v1162_v32 = vrot.slane %v1149_v62, 6 }
 0x156   :  { %v4548_v51 = vpop.permute.xlu2 %749  ;;  %v4550_v58 = vpop.permute.xlu1 %703  ;;  %v1126_v28 = vsel %vm335_vm8, %v1124_v43, %v1125_v44 }
 0x157   :  { %6853 = vst [vmem:[#allocation34_spill] sm:$0xff] %v4548_v51  ;;  %v4552_v4 = vpop.permute.xlu0 %601  ;;  %v1161_v49 = vsel %vm368_vm9, %v1159_v46, %v1160_v45  ;;  %v1127_v46 = vrot.slane %v1112_v54, 5 }
 0x158   :  { %6854 = vst [vmem:[#allocation35_spill] sm:$0xff] %v4550_v58  ;;  %v1292_v58 = vstv %s3917_s1  ;;  %s5061_s1 = sld [smem:[#allocation4 + $0x22]] }
 0x159   :  { %6855 = vst [vmem:[#allocation36_spill] sm:$0xff] %v4552_v4  ;;  %v1128_v29 = vsel %vm335_vm8, %v1125_v44, %v1127_v46 }
 0x15c   :  { %1095 = vrot.lane.b32.xlu2 %v1088_v12, %s4114_s9  ;;  %1131 = vrot.lane.b32.xlu1 %v1123_v1, %s4114_s9  ;;  %v1152_v12 = vmul.f32 %v1146_v0, %v4243_v41  ;;  %v1121_v1 = vsel %vm335_vm8, %v1119_v47, %v1120_v63  ;;  %v1150_v47 = vmul.f32 %v1146_v0, %v4209_v13 }
 0x15d   :  { %1091 = vrot.lane.b32.xlu0 %v1083_v30, %s4114_s9 }
 0x15e   :  { %v4564_v31 = vpop.permute.xlu2 %787  ;;  %v4566_v33 = vpop.permute.xlu1 %709  ;;  %v1167_v43 = vrot.slane %v1152_v12, 6  ;;  %v1186_v12 = vstv %s3914_s15  ;;  %s4953_s15 = sld [smem:[#allocation4 + $0x1c]] }
 0x15f   :  { %6856 = vst [vmem:[#allocation37_spill] sm:$0xff] %v4564_v31  ;;  %v4569_v10 = vpop.permute.xlu0 %639  ;;  %v1189_v54 = vmul.f32 %v1186_v12, %v4209_v13 }
 0x160   :  { %6857 = vst [vmem:[#allocation38_spill] sm:$0xff] %v4566_v33  ;;  %v1168_v63 = vsel %vm368_vm9, %v1165_v34, %v1167_v43 }
 0x161   :  { %6858 = vst [vmem:[#allocation39_spill] sm:$0xff] %v4569_v10 }
 0x164   :  { %1133 = vrot.lane.b32.xlu2 %v1126_v28, %s4114_s9  ;;  %1169 = vrot.lane.b32.xlu1 %v1161_v49, %s4114_s9  ;;  %v1163_v28 = vsel %vm368_vm9, %v1160_v45, %v1162_v32  ;;  %v1164_v45 = vrot.slane %v1150_v47, 6  ;;  %v1212_v32 = vstv %s3915_s16  ;;  %v1252_v47 = vstv %s3916_s17  ;;  %s4974_s16 = sld [smem:[#allocation4 + $0x23]] }
 0x165   :  { %1129 = vrot.lane.b32.xlu0 %v1121_v1, %s4114_s9  ;;  %v1187_v1 = vmul.f32 %v1186_v12, %v4213_v15  ;;  %v1214_v44 = vmul.f32 %v1212_v32, %v4222_v20  ;;  %v1215_v0 = vmul.f32 %v1212_v32, %v4224_v21  ;;  %v1188_v21 = vmul.f32 %v1186_v12, %v4222_v20  ;;  %s4979_s17 = sld [smem:[#allocation4 + $0x2a]] }
 0x166   :  { %v4581_v5 = vpop.permute.xlu2 %825  ;;  %v4583_v2 = vpop.permute.xlu1 %747  ;;  %v1166_v43 = vsel %vm368_vm9, %v1164_v45, %v1165_v34  ;;  %v1217_v45 = vmul.f32 %v1212_v32, %v4219_v18 }
 0x167   :  { %6859 = vst [vmem:[#allocation40_spill] sm:$0xff] %v4581_v5  ;;  %v4585_v30 = vpop.permute.xlu0 %707 }
 0x168   :  { %6860 = vst [vmem:[#allocation41_spill] sm:$0xff] %v4583_v2 }
 0x169   :  { %6861 = vst [vmem:[#allocation42_spill] sm:$0xff] %v4585_v30 }
 0x16a   :  { %v5038_v6 = vstv %s4974_s16  ;;  %s5993_s16 = sld [smem:[#allocation4 + $0x4d]] }
 0x16c   :  { %1171 = vrot.lane.b32.xlu2 %v1163_v28, %s4114_s9  ;;  %1175 = vrot.lane.b32.xlu1 %v1168_v63, %s4114_s9  ;;  %v1226_v28 = vrot.slane %v1214_v44, 1  ;;  %v1228_v63 = vrot.slane %v1215_v0, 1  ;;  %v4625_v44 = vld [vmem:[#allocation2] sm:$0xff] }
 0x16d   :  { %1135 = vrot.lane.b32.xlu0 %v1128_v29, %s4114_s9  ;;  %v1190_v29 = vmul.f32 %v1186_v12, %v4219_v18  ;;  %v1253_v12 = vmul.f32 %v4625_v44, %v1252_v47 }
 0x16e   :  { %v4594_v62 = vpop.permute.xlu2 %863  ;;  %v4596_v49 = vpop.permute.xlu1 %785 }
 0x16f   :  { %6862 = vst [vmem:[#allocation43_spill] sm:$0xff] %v4594_v62  ;;  %v4598_v7 = vpop.permute.xlu0 %745  ;;  %v1213_v62 = vmul.f32 %v4625_v44, %v1212_v32 }
 0x170   :  { %6863 = vst [vmem:[#allocation44_spill] sm:$0xff] %v4596_v49  ;;  %v4640_v49 = vld [vmem:[#allocation2 + $0x20] sm:$0xff] }
 0x171   :  { %6864 = vst [vmem:[#allocation45_spill] sm:$0xff] %v4598_v7  ;;  %v1257_v3 = vmul.f32 %v4640_v49, %v1252_v47  ;;  %v5153_v55 = vmul.f32 %v4640_v49, %v5038_v6 }
 0x174   :  { %1195 = vrot.lane.b32.xlu2 %v1187_v1, %s4115_s0  ;;  %1199 = vrot.lane.b32.xlu1 %v1189_v54, %s4115_s0  ;;  %v1229_v1 = vsel %vm203_vm4, %v1226_v28, %v1228_v63  ;;  %v4617_v54 = vld [vmem:[#allocation2 + $0x18] sm:$0xff] }
 0x175   :  { %1173 = vrot.lane.b32.xlu0 %v1166_v43, %s4114_s9  ;;  %v1216_v34 = vmul.f32 %v4617_v54, %v1212_v32  ;;  %v1254_v43 = vmul.f32 %v1252_v47, %v4222_v20  ;;  %v1231_v20 = vrot.slane %v1217_v45, 1 }
 0x176   :  { %v4608_v46 = vpop.permute.xlu2 %869  ;;  %v4610_v15 = vpop.permute.xlu1 %823 }
 0x177   :  { %6865 = vst [vmem:[#allocation46_spill] sm:$0xff] %v4608_v46  ;;  %v4612_v13 = vpop.permute.xlu0 %783  ;;  %v1230_v18 = vrot.slane %v1216_v34, 1  ;;  %v1266_v5 = vrot.slane %v1254_v43, 2  ;;  %v1218_v34 = vmul.f32 %v1212_v32, %v4243_v41  ;;  %v1296_v32 = vmul.f32 %v4617_v54, %v1292_v58 }
 0x178   :  { %6866 = vst [vmem:[#allocation47_spill] sm:$0xff] %v4610_v15 }
 0x179   :  { %6867 = vst [vmem:[#allocation48_spill] sm:$0xff] %v4612_v13  ;;  %v1225_v13 = vrot.slane %v1213_v62, 1  ;;  %v1232_v46 = vsel %vm203_vm4, %v1230_v18, %v1231_v20  ;;  %v1233_v7 = vrot.slane %v1218_v34, 1 }
 0x17b   :  { %v1227_v62 = vsel %vm203_vm4, %v1225_v13, %v1226_v28  ;;  %v4657_v28 = vld [vmem:[#allocation2 + $0x8] sm:$0xff] }
 0x17c   :  { %1201 = vrot.lane.b32.xlu2 %v1190_v29, %s4115_s0  ;;  %1237 = vrot.lane.b32.xlu1 %v1229_v1, %s4115_s0  ;;  %v1265_v29 = vrot.slane %v1253_v12, 2  ;;  %v4635_v1 = vld [vmem:[#allocation2 + $0x10] sm:$0x3f] }
 0x17d   :  { %1197 = vrot.lane.b32.xlu0 %v1188_v21, %s4115_s0  ;;  %v1255_v21 = vmul.f32 %v4635_v1, %v1252_v47 }
 0x17e   :  { %v4628_v0 = vpop.permute.xlu2 %907  ;;  %v4630_v63 = vpop.permute.xlu1 %829 }
 0x17f   :  { %6868 = vst [vmem:[#allocation49_spill] sm:$0xff] %v4628_v0  ;;  %v4633_v15 = vpop.permute.xlu0 %789  ;;  %v1267_v0 = vsel %vm236_vm5, %v1265_v29, %v1266_v5  ;;  %v1268_v12 = vrot.slane %v1255_v21, 2  ;;  %v1271_v29 = vrot.slane %v1257_v3, 2  ;;  %v1234_v3 = vsel %vm203_vm4, %v1231_v20, %v1233_v7 }
 0x180   :  { %6869 = vst [vmem:[#allocation50_spill] sm:$0xff] %v4630_v63  ;;  %v1258_v63 = vmul.f32 %v1252_v47, %v4243_v41  ;;  %v1294_v41 = vmul.f32 %v4657_v28, %v1292_v58 }
 0x181   :  { %6870 = vst [vmem:[#allocation51_spill] sm:$0xff] %v4633_v15  ;;  %v1372_v15 = vstv %s3919_s22  ;;  %s5190_s22 = sld [smem:[#allocation4 + $0x30]] }
 0x182   :  { %v1273_v31 = vrot.slane %v1258_v63, 2  ;;  %v1306_v34 = vrot.slane %v1294_v41, 3 }
 0x184   :  { %1239 = vrot.lane.b32.xlu2 %v1232_v46, %s4115_s0  ;;  %1275 = vrot.lane.b32.xlu1 %v1267_v0, %s4115_s0  ;;  %v1269_v46 = vsel %vm236_vm5, %v1266_v5, %v1268_v12  ;;  %v1274_v13 = vsel %vm236_vm5, %v1271_v29, %v1273_v31  ;;  %v1297_v0 = vmul.f32 %v4640_v49, %v1292_v58  ;;  %v1310_v12 = vrot.slane %v1296_v32, 3 }
 0x185   :  { %1235 = vrot.lane.b32.xlu0 %v1227_v62, %s4115_s0  ;;  %v1256_v5 = vmul.f32 %v4617_v54, %v1252_v47  ;;  %v1293_v31 = vmul.f32 %v4625_v44, %v1292_v58  ;;  %v1332_v47 = vstv %s3918_s20  ;;  %v1295_v32 = vmul.f32 %v4635_v1, %v1292_v58  ;;  %s5129_s20 = sld [smem:[#allocation4 + $0x29]] }
 0x186   :  { %v4649_v45 = vpop.permute.xlu2 %931  ;;  %v4651_v43 = vpop.permute.xlu1 %867 }
 0x187   :  { %6871 = vst [vmem:[#allocation52_spill] sm:$0xff] %v4649_v45  ;;  %v4653_v18 = vpop.permute.xlu0 %827  ;;  %v1311_v45 = vrot.slane %v1297_v0, 3 }
 0x188   :  { %6872 = vst [vmem:[#allocation53_spill] sm:$0xff] %v4651_v43  ;;  %v1305_v43 = vrot.slane %v1293_v31, 3 }
 0x189   :  { %6873 = vst [vmem:[#allocation54_spill] sm:$0xff] %v4653_v18  ;;  %v1308_v18 = vrot.slane %v1295_v32, 3 }
 0x18a   :  { %v1307_v20 = vsel %vm269_vm6, %v1305_v43, %v1306_v34 }
 0x18b   :  { %v5188_v26 = vstv %s5129_s20  ;;  %s6090_s20 = sld [smem:[#allocation4 + $0x5b]] }
 0x18c   :  { %1277 = vrot.lane.b32.xlu2 %v1269_v46, %s4115_s0  ;;  %1281 = vrot.lane.b32.xlu1 %v1274_v13, %s4115_s0  ;;  %v1270_v46 = vrot.slane %v1256_v5, 2  ;;  %v4674_v13 = vld [vmem:[#allocation2 + $0x28] sm:$0x3f] }
 0x18d   :  { %1241 = vrot.lane.b32.xlu0 %v1234_v3, %s4115_s0  ;;  %v1298_v7 = vmul.f32 %v4674_v13, %v1292_v58  ;;  %v1312_v3 = vsel %vm269_vm6, %v1310_v12, %v1311_v45  ;;  %v1337_v58 = vmul.f32 %v4640_v49, %v1332_v47 }
 0x18e   :  { %v4668_v63 = vpop.permute.xlu2 %969  ;;  %v4670_v21 = vpop.permute.xlu1 %905  ;;  %v1272_v41 = vsel %vm236_vm5, %v1270_v46, %v1271_v29  ;;  %v1374_v46 = vmul.f32 %v4657_v28, %v1372_v15 }
 0x18f   :  { %6874 = vst [vmem:[#allocation55_spill] sm:$0xff] %v4668_v63  ;;  %v4672_v62 = vpop.permute.xlu0 %865  ;;  %v1334_v63 = vmul.f32 %v4657_v28, %v1332_v47  ;;  %v1313_v31 = vrot.slane %v1298_v7, 3  ;;  %v1309_v7 = vsel %vm269_vm6, %v1306_v34, %v1308_v18 }
 0x190   :  { %6875 = vst [vmem:[#allocation56_spill] sm:$0xff] %v4670_v21  ;;  %v1335_v21 = vmul.f32 %v4635_v1, %v1332_v47 }
 0x191   :  { %6876 = vst [vmem:[#allocation57_spill] sm:$0xff] %v4672_v62  ;;  %v1346_v12 = vrot.slane %v1334_v63, 4  ;;  %v1373_v63 = vmul.f32 %v4625_v44, %v1372_v15 }
 0x192   :  { %v1348_v62 = vrot.slane %v1335_v21, 4 }
 0x194   :  { %1315 = vrot.lane.b32.xlu2 %v1307_v20, %s4115_s0  ;;  %1319 = vrot.lane.b32.xlu1 %v1312_v3, %s4115_s0  ;;  %v1336_v20 = vmul.f32 %v4617_v54, %v1332_v47  ;;  %v1314_v3 = vsel %vm269_vm6, %v1311_v45, %v1313_v31  ;;  %v1349_v29 = vsel %vm302_vm7, %v1346_v12, %v1348_v62  ;;  %v1351_v31 = vrot.slane %v1337_v58, 4 }
 0x195   :  { %1279 = vrot.lane.b32.xlu0 %v1272_v41, %s4115_s0  ;;  %v1333_v45 = vmul.f32 %v4625_v44, %v1332_v47  ;;  %v1338_v58 = vmul.f32 %v4674_v13, %v1332_v47 }
 0x196   :  { %v4686_v0 = vpop.permute.xlu2 %975  ;;  %v4688_v5 = vpop.permute.xlu1 %929  ;;  %v1350_v32 = vrot.slane %v1336_v20, 4 }
 0x197   :  { %6877 = vst [vmem:[#allocation58_spill] sm:$0xff] %v4686_v0  ;;  %v4690_v43 = vpop.permute.xlu0 %903 }
 0x198   :  { %6878 = vst [vmem:[#allocation59_spill] sm:$0xff] %v4688_v5  ;;  %v1386_v5 = vrot.slane %v1374_v46, 5  ;;  %v1352_v18 = vsel %vm302_vm7, %v1350_v32, %v1351_v31 }
 0x199   :  { %6879 = vst [vmem:[#allocation60_spill] sm:$0xff] %v4690_v43  ;;  %v1345_v43 = vrot.slane %v1333_v45, 4 }
 0x19b   :  { %v1347_v20 = vsel %vm302_vm7, %v1345_v43, %v1346_v12 }
 0x19c   :  { %1321 = vrot.lane.b32.xlu2 %v1314_v3, %s4115_s0  ;;  %1357 = vrot.lane.b32.xlu1 %v1349_v29, %s4115_s0  ;;  %v1385_v3 = vrot.slane %v1373_v63, 5  ;;  %v1375_v29 = vmul.f32 %v4635_v1, %v1372_v15 }
 0x19d   :  { %1317 = vrot.lane.b32.xlu0 %v1309_v7, %s4115_s0  ;;  %v1377_v7 = vmul.f32 %v4640_v49, %v1372_v15 }
 0x19e   :  { %v4702_v21 = vpop.permute.xlu2 %1013  ;;  %v4704_v41 = vpop.permute.xlu1 %935  ;;  %v1387_v34 = vsel %vm335_vm8, %v1385_v3, %v1386_v5  ;;  %v1388_v45 = vrot.slane %v1375_v29, 5 }
 0x19f   :  { %6880 = vst [vmem:[#allocation61_spill] sm:$0xff] %v4702_v21  ;;  %v4707_v62 = vpop.permute.xlu0 %909  ;;  %v1378_v21 = vmul.f32 %v4674_v13, %v1372_v15  ;;  %v1391_v3 = vrot.slane %v1377_v7, 5 }
 0x1a0   :  { %6881 = vst [vmem:[#allocation62_spill] sm:$0xff] %v4704_v41  ;;  %v1353_v41 = vrot.slane %v1338_v58, 4 }
 0x1a1   :  { %6882 = vst [vmem:[#allocation63_spill] sm:$0xff] %v4707_v62  ;;  %v1393_v0 = vrot.slane %v1378_v21, 5  ;;  %v1412_v62 = vstv %s3920_s23  ;;  %v1376_v21 = vmul.f32 %v4617_v54, %v1372_v15  ;;  %s5332_s23 = sld [smem:[#allocation4 + $0x32]] }
 0x1a2   :  { %v1414_v43 = vmul.f32 %v4657_v28, %v1412_v62  ;;  %v1416_v47 = vmul.f32 %v4617_v54, %v1412_v62  ;;  %v1417_v12 = vmul.f32 %v4640_v49, %v1412_v62  ;;  %v1354_v29 = vsel %vm302_vm7, %v1351_v31, %v1353_v41 }
 0x1a3   :  { %v1418_v31 = vmul.f32 %v4674_v13, %v1412_v62 }
 0x1a4   :  { %1359 = vrot.lane.b32.xlu2 %v1352_v18, %s4115_s0  ;;  %1395 = vrot.lane.b32.xlu1 %v1387_v34, %s4115_s0  ;;  %v1389_v18 = vsel %vm335_vm8, %v1386_v5, %v1388_v45  ;;  %v1394_v34 = vsel %vm335_vm8, %v1391_v3, %v1393_v0  ;;  %v1413_v5 = vmul.f32 %v4625_v44, %v1412_v62  ;;  %v1426_v58 = vrot.slane %v1414_v43, 6 }
 0x1a5   :  { %1355 = vrot.lane.b32.xlu0 %v1347_v20, %s4115_s0  ;;  %v1430_v45 = vrot.slane %v1416_v47, 6  ;;  %v1415_v43 = vmul.f32 %v4635_v1, %v1412_v62 }
 0x1a6   :  { %v4719_v46 = vpop.permute.xlu2 %1051  ;;  %v4721_v63 = vpop.permute.xlu1 %973 }
 0x1a7   :  { %6883 = vst [vmem:[#allocation64_spill] sm:$0xff] %v4719_v46  ;;  %v4723_v32 = vpop.permute.xlu0 %933  ;;  %v1431_v46 = vrot.slane %v1417_v12, 6 }
 0x1a8   :  { %6884 = vst [vmem:[#allocation65_spill] sm:$0xff] %v4721_v63  ;;  %v1425_v63 = vrot.slane %v1413_v5, 6  ;;  %v1452_v5 = vstv %s3921_s25  ;;  %s5340_s25 = sld [smem:[#allocation4 + $0x39]] }
 0x1a9   :  { %6885 = vst [vmem:[#allocation66_spill] sm:$0xff] %v4723_v32  ;;  %v1432_v15 = vsel %vm368_vm9, %v1430_v45, %v1431_v46  ;;  %v1454_v45 = vmul.f32 %v4657_v28, %v1452_v5  ;;  %v1598_v32 = vstv %s3925_s30  ;;  %s3947_s30 = sld [smem:[#allocation4 + $0x55]] }
 0x1aa   :  { %v1427_v41 = vsel %vm368_vm9, %v1425_v63, %v1426_v58  ;;  %v1433_v63 = vrot.slane %v1418_v31, 6 }
 0x1ac   :  { %1397 = vrot.lane.b32.xlu2 %v1389_v18, %s4115_s0  ;;  %1401 = vrot.lane.b32.xlu1 %v1394_v34, %s4115_s0  ;;  %v1390_v18 = vrot.slane %v1376_v21, 5  ;;  %v1428_v21 = vrot.slane %v1415_v43, 6 }
 0x1ad   :  { %1361 = vrot.lane.b32.xlu0 %v1354_v29, %s4115_s0 }
 0x1ae   :  { %v4736_v7 = vpop.permute.xlu2 %1089  ;;  %v4738_v0 = vpop.permute.xlu1 %1011  ;;  %v1392_v34 = vsel %vm335_vm8, %v1390_v18, %v1391_v3  ;;  %v1429_v62 = vsel %vm368_vm9, %v1426_v58, %v1428_v21 }
 0x1af   :  { %6886 = vst [vmem:[#allocation67_spill] sm:$0xff] %v4736_v7  ;;  %v4740_v20 = vpop.permute.xlu0 %971  ;;  %v1453_v7 = vmul.f32 %v4625_v44, %v1452_v5 }
 0x1b0   :  { %6887 = vst [vmem:[#allocation68_spill] sm:$0xff] %v4738_v0  ;;  %v1518_v0 = vstv %s3923_s28  ;;  %s3945_s28 = sld [smem:[#allocation4 + $0x47]] }
 0x1b1   :  { %6888 = vst [vmem:[#allocation69_spill] sm:$0xff] %v4740_v20  ;;  %v1520_v20 = vmul.f32 %v4657_v28, %v1518_v0 }
 0x1b4   :  { %1435 = vrot.lane.b32.xlu2 %v1427_v41, %s4115_s0  ;;  %1439 = vrot.lane.b32.xlu1 %v1432_v15, %s4115_s0  ;;  %v1478_v41 = vstv %s3922_s26  ;;  %v1434_v15 = vsel %vm368_vm9, %v1431_v46, %v1433_v63  ;;  %s3944_s26 = sld [smem:[#allocation4 + $0x40]] }
 0x1b5   :  { %1399 = vrot.lane.b32.xlu0 %v1392_v34, %s4115_s0  ;;  %v1480_v3 = vmul.f32 %v4657_v28, %v1478_v41  ;;  %v1479_v18 = vmul.f32 %v4625_v44, %v1478_v41  ;;  %v1481_v58 = vmul.f32 %v4635_v1, %v1478_v41  ;;  %v1483_v21 = vmul.f32 %v4640_v49, %v1478_v41 }
 0x1b6   :  { %v4750_v47 = vpop.permute.xlu2 %1095  ;;  %v4752_v12 = vpop.permute.xlu1 %1049 }
 0x1b7   :  { %6889 = vst [vmem:[#allocation70_spill] sm:$0xff] %v4750_v47  ;;  %v4754_v29 = vpop.permute.xlu0 %1009  ;;  %v1492_v46 = vrot.slane %v1480_v3, 1  ;;  %v1491_v63 = vrot.slane %v1479_v18, 1  ;;  %v1456_v47 = vmul.f32 %v4640_v49, %v1452_v5 }
 0x1b8   :  { %6890 = vst [vmem:[#allocation71_spill] sm:$0xff] %v4752_v12 }
 0x1b9   :  { %6891 = vst [vmem:[#allocation72_spill] sm:$0xff] %v4754_v29 }
 0x1bc   :  { %1441 = vrot.lane.b32.xlu2 %v1434_v15, %s4115_s0  ;;  %1463 = vrot.lane.b32.xlu1 %v1454_v45, %s4116_s27  ;;  %v1455_v15 = vmul.f32 %v4617_v54, %v1452_v5  ;;  %v1493_v45 = vsel %vm203_vm4, %v1491_v63, %v1492_v46  ;;  %v1497_v63 = vrot.slane %v1483_v21, 1  ;;  %v1519_v5 = vmul.f32 %v4625_v44, %v1518_v0 }
 0x1bd   :  { %1437 = vrot.lane.b32.xlu0 %v1429_v62, %s4115_s0  ;;  %v1484_v62 = vmul.f32 %v4674_v13, %v1478_v41 }
 0x1be   :  { %v4764_v31 = vpop.permute.xlu2 %1133  ;;  %v4766_v34 = vpop.permute.xlu1 %1055 }
 0x1bf   :  { %6892 = vst [vmem:[#allocation73_spill] sm:$0xff] %v4764_v31  ;;  %v4768_v43 = vpop.permute.xlu0 %1015  ;;  %v1494_v31 = vrot.slane %v1481_v58, 1  ;;  %v1499_v29 = vrot.slane %v1484_v62, 1  ;;  %v1482_v58 = vmul.f32 %v4617_v54, %v1478_v41 }
 0x1c0   :  { %6893 = vst [vmem:[#allocation74_spill] sm:$0xff] %v4766_v34  ;;  %v1531_v34 = vrot.slane %v1519_v5, 2 }
 0x1c1   :  { %6894 = vst [vmem:[#allocation75_spill] sm:$0xff] %v4768_v43 }
 0x1c4   :  { %1465 = vrot.lane.b32.xlu2 %v1455_v15, %s4116_s27  ;;  %1501 = vrot.lane.b32.xlu1 %v1493_v45, %s4116_s27  ;;  %v1495_v15 = vsel %vm203_vm4, %v1492_v46, %v1494_v31  ;;  %v1500_v45 = vsel %vm203_vm4, %v1497_v63, %v1499_v29  ;;  %v1532_v29 = vrot.slane %v1520_v20, 2 }
 0x1c5   :  { %1461 = vrot.lane.b32.xlu0 %v1453_v7, %s4116_s27  ;;  %v1522_v7 = vmul.f32 %v4617_v54, %v1518_v0 }
 0x1c6   :  { %v4779_v3 = vpop.permute.xlu2 %1171  ;;  %v4781_v18 = vpop.permute.xlu1 %1093  ;;  %v1533_v41 = vsel %vm236_vm5, %v1531_v34, %v1532_v29 }
 0x1c7   :  { %6895 = vst [vmem:[#allocation76_spill] sm:$0xff] %v4779_v3  ;;  %v4783_v12 = vpop.permute.xlu0 %1053  ;;  %v1523_v3 = vmul.f32 %v4640_v49, %v1518_v0  ;;  %v1536_v46 = vrot.slane %v1522_v7, 2 }
 0x1c8   :  { %6896 = vst [vmem:[#allocation77_spill] sm:$0xff] %v4781_v18 }
 0x1c9   :  { %6897 = vst [vmem:[#allocation78_spill] sm:$0xff] %v4783_v12  ;;  %v1537_v18 = vrot.slane %v1523_v3, 2  ;;  %v1496_v12 = vrot.slane %v1482_v58, 1  ;;  %v1521_v3 = vmul.f32 %v4635_v1, %v1518_v0 }
 0x1cb   :  { %v1498_v20 = vsel %vm203_vm4, %v1496_v12, %v1497_v63  ;;  %v1600_v63 = vmul.f32 %v4657_v28, %v1598_v32 }
 0x1cc   :  { %1503 = vrot.lane.b32.xlu2 %v1495_v15, %s4116_s27  ;;  %1507 = vrot.lane.b32.xlu1 %v1500_v45, %s4116_s27  ;;  %v1524_v15 = vmul.f32 %v4674_v13, %v1518_v0  ;;  %v1558_v45 = vstv %s3924_s29  ;;  %s3946_s29 = sld [smem:[#allocation4 + $0x4e]] }
 0x1cd   :  { %1467 = vrot.lane.b32.xlu0 %v1456_v47, %s4116_s27  ;;  %v1538_v47 = vsel %vm236_vm5, %v1536_v46, %v1537_v18  ;;  %v1560_v43 = vmul.f32 %v4657_v28, %v1558_v45  ;;  %v1563_v0 = vmul.f32 %v4640_v49, %v1558_v45 }
 0x1ce   :  { %v4796_v21 = vpop.permute.xlu2 %1195  ;;  %v4798_v62 = vpop.permute.xlu1 %1131  ;;  %v1539_v5 = vrot.slane %v1524_v15, 2 }
 0x1cf   :  { %6898 = vst [vmem:[#allocation79_spill] sm:$0xff] %v4796_v21  ;;  %v4800_v31 = vpop.permute.xlu0 %1091  ;;  %v1561_v21 = vmul.f32 %v4635_v1, %v1558_v45  ;;  %v1572_v46 = vrot.slane %v1560_v43, 3  ;;  %v1599_v43 = vmul.f32 %v4625_v44, %v1598_v32 }
 0x1d0   :  { %6899 = vst [vmem:[#allocation80_spill] sm:$0xff] %v4798_v62 }
 0x1d1   :  { %6900 = vst [vmem:[#allocation81_spill] sm:$0xff] %v4800_v31  ;;  %v1574_v62 = vrot.slane %v1561_v21, 3  ;;  %v1534_v31 = vrot.slane %v1521_v3, 2 }
 0x1d3   :  { %v1575_v12 = vsel %vm269_vm6, %v1572_v46, %v1574_v62  ;;  %v1535_v15 = vsel %vm236_vm5, %v1532_v29, %v1534_v31 }
 0x1d4   :  { %1541 = vrot.lane.b32.xlu2 %v1533_v41, %s4116_s27  ;;  %1545 = vrot.lane.b32.xlu1 %v1538_v47, %s4116_s27  ;;  %v1562_v41 = vmul.f32 %v4617_v54, %v1558_v45  ;;  %v1540_v47 = vsel %vm236_vm5, %v1537_v18, %v1539_v5  ;;  %v1559_v18 = vmul.f32 %v4625_v44, %v1558_v45  ;;  %v1577_v5 = vrot.slane %v1563_v0, 3 }
 0x1d5   :  { %1505 = vrot.lane.b32.xlu0 %v1498_v20, %s4116_s27  ;;  %v1564_v0 = vmul.f32 %v4674_v13, %v1558_v45 }
 0x1d6   :  { %v4812_v7 = vpop.permute.xlu2 %1201  ;;  %v4814_v58 = vpop.permute.xlu1 %1169  ;;  %v1576_v3 = vrot.slane %v1562_v41, 3 }
 0x1d7   :  { %6901 = vst [vmem:[#allocation82_spill] sm:$0xff] %v4812_v7  ;;  %v4816_v34 = vpop.permute.xlu0 %1129 }
 0x1d8   :  { %6902 = vst [vmem:[#allocation83_spill] sm:$0xff] %v4814_v58  ;;  %v1612_v58 = vrot.slane %v1600_v63, 4  ;;  %v1578_v31 = vsel %vm269_vm6, %v1576_v3, %v1577_v5 }
 0x1d9   :  { %6903 = vst [vmem:[#allocation84_spill] sm:$0xff] %v4816_v34  ;;  %v1571_v34 = vrot.slane %v1559_v18, 3 }
 0x1db   :  { %v1573_v41 = vsel %vm269_vm6, %v1571_v34, %v1572_v46 }
 0x1dc   :  { %1547 = vrot.lane.b32.xlu2 %v1540_v47, %s4116_s27  ;;  %1583 = vrot.lane.b32.xlu1 %v1575_v12, %s4116_s27  ;;  %v1611_v47 = vrot.slane %v1599_v43, 4  ;;  %v1601_v12 = vmul.f32 %v4635_v1, %v1598_v32 }
 0x1dd   :  { %1543 = vrot.lane.b32.xlu0 %v1535_v15, %s4116_s27  ;;  %v1603_v15 = vmul.f32 %v4640_v49, %v1598_v32 }
 0x1de   :  { %v4828_v21 = vpop.permute.xlu2 %1239  ;;  %v4830_v20 = vpop.permute.xlu1 %1175  ;;  %v1613_v29 = vsel %vm302_vm7, %v1611_v47, %v1612_v58  ;;  %v1614_v18 = vrot.slane %v1601_v12, 4 }
 0x1df   :  { %6904 = vst [vmem:[#allocation85_spill] sm:$0xff] %v4828_v21  ;;  %v4833_v62 = vpop.permute.xlu0 %1135  ;;  %v1604_v21 = vmul.f32 %v4674_v13, %v1598_v32  ;;  %v1617_v47 = vrot.slane %v1603_v15, 4 }
 0x1e0   :  { %6905 = vst [vmem:[#allocation86_spill] sm:$0xff] %v4830_v20  ;;  %v1579_v20 = vrot.slane %v1564_v0, 3 }
 0x1e1   :  { %6906 = vst [vmem:[#allocation87_spill] sm:$0xff] %v4833_v62  ;;  %v1619_v7 = vrot.slane %v1604_v21, 4  ;;  %v1638_v62 = vstv %s3926_s3  ;;  %v1602_v21 = vmul.f32 %v4617_v54, %v1598_v32  ;;  %s3948_s3 = sld [smem:[#allocation4 + $0x5c]] }
 0x1e2   :  { %v1640_v45 = vmul.f32 %v4657_v28, %v1638_v62  ;;  %v1642_v46 = vmul.f32 %v4617_v54, %v1638_v62  ;;  %v1580_v12 = vsel %vm269_vm6, %v1577_v5, %v1579_v20  ;;  %v1678_v20 = vstv %s3927_s4  ;;  %s3949_s4 = sld [smem:[#allocation4 + $0x33]] }
 0x1e3   :  { %v1620_v34 = vsel %vm302_vm7, %v1617_v47, %v1619_v7 }
 0x1e4   :  { %1585 = vrot.lane.b32.xlu2 %v1578_v31, %s4116_s27  ;;  %1621 = vrot.lane.b32.xlu1 %v1613_v29, %s4116_s27  ;;  %v1615_v31 = vsel %vm302_vm7, %v1612_v58, %v1614_v18  ;;  %v1643_v29 = vmul.f32 %v4640_v49, %v1638_v62  ;;  %v1639_v58 = vmul.f32 %v4625_v44, %v1638_v62  ;;  %v1652_v0 = vrot.slane %v1640_v45, 5 }
 0x1e5   :  { %1581 = vrot.lane.b32.xlu0 %v1573_v41, %s4116_s27  ;;  %v1656_v18 = vrot.slane %v1642_v46, 5  ;;  %v1641_v46 = vmul.f32 %v4635_v1, %v1638_v62 }
 0x1e6   :  { %v4845_v63 = vpop.permute.xlu2 %1277  ;;  %v4847_v43 = vpop.permute.xlu1 %1199 }
 0x1e7   :  { %6907 = vst [vmem:[#allocation88_spill] sm:$0xff] %v4845_v63  ;;  %v4849_v3 = vpop.permute.xlu0 %1173  ;;  %v1657_v63 = vrot.slane %v1643_v29, 5 }
 0x1e8   :  { %6908 = vst [vmem:[#allocation89_spill] sm:$0xff] %v4847_v43  ;;  %v1651_v43 = vrot.slane %v1639_v58, 5 }
 0x1e9   :  { %6909 = vst [vmem:[#allocation90_spill] sm:$0xff] %v4849_v3  ;;  %v1658_v5 = vsel %vm335_vm8, %v1656_v18, %v1657_v63 }
 0x1ea   :  { %v1653_v32 = vsel %vm335_vm8, %v1651_v43, %v1652_v0 }
 0x1ec   :  { %1623 = vrot.lane.b32.xlu2 %v1615_v31, %s4116_s27  ;;  %1627 = vrot.lane.b32.xlu1 %v1620_v34, %s4116_s27  ;;  %v1616_v31 = vrot.slane %v1602_v21, 4  ;;  %v1644_v34 = vmul.f32 %v4674_v13, %v1638_v62  ;;  %v1683_v62 = vmul.f32 %v4640_v49, %v1678_v20 }
 0x1ed   :  { %1587 = vrot.lane.b32.xlu0 %v1580_v12, %s4116_s27  ;;  %v1680_v12 = vmul.f32 %v4657_v28, %v1678_v20 }
 0x1ee   :  { %v4862_v15 = vpop.permute.xlu2 %1315  ;;  %v4864_v7 = vpop.permute.xlu1 %1237  ;;  %v1618_v45 = vsel %vm302_vm7, %v1616_v31, %v1617_v47  ;;  %v1659_v58 = vrot.slane %v1644_v34, 5  ;;  %v1682_v47 = vmul.f32 %v4617_v54, %v1678_v20 }
 0x1ef   :  { %6910 = vst [vmem:[#allocation91_spill] sm:$0xff] %v4862_v15  ;;  %v4866_v41 = vpop.permute.xlu0 %1197  ;;  %v1681_v15 = vmul.f32 %v4635_v1, %v1678_v20  ;;  %v1692_v18 = vrot.slane %v1680_v12, 6 }
 0x1f0   :  { %6911 = vst [vmem:[#allocation92_spill] sm:$0xff] %v4864_v7 }
 0x1f1   :  { %6912 = vst [vmem:[#allocation93_spill] sm:$0xff] %v4866_v41  ;;  %v1694_v7 = vrot.slane %v1681_v15, 6  ;;  %v1654_v41 = vrot.slane %v1641_v46, 5  ;;  %v1718_v46 = vstv %s3928_s5  ;;  %s3950_s5 = sld [smem:[#allocation4 + $0x3a]] }
 0x1f3   :  { %v1655_v31 = vsel %vm335_vm8, %v1652_v0, %v1654_v41  ;;  %v1684_v0 = vmul.f32 %v4674_v13, %v1678_v20 }
 0x1f4   :  { %1661 = vrot.lane.b32.xlu2 %v1653_v32, %s4116_s27  ;;  %1665 = vrot.lane.b32.xlu1 %v1658_v5, %s4116_s27  ;;  %v1660_v32 = vsel %vm335_vm8, %v1657_v63, %v1659_v58  ;;  %v1695_v5 = vsel %vm368_vm9, %v1692_v18, %v1694_v7  ;;  %v1679_v63 = vmul.f32 %v4625_v44, %v1678_v20  ;;  %v1696_v7 = vrot.slane %v1682_v47, 6 }
 0x1f5   :  { %1625 = vrot.lane.b32.xlu0 %v1618_v45, %s4116_s27  ;;  %v1697_v45 = vrot.slane %v1683_v62, 6  ;;  %v1719_v58 = vmul.f32 %v4625_v44, %v1718_v46 }
 0x1f6   :  { %v4878_v29 = vpop.permute.xlu2 %1321  ;;  %v4880_v21 = vpop.permute.xlu1 %1275 }
 0x1f7   :  { %6913 = vst [vmem:[#allocation94_spill] sm:$0xff] %v4878_v29  ;;  %v4882_v43 = vpop.permute.xlu0 %1235  ;;  %v4941_v29 = vstv %s3930_s10  ;;  %s5719_s10 = sld [smem:[#allocation4 + $0x31]] }
 0x1f8   :  { %6914 = vst [vmem:[#allocation95_spill] sm:$0xff] %v4880_v21  ;;  %v1744_v21 = vstv %s3929_s6  ;;  %s3951_s6 = sld [smem:[#allocation4 + $0x41]] }
 0x1f9   :  { %6915 = vst [vmem:[#allocation96_spill] sm:$0xff] %v4882_v43  ;;  %v1748_v20 = vmul.f32 %v4617_v54, %v1744_v21 }
 0x1fc   :  { %1667 = vrot.lane.b32.xlu2 %v1660_v32, %s4116_s27  ;;  %1703 = vrot.lane.b32.xlu1 %v1695_v5, %s4116_s27  ;;  %v1691_v32 = vrot.slane %v1679_v63, 6  ;;  %v1698_v5 = vsel %vm368_vm9, %v1696_v7, %v1697_v45  ;;  %v1699_v63 = vrot.slane %v1684_v0, 6  ;;  %v1720_v7 = vmul.f32 %v4657_v28, %v1718_v46 }
 0x1fd   :  { %1663 = vrot.lane.b32.xlu0 %v1655_v31, %s4116_s27 }
 0x1fe   :  { %v4892_v34 = vpop.permute.xlu2 %1359  ;;  %v4894_v15 = vpop.permute.xlu1 %1281  ;;  %v1693_v41 = vsel %vm368_vm9, %v1691_v32, %v1692_v18  ;;  %v4915_v18 = vmul.f32 %v4657_v28, %v1744_v21  ;;  %v1700_v32 = vsel %vm368_vm9, %v1697_v45, %v1699_v63 }
 0x1ff   :  { %6916 = vst [vmem:[#allocation97_spill] sm:$0xff] %v4892_v34  ;;  %v4897_v12 = vpop.permute.xlu0 %1241  ;;  %v4928_v34 = vstv %s3887_s8  ;;  %s5711_s8 = sld [smem:[#allocation4 + $0x48]] }
 0x200   :  { %6917 = vst [vmem:[#allocation98_spill] sm:$0xff] %v4894_v15  ;;  %v4935_v45 = vmul.f32 %v4657_v28, %v4928_v34  ;;  %v194_v4 = vmul.f32 %v4617_v54, %v4928_v34 }
 0x201   :  { %6918 = vst [vmem:[#allocation99_spill] sm:$0xff] %v4897_v12 }
 0x204   :  { %1705 = vrot.lane.b32.xlu2 %v1698_v5, %s4116_s27  ;;  %1727 = vrot.lane.b32.xlu1 %v1719_v58, %s4117_s7  ;;  %v1722_v5 = vmul.f32 %v4640_v49, %v1718_v46  ;;  %v1749_v58 = vmul.f32 %v4640_v49, %v1744_v21 }
 0x205   :  { %1701 = vrot.lane.b32.xlu0 %v1693_v41, %s4116_s27  ;;  %v1745_v41 = vmul.f32 %v4625_v44, %v1744_v21 }
 0x206   :  { %v4906_v47 = vpop.permute.xlu2 %1397  ;;  %v4908_v62 = vpop.permute.xlu1 %1319 }
 0x207   :  { %6919 = vst [vmem:[#allocation100_spill] sm:$0xff] %v4906_v47  ;;  %v4910_v31 = vpop.permute.xlu0 %1279  ;;  %v1757_v63 = vrot.slane %v1745_v41, 1  ;;  %v1787_v41 = vmul.f32 %v4635_v1, %v4941_v29 }
 0x208   :  { %6920 = vst [vmem:[#allocation101_spill] sm:$0xff] %v4908_v62  ;;  %v1763_v62 = vrot.slane %v1749_v58, 1  ;;  %v4949_v58 = vmul.f32 %v4657_v28, %v4941_v29 }
 0x209   :  { %6921 = vst [vmem:[#allocation102_spill] sm:$0xff] %v4910_v31  ;;  %v1800_v3 = vrot.slane %v1787_v41, 2 }
 0x20c   :  { %1729 = vrot.lane.b32.xlu2 %v1720_v7, %s4117_s7  ;;  %1733 = vrot.lane.b32.xlu1 %v1722_v5, %s4117_s7  ;;  %v1758_v7 = vrot.slane %v4915_v18, 1  ;;  %v1762_v5 = vrot.slane %v1748_v20, 1 }
 0x20d   :  { %1707 = vrot.lane.b32.xlu0 %v1700_v32, %s4116_s27  ;;  %v191_v32 = vmul.f32 %v4625_v44, %v4928_v34 }
 0x20e   :  { %v4924_v0 = vpop.permute.xlu2 %1435  ;;  %v4926_v47 = vpop.permute.xlu1 %1357  ;;  %v1759_v18 = vsel %vm203_vm4, %v1757_v63, %v1758_v7  ;;  %v1764_v20 = vsel %vm203_vm4, %v1762_v5, %v1763_v62  ;;  %v4962_v5 = vstv %s179_s12  ;;  %s5766_s12 = sld [smem:[#allocation4 + $0x4f]] }
 0x20f   :  { %6922 = vst [vmem:[#allocation103_spill] sm:$0xff] %v4924_v0  ;;  %v4930_v43 = vpop.permute.xlu0 %1317  ;;  %v1721_v0 = vmul.f32 %v4617_v54, %v1718_v46  ;;  %v1747_v46 = vmul.f32 %v4635_v1, %v1744_v21 }
 0x210   :  { %6923 = vst [vmem:[#allocation104_spill] sm:$0xff] %v4926_v47  ;;  %v1750_v47 = vmul.f32 %v4674_v13, %v1744_v21  ;;  %v204_v21 = vrot.slane %v191_v32, 1 }
 0x211   :  { %6924 = vst [vmem:[#allocation105_spill] sm:$0xff] %v4930_v43  ;;  %v4958_v43 = vstv %s3888_s11  ;;  %v1760_v48 = vrot.slane %v1747_v46, 1  ;;  %s5741_s11 = sld [smem:[#allocation4 + $0x3f]] }
 0x212   :  { %v4966_v31 = vmul.f32 %v4657_v28, %v4958_v43  ;;  %v224_v2 = vmul.f32 %v4625_v44, %v4958_v43 }
 0x214   :  { %1767 = vrot.lane.b32.xlu2 %v1759_v18, %s4117_s7  ;;  %1771 = vrot.lane.b32.xlu1 %v1764_v20, %s4117_s7  ;;  %v1765_v18 = vrot.slane %v1750_v47, 1  ;;  %v4972_v20 = vstv %s3889_s13  ;;  %v6928_v47 = vrot.slane %v4935_v45, 1  ;;  %s5888_s13 = sld [smem:[#allocation4 + $0x46]] }
 0x215   :  { %1731 = vrot.lane.b32.xlu0 %v1721_v0, %s4117_s7  ;;  %v1798_v0 = vrot.slane %v4949_v58, 2  ;;  %v4990_v32 = vmul.f32 %v4657_v28, %v4972_v20  ;;  %v257_v41 = vmul.f32 %v4625_v44, %v4972_v20  ;;  %v5011_v58 = vstv %s4953_s15  ;;  %s5961_s15 = sld [smem:[#allocation4 + $0x5d]] }
 0x216   :  { %v4968_v15 = vpop.permute.xlu2 %1441  ;;  %v4970_v12 = vpop.permute.xlu1 %1395  ;;  %v1766_v46 = vsel %vm203_vm4, %v1763_v62, %v1765_v18  ;;  %v237_v62 = vrot.slane %v224_v2, 2  ;;  %v5019_v36 = vmul.f32 %v4657_v28, %v5011_v58  ;;  %v6931_v2 = vrot.slane %v4966_v31, 2 }
 0x217   :  { %6925 = vst [vmem:[#allocation106_spill] sm:$0xff] %v4968_v15  ;;  %v4976_v63 = vpop.permute.xlu0 %1355  ;;  %v181_v15 = vmul.f32 %v4625_v44, %v4962_v5  ;;  %v1801_v51 = vsel %vm236_vm5, %v1798_v0, %v1800_v3  ;;  %v1761_v3 = vsel %vm203_vm4, %v1758_v7, %v1760_v48  ;;  %v1785_v48 = vmul.f32 %v4625_v44, %v4941_v29 }
 0x218   :  { %6926 = vst [vmem:[#allocation107_spill] sm:$0xff] %v4970_v12  ;;  %v206_v12 = vsel %vm203_vm4, %v204_v21, %v6928_v47  ;;  %v1788_v21 = vmul.f32 %v4617_v54, %v4941_v29  ;;  %v5004_v47 = vmul.f32 %v4640_v49, %v4941_v29  ;;  %v239_v7 = vsel %vm236_vm5, %v237_v62, %v6931_v2 }
 0x219   :  { %6927 = vst [vmem:[#allocation108_spill] sm:$0xff] %v4976_v63  ;;  %v4997_v63 = vstv %s4943_s14  ;;  %v218_v30 = vadd.f32 %v206_v12, %v181_v15  ;;  %v270_v12 = vrot.slane %v257_v41, 3  ;;  %v5041_v41 = vstv %s4979_s17  ;;  %s5893_s14 = sld [smem:[#allocation4 + $0x56]] }
 0x21a   :  { %v5008_v57 = vmul.f32 %v4657_v28, %v4997_v63  ;;  %v1825_v15 = vmul.f32 %v4625_v44, %v4997_v63  ;;  %v1802_v33 = vrot.slane %v1788_v21, 2  ;;  %v6933_v10 = vrot.slane %v4990_v32, 3  ;;  %s6006_s17 = sld [smem:[#allocation4 + $0x54]] }
 0x21b   :  { %v5051_v21 = vmul.f32 %v4657_v28, %v5038_v6  ;;  %v6937_v14 = vrot.slane %v5019_v36, 4  ;;  %v262_v52 = vmul.f32 %v4674_v13, %v4972_v20  ;;  %v5214_v9 = vmul.f32 %v4674_v13, %v5041_v41 }
 0x21c   :  { %1773 = vrot.lane.b32.xlu2 %v1766_v46, %s4117_s7  ;;  %1809 = vrot.lane.b32.xlu1 %v1801_v51, %s4117_s7  ;;  %v1838_v59 = vrot.slane %v5008_v57, 3  ;;  %v272_v11 = vsel %vm269_vm6, %v270_v12, %v6933_v10  ;;  %v1837_v2 = vrot.slane %v1825_v15, 3  ;;  %v5055_v57 = vmul.f32 %v4640_v49, %v4928_v34 }
 0x21d   :  { %1769 = vrot.lane.b32.xlu0 %v1761_v3, %s4117_s7  ;;  %v1827_v3 = vmul.f32 %v4635_v1, %v4997_v63  ;;  %v6934_v10 = vrot.slane %v5004_v47, 2  ;;  %v5069_v15 = vmul.f32 %v4640_v49, %v4997_v63 }
 0x21e   :  { %v5024_v46 = vpop.permute.xlu2 %1465  ;;  %v5026_v51 = vpop.permute.xlu1 %1401  ;;  %v1839_v62 = vsel %vm269_vm6, %v1837_v2, %v1838_v59  ;;  %v5080_v2 = vmul.f32 %v4625_v44, %v5038_v6 }
 0x21f   :  { %6929 = vst [vmem:[#allocation109_spill] sm:$0xff] %v5024_v46  ;;  %v5033_v18 = vpop.permute.xlu0 %1361  ;;  %v251_v46 = vadd.f32 %v239_v7, %v218_v30  ;;  %v196_v30 = vmul.f32 %v4674_v13, %v4928_v34  ;;  %v1797_v7 = vrot.slane %v1785_v48, 2  ;;  %v1804_v12 = vsel %vm236_vm5, %v1802_v33, %v6934_v10 }
 0x220   :  { %6930 = vst [vmem:[#allocation110_spill] sm:$0xff] %v5026_v51  ;;  %v290_v51 = vmul.f32 %v4625_v44, %v5011_v58  ;;  %v1790_v33 = vmul.f32 %v4674_v13, %v4941_v29  ;;  %v5084_v10 = vmul.f32 %v4625_v44, %v5041_v41  ;;  %v5095_v29 = vmul.f32 %v4657_v28, %v5041_v41 }
 0x221   :  { %6932 = vst [vmem:[#allocation111_spill] sm:$0xff] %v5033_v18  ;;  %v1830_v18 = vmul.f32 %v4674_v13, %v4997_v63  ;;  %v284_v19 = vadd.f32 %v272_v11, %v251_v46  ;;  %v1799_v35 = vsel %vm236_vm5, %v1797_v7, %v1798_v0  ;;  %v5088_v11 = vmul.f32 %v4640_v49, %v4958_v43 }
 0x222   :  { %v303_v48 = vrot.slane %v290_v51, 4  ;;  %v229_v46 = vmul.f32 %v4674_v13, %v4958_v43  ;;  %v210_v0 = vrot.slane %v5055_v57, 1  ;;  %v212_v51 = vrot.slane %v196_v30, 1 }
 0x223   :  { %v1845_v60 = vrot.slane %v1830_v18, 3  ;;  %v184_v57 = vmul.f32 %v4640_v49, %v4962_v5  ;;  %v1805_v30 = vrot.slane %v1790_v33, 2  ;;  %v6939_v33 = vrot.slane %v5069_v15, 3 }
 0x224   :  { %1811 = vrot.lane.b32.xlu2 %v1804_v12, %s4117_s7  ;;  %1847 = vrot.lane.b32.xlu1 %v1839_v62, %s4117_s7  ;;  %v1840_v12 = vrot.slane %v1827_v3, 3  ;;  %v305_v16 = vsel %vm302_vm7, %v303_v48, %v6937_v14  ;;  %v5115_v3 = vmul.f32 %v4640_v49, %v4972_v20  ;;  %v245_v48 = vrot.slane %v229_v46, 2 }
 0x225   :  { %1807 = vrot.lane.b32.xlu0 %v1799_v35, %s4117_s7  ;;  %v5109_v50 = vadd.f32 %v305_v16, %v284_v19  ;;  %v213_v16 = vsel %vm203_vm4, %v210_v0, %v212_v51  ;;  %v5125_v19 = vmul.f32 %v4640_v49, %v5011_v58  ;;  %v1846_v46 = vsel %vm269_vm6, %v6939_v33, %v1845_v60 }
 0x226   :  { %v5098_v62 = vpop.permute.xlu2 %1503  ;;  %v5100_v7 = vpop.permute.xlu1 %1439  ;;  %v1841_v18 = vsel %vm269_vm6, %v1838_v59, %v1840_v12  ;;  %v295_v59 = vmul.f32 %v4674_v13, %v5011_v58  ;;  %v6940_v12 = vrot.slane %v5004_v47, 2  ;;  %v1828_v33 = vmul.f32 %v4617_v54, %v4997_v63 }
 0x227   :  { %6935 = vst [vmem:[#allocation112_spill] sm:$0xff] %v5098_v62  ;;  %v5106_v35 = vpop.permute.xlu0 %1399  ;;  %v1864_v62 = vstv %s5061_s1  ;;  %v221_v23 = vadd.f32 %v213_v16, %v184_v57  ;;  %v278_v47 = vrot.slane %v262_v52, 3  ;;  %v193_v63 = vmul.f32 %v4635_v1, %v4928_v34  ;;  %s6079_s1 = sld [smem:[#allocation4 + $0x34]] }
 0x228   :  { %6936 = vst [vmem:[#allocation113_spill] sm:$0xff] %v5100_v7  ;;  %v5135_v14 = vmul.f32 %v4657_v28, %v1864_v62  ;;  %v1868_v7 = vmul.f32 %v4617_v54, %v1864_v62  ;;  %v5139_v51 = vmul.f32 %v4640_v49, %v1864_v62  ;;  %v1806_v60 = vsel %vm236_vm5, %v6940_v12, %v1805_v30 }
 0x229   :  { %6938 = vst [vmem:[#allocation114_spill] sm:$0xff] %v5106_v35  ;;  %v209_v35 = vrot.slane %v194_v4, 1  ;;  %v1865_v27 = vmul.f32 %v4625_v44, %v1864_v62  ;;  %v227_v30 = vmul.f32 %v4617_v54, %v4958_v43  ;;  %v5179_v34 = vmul.f32 %v4640_v49, %v5041_v41 }
 0x22a   :  { %v1883_v52 = vrot.slane %v5139_v51, 4  ;;  %v183_v4 = vmul.f32 %v4617_v54, %v4962_v5  ;;  %v6945_v49 = vrot.slane %v5135_v14, 4 }
 0x22b   :  { %v1877_v44 = vrot.slane %v1865_v27, 4  ;;  %v242_v51 = vrot.slane %v227_v30, 2  ;;  %v1907_v27 = vmul.f32 %v4635_v1, %v5188_v26  ;;  %v6946_v30 = vrot.slane %v5069_v15, 3 }
 0x22c   :  { %1849 = vrot.lane.b32.xlu2 %v1841_v18, %s4117_s7  ;;  %1853 = vrot.lane.b32.xlu1 %v1846_v46, %s4117_s7  ;;  %v6941_v18 = vrot.slane %v5088_v11, 2 }
 0x22d   :  { %1813 = vrot.lane.b32.xlu0 %v1806_v60, %s4117_s7  ;;  %v1882_v60 = vrot.slane %v1868_v7, 4  ;;  %v260_v7 = vmul.f32 %v4617_v54, %v4972_v20  ;;  %v342_v54 = vrot.slane %v5153_v55, 5 }
 0x22e   :  { %v246_v46 = vsel %vm236_vm5, %v6941_v18, %v245_v48  ;;  %v5164_v57 = vpop.permute.xlu2 %1541  ;;  %v5166_v16 = vpop.permute.xlu1 %1463  ;;  %v311_v48 = vrot.slane %v295_v59, 4  ;;  %v5175_v18 = vmul.f32 %v4674_v13, %v5038_v6  ;;  %v207_v59 = vrot.slane %v193_v63, 1 }
 0x22f   :  { %6942 = vst [vmem:[#allocation115_spill] sm:$0xff] %v5164_v57  ;;  %v5169_v12 = vpop.permute.xlu0 %1437  ;;  %v1842_v57 = vrot.slane %v1828_v33, 3  ;;  %v1879_v33 = vsel %vm302_vm7, %v1877_v44, %v6945_v49  ;;  %v1884_v37 = vsel %vm302_vm7, %v1882_v60, %v1883_v52  ;;  %v1867_v44 = vmul.f32 %v4635_v1, %v1864_v62 }
 0x230   :  { %6943 = vst [vmem:[#allocation116_spill] sm:$0xff] %v5166_v16  ;;  %v211_v16 = vsel %vm203_vm4, %v209_v35, %v210_v0  ;;  %v5198_v0 = vmul.f32 %v4657_v28, %v5188_v26  ;;  %v254_v60 = vadd.f32 %v246_v46, %v221_v23  ;;  %v6947_v49 = vrot.slane %v5115_v3, 3 }
 0x231   :  { %6944 = vst [vmem:[#allocation117_spill] sm:$0xff] %v5169_v12  ;;  %v1870_v12 = vmul.f32 %v4674_v13, %v1864_v62  ;;  %v220_v35 = vadd.f32 %v211_v16, %v183_v4  ;;  %v1844_v63 = vsel %vm269_vm6, %v1842_v57, %v6946_v30  ;;  %v226_v16 = vmul.f32 %v4635_v1, %v4958_v43  ;;  %v5236_v30 = vld [vmem:[#allocation2 + $0x18] sm:$0xff] }
 0x232   :  { %v279_v40 = vsel %vm269_vm6, %v6947_v49, %v278_v47  ;;  %v344_v62 = vrot.slane %v5175_v18, 5  ;;  %v275_v23 = vrot.slane %v260_v7, 3  ;;  %v6949_v13 = vrot.slane %v5088_v11, 2  ;;  %v4024_v49 = vld [vmem:[#allocation2 + $0x10] sm:$0x3f] }
 0x233   :  { %v1885_v47 = vrot.slane %v1870_v12, 4  ;;  %v6950_v1 = vrot.slane %v4935_v45, 1  ;;  %v1920_v18 = vrot.slane %v1907_v27, 5  ;;  %v293_v12 = vmul.f32 %v5236_v30, %v5011_v58 }
 0x234   :  { %1887 = vrot.lane.b32.xlu2 %v1879_v33, %s4117_s7  ;;  %1891 = vrot.lane.b32.xlu1 %v1884_v37, %s4117_s7  ;;  %v6948_v37 = vrot.slane %v5125_v19, 4  ;;  %v244_v4 = vsel %vm236_vm5, %v242_v51, %v6949_v13  ;;  %v182_v11 = vmul.f32 %v4657_v28, %v4962_v5  ;;  %v1880_v51 = vrot.slane %v1867_v44, 4  ;;  %v4025_v44 = vld [vmem:[#allocation2 + $0x20] sm:$0xff] }
 0x235   :  { %1851 = vrot.lane.b32.xlu0 %v1844_v63, %s4117_s7  ;;  %v208_v43 = vsel %vm203_vm4, %v6950_v1, %v207_v59  ;;  %v253_v7 = vadd.f32 %v244_v4, %v220_v35  ;;  %v287_v63 = vadd.f32 %v279_v40, %v254_v60  ;;  %v240_v59 = vrot.slane %v226_v16, 2 }
 0x236   :  { %v312_v15 = vsel %vm302_vm7, %v6948_v37, %v311_v48  ;;  %v5223_v46 = vpop.permute.xlu2 %1547  ;;  %v5225_v57 = vpop.permute.xlu1 %1501  ;;  %v1918_v48 = vrot.slane %v5198_v0, 5  ;;  %v259_v37 = vmul.f32 %v4024_v49, %v4972_v20  ;;  %v6951_v13 = vrot.slane %v5115_v3, 3 }
 0x237   :  { %v5233_v33 = vpop.permute.xlu0 %1461  ;;  %v219_v35 = vadd.f32 %v208_v43, %v182_v11  ;;  %v1886_v4 = vsel %vm302_vm7, %v1883_v52, %v1885_v47  ;;  %v5249_v1 = vstv %s5190_s22  ;;  %v1908_v40 = vmul.f32 %v5236_v30, %v5188_v26  ;;  %s6172_s22 = sld [smem:[#allocation4 + $0x3b]] }
 0x238   :  { %v277_v27 = vsel %vm269_vm6, %v275_v23, %v6951_v13  ;;  %v1921_v5 = vsel %vm335_vm8, %v1918_v48, %v1920_v18  ;;  %v5257_v60 = vmul.f32 %v4025_v44, %v5188_v26  ;;  %v5261_v20 = vmul.f32 %v4657_v28, %v5249_v1 }
 0x239   :  { %v286_v3 = vadd.f32 %v277_v27, %v253_v7  ;;  %v308_v16 = vrot.slane %v293_v12, 4  ;;  %v326_v52 = vmul.f32 %v5236_v30, %v5038_v6  ;;  %v6952_v23 = vrot.slane %v5135_v14, 4  ;;  %v4026_v7 = vld [vmem:[#allocation2] sm:$0xff] }
 0x23a   :  { %v6953_v43 = vrot.slane %v4966_v31, 2  ;;  %v273_v11 = vrot.slane %v259_v37, 3  ;;  %v292_v28 = vmul.f32 %v4024_v49, %v5011_v58  ;;  %v1945_v12 = vmul.f32 %v4026_v7, %v5249_v1 }
 0x23b   :  { %v1881_v47 = vsel %vm302_vm7, %v6952_v23, %v1880_v51  ;;  %v320_v13 = vadd.f32 %v312_v15, %v287_v63  ;;  %v377_v27 = vrot.slane %v5214_v9, 6  ;;  %v1905_v31 = vmul.f32 %v4026_v7, %v5188_v26 }
 0x23c   :  { %1893 = vrot.lane.b32.xlu2 %v1886_v4, %s4117_s7  ;;  %1929 = vrot.lane.b32.xlu1 %v1921_v5, %s4117_s7  ;;  %v241_v18 = vsel %vm236_vm5, %v6953_v43, %v240_v59  ;;  %v345_v51 = vsel %vm335_vm8, %v342_v54, %v344_v62  ;;  %v1922_v59 = vrot.slane %v1908_v40, 5  ;;  %v1923_v37 = vrot.slane %v5257_v60, 5 }
 0x23d   :  { %1889 = vrot.lane.b32.xlu0 %v1881_v47, %s4117_s7  ;;  %v252_v4 = vadd.f32 %v241_v18, %v219_v35  ;;  %v1958_v15 = vrot.slane %v5261_v20, 6  ;;  %v6954_v9 = vrot.slane %v5125_v19, 4  ;;  %v341_v35 = vrot.slane %v326_v52, 5 }
 0x23e   :  { %v5277_v5 = vpop.permute.xlu2 %1585  ;;  %v5279_v14 = vpop.permute.xlu1 %1507  ;;  %v359_v23 = vmul.f32 %v5236_v30, %v5041_v41  ;;  %v325_v47 = vmul.f32 %v4024_v49, %v5038_v6  ;;  %v6955_v62 = vrot.slane %v4990_v32, 3  ;;  %v306_v40 = vrot.slane %v292_v28, 4  ;;  %v4027_v6 = vld [vmem:[#allocation2 + $0x28] sm:$0x3f] }
 0x23f   :  { %v5285_v58 = vpop.permute.xlu0 %1467  ;;  %v310_v63 = vsel %vm302_vm7, %v308_v16, %v6954_v9  ;;  %v1957_v7 = vrot.slane %v1945_v12, 6  ;;  %v353_v60 = vadd.f32 %v345_v51, %v320_v13  ;;  %v1917_v20 = vrot.slane %v1905_v31, 5 }
 0x240   :  { %v319_v43 = vadd.f32 %v310_v63, %v286_v3  ;;  %v274_v18 = vsel %vm269_vm6, %v6955_v62, %v273_v11  ;;  %v1947_v19 = vmul.f32 %v4024_v49, %v5249_v1  ;;  %v1924_v16 = vsel %vm335_vm8, %v1922_v59, %v1923_v37 }
 0x241   :  { %v285_v45 = vadd.f32 %v274_v18, %v252_v4  ;;  %v1959_v52 = vsel %vm368_vm9, %v1957_v7, %v1958_v15  ;;  %v5302_v9 = vmul.f32 %v4025_v44, %v5249_v1  ;;  %v1950_v3 = vmul.f32 %v4027_v6, %v5249_v1 }
 0x242   :  { %v343_v32 = vsel %vm335_vm8, %v341_v35, %v342_v54  ;;  %v374_v11 = vrot.slane %v359_v23, 6  ;;  %v1919_v28 = vsel %vm335_vm8, %v1917_v20, %v1918_v48  ;;  %v1910_v12 = vmul.f32 %v4027_v6, %v5188_v26 }
 0x243   :  { %v352_v44 = vadd.f32 %v343_v32, %v319_v43  ;;  %v6956_v13 = vrot.slane %v5019_v36, 4  ;;  %v339_v31 = vrot.slane %v325_v47, 5  ;;  %v358_v55 = vmul.f32 %v4024_v49, %v5041_v41 }
 0x244   :  { %1931 = vrot.lane.b32.xlu2 %v1924_v16, %s4117_s7  ;;  %1967 = vrot.lane.b32.xlu1 %v1959_v52, %s4117_s7  ;;  %v336_v54 = vrot.slane %v5080_v2, 5  ;;  %v369_v51 = vrot.slane %v5084_v10, 6  ;;  %v370_v0 = vrot.slane %v5095_v29, 6  ;;  %v6957_v36 = vrot.slane %v5179_v34, 6 }
 0x245   :  { %v307_v4 = vsel %vm302_vm7, %v6956_v13, %v306_v40  ;;  %1927 = vrot.lane.b32.xlu0 %v1919_v28, %s4117_s7  ;;  %v1960_v41 = vrot.slane %v1947_v19, 6  ;;  %v1963_v49 = vrot.slane %v5302_v9, 6  ;;  %v1965_v23 = vrot.slane %v1950_v3, 6  ;;  %v5363_v3 = vld [vmem:[#allocation3] sm:$0xff]  ;;  %v5372_v28 = vld [vmem:[#allocation3 + $0x8] sm:$0xff] }
 0x246   :  { %v318_v59 = vadd.f32 %v307_v4, %v285_v45  ;;  %v5322_v48 = vpop.permute.xlu2 %1623  ;;  %v5324_v26 = vpop.permute.xlu1 %1545  ;;  %v378_v63 = vsel %vm368_vm9, %v6957_v36, %v377_v27  ;;  %v6958_v2 = vrot.slane %v5051_v21, 5  ;;  %v6959_v45 = vmov %v6957_v36 }
 0x247   :  { %v5329_v35 = vpop.permute.xlu0 %1505  ;;  %v386_v29 = vadd.f32 %v378_v63, %v353_v60  ;;  %v376_v47 = vsel %vm368_vm9, %v374_v11, %v6959_v45  ;;  %v1925_v43 = vrot.slane %v1910_v12, 5  ;;  %v372_v7 = vrot.slane %v358_v55, 6  ;;  %v5367_v11 = vld [vmem:[#allocation3 + $0x18] sm:$0xff]  ;;  %v5374_v12 = vld [vmem:[#allocation3 + $0x10] sm:$0x3f]  ;;  %v6963_v63 = vld [vmem:[#allocation15_spill] sm:$0xff] }
 0x248   :  { %v338_v10 = vsel %vm335_vm8, %v336_v54, %v6958_v2  ;;  %v385_v62 = vadd.f32 %v376_v47, %v352_v44  ;;  %v6960_v18 = vmov %v6958_v2  ;;  %v371_v60 = vsel %vm368_vm9, %v369_v51, %v370_v0 }
 0x249   :  { %v350_v27 = vadd.f32 %v338_v10, %v5109_v50  ;;  %v340_v40 = vsel %vm335_vm8, %v6960_v18, %v339_v31  ;;  %v412_v20 = vadd.f32 %v4366_v53, %v386_v29  ;;  %v1961_v16 = vsel %vm368_vm9, %v1958_v15, %v1960_v41  ;;  %v6966_v18 = vld [vmem:[#allocation16_spill] sm:$0xff] }
 0x24a   :  { %v351_v19 = vadd.f32 %v340_v40, %v318_v59  ;;  %v411_v34 = vadd.f32 %v4389_v17, %v385_v62  ;;  %v1966_v52 = vsel %vm368_vm9, %v1963_v49, %v1965_v23  ;;  %v1926_v50 = vsel %vm335_vm8, %v1923_v37, %v1925_v43  ;;  %v6962_v59 = vld [vmem:[#allocation22_spill] sm:$0xff]  ;;  %v6964_v23 = vld [vmem:[#allocation33_spill] sm:$0xff] }
 0x24b   :  { %v452_v9 = vadd.f32 %v4470_v42, %v412_v20  ;;  %v1948_v53 = vmul.f32 %v5236_v30, %v5249_v1  ;;  %v383_v21 = vadd.f32 %v371_v60, %v350_v27  ;;  %v373_v6 = vsel %vm368_vm9, %v370_v0, %v372_v7  ;;  %v6965_v27 = vld [vmem:[#allocation27_spill] sm:$0xff]  ;;  %v6967_v7 = vld [vmem:[#allocation20_spill] sm:$0xff] }
 0x24c   :  { %1969 = vrot.lane.b32.xlu2 %v1961_v16, %s4117_s7  ;;  %1973 = vrot.lane.b32.xlu1 %v1966_v52, %s4117_s7  ;;  %v384_v17 = vadd.f32 %v373_v6, %v351_v19  ;;  %v451_v37 = vadd.f32 %v4393_v22, %v411_v34  ;;  %v2192_v1 = vstv %s5332_s23  ;;  %v5379_v31 = vstv %s5340_s25  ;;  %v6968_v19 = vld [vmem:[#allocation29_spill] sm:$0xff]  ;;  %v6969_v6 = vld [vmem:[#allocation24_spill] sm:$0xff]  ;;  %s6235_s23 = sld [smem:[#allocation4 + $0x42]] }
 0x24d   :  { %1933 = vrot.lane.b32.xlu0 %v1926_v50, %s4117_s7  ;;  %v409_v32 = vadd.f32 %v4354_v38, %v383_v21  ;;  %v492_v13 = vadd.f32 %v4452_v24, %v452_v9  ;;  %v1962_v4 = vrot.slane %v1948_v53, 6  ;;  %v2193_v54 = vmul.f32 %v2192_v1, %v5363_v3  ;;  %s3960_s25 = sld [smem:[#allocation4 + $0x50]] }
 0x24e   :  { %v5359_v15 = vpop.permute.xlu2 %1661  ;;  %v5361_v42 = vpop.permute.xlu1 %1583  ;;  %v410_v44 = vadd.f32 %v4410_v39, %v384_v17  ;;  %v491_v22 = vadd.f32 %v4486_v61, %v451_v37  ;;  %v2195_v51 = vmul.f32 %v2192_v1, %v5367_v11  ;;  %v2220_v0 = vmul.f32 %v5379_v31, %v5372_v28  ;;  %v6961_v61 = vld [vmem:[#allocation18_spill] sm:$0xff] }
 0x24f   :  { %v5369_v30 = vpop.permute.xlu0 %1543  ;;  %v449_v38 = vadd.f32 %v4454_v25, %v409_v32  ;;  %v2221_v39 = vmul.f32 %v5379_v31, %v5374_v12  ;;  %v532_v24 = vadd.f32 %v4436_v8, %v492_v13  ;;  %v1964_v25 = vsel %vm368_vm9, %v1962_v4, %v1963_v49  ;;  %v5403_v8 = vld [vmem:[#allocation3 + $0x20] sm:$0xff]  ;;  %v6970_v32 = vld [vmem:[#allocation36_spill] sm:$0xff]  ;;  %v6972_v4 = vld [vmem:[#allocation25_spill] sm:$0xff] }
 0x250   :  { %v450_v55 = vadd.f32 %v4424_v56, %v410_v44  ;;  %v531_v36 = vadd.f32 %v6962_v59, %v491_v22  ;;  %v2232_v47 = vrot.slane %v2220_v0, 1  ;;  %v5407_v43 = vstv %s3944_s26  ;;  %v6971_v44 = vld [vmem:[#allocation30_spill] sm:$0xff]  ;;  %v6974_v59 = vld [vmem:[#allocation21_spill] sm:$0xff]  ;;  %s3961_s26 = sld [smem:[#allocation4 + $0x57]] }
 0x251   :  { %v489_v56 = vadd.f32 %v6961_v61, %v449_v38  ;;  %v572_v2 = vadd.f32 %v6964_v23, %v532_v24  ;;  %v2234_v49 = vrot.slane %v2221_v39, 1  ;;  %v2196_v34 = vmul.f32 %v2192_v1, %v5403_v8  ;;  %v6973_v61 = vld [vmem:[#allocation32_spill] sm:$0xff] }
 0x252   :  { %v490_v41 = vadd.f32 %v6963_v63, %v450_v55  ;;  %v571_v20 = vadd.f32 %v6967_v7, %v531_v36  ;;  %v2194_v16 = vmul.f32 %v2192_v1, %v5372_v28  ;;  %v2259_v52 = vmul.f32 %v5407_v43, %v5363_v3 }
 0x253   :  { %v529_v40 = vadd.f32 %v6966_v18, %v489_v56  ;;  %v612_v60 = vadd.f32 %v6968_v19, %v572_v2  ;;  %v2235_v9 = vsel %vm203_vm4, %v2232_v47, %v2234_v49  ;;  %v2222_v50 = vmul.f32 %v5379_v31, %v5367_v11  ;;  %v6976_v2 = vld [vmem:[#allocation19_spill] sm:$0xff] }
 0x254   :  { %2201 = vrot.lane.b32.xlu2 %v2193_v54, %s4112_s21  ;;  %2205 = vrot.lane.b32.xlu1 %v2195_v51, %s4112_s21  ;;  %v530_v62 = vadd.f32 %v6965_v27, %v490_v41  ;;  %v5422_v53 = vmul.f32 %v5379_v31, %v5403_v8  ;;  %v2260_v21 = vmul.f32 %v5407_v43, %v5372_v28  ;;  %v2271_v39 = vrot.slane %v2259_v52, 2  ;;  %v6975_v41 = vld [vmem:[#allocation26_spill] sm:$0xff]  ;;  %v6977_v27 = vld [vmem:[#allocation39_spill] sm:$0xff] }
 0x255   :  { %1971 = vrot.lane.b32.xlu0 %v1964_v25, %s4117_s7  ;;  %v611_v37 = vadd.f32 %v6970_v32, %v571_v20  ;;  %v2219_v1 = vmul.f32 %v5379_v31, %v5363_v3  ;;  %v569_v13 = vadd.f32 %v6971_v44, %v529_v40  ;;  %v652_v38 = vadd.f32 %v6972_v4, %v612_v60  ;;  %v5442_v25 = vld [vmem:[#allocation3 + $0x28] sm:$0x3f]  ;;  %v6978_v60 = vld [vmem:[#allocation13_spill] sm:$0xff]  ;;  %v6982_v32 = vld [vmem:[#allocation42_spill] sm:$0xff] }
 0x256   :  { %v5399_v10 = vpop.permute.xlu2 %1667  ;;  %v5401_v29 = vpop.permute.xlu1 %1621  ;;  %v570_v17 = vadd.f32 %v6969_v6, %v530_v62  ;;  %v2236_v51 = vrot.slane %v2222_v50, 1  ;;  %v2237_v0 = vrot.slane %v5422_v53, 1  ;;  %v2272_v24 = vrot.slane %v2260_v21, 2  ;;  %v6980_v53 = vld [vmem:[#allocation38_spill] sm:$0xff] }
 0x257   :  { %v5405_v45 = vpop.permute.xlu0 %1581  ;;  %v651_v56 = vadd.f32 %v6973_v61, %v611_v37  ;;  %v2231_v63 = vrot.slane %v2219_v1, 1  ;;  %v609_v23 = vadd.f32 %v6975_v41, %v569_v13  ;;  %v678_v49 = vadd.f32 %v6976_v2, %v652_v38  ;;  %v6981_v6 = vld [vmem:[#allocation14_spill] sm:$0xff]  ;;  %v6986_v41 = vld [vmem:[#allocation28_spill] sm:$0xff] }
 0x258   :  { %v610_v36 = vadd.f32 %v6974_v59, %v570_v17  ;;  %v2261_v18 = vmul.f32 %v5407_v43, %v5374_v12  ;;  %v2238_v40 = vsel %vm203_vm4, %v2236_v51, %v2237_v0  ;;  %v2273_v7 = vsel %vm236_vm5, %v2271_v39, %v2272_v24  ;;  %v6983_v39 = vld [vmem:[#allocation17_spill] sm:$0xff] }
 0x259   :  { %v5455_v20 = vmul.f32 %v5407_v43, %v5403_v8  ;;  %v2264_v19 = vmul.f32 %v5407_v43, %v5442_v25  ;;  %v2224_v52 = vmul.f32 %v5379_v31, %v5442_v25  ;;  %v718_v21 = vadd.f32 %v6980_v53, %v678_v49 }
 0x25a   :  { %v650_v62 = vadd.f32 %v6977_v27, %v610_v36  ;;  %v2298_v38 = vstv %s3945_s28  ;;  %v6985_v36 = vld [vmem:[#allocation41_spill] sm:$0xff]  ;;  %s3962_s28 = sld [smem:[#allocation4 + $0x5e]] }
 0x25b   :  { %v2277_v31 = vrot.slane %v5455_v20, 2  ;;  %v2279_v4 = vrot.slane %v2264_v19, 2  ;;  %v2239_v51 = vrot.slane %v2224_v52, 1  ;;  %v2299_v2 = vmul.f32 %v2298_v38, %v5363_v3 }
 0x25c   :  { %2207 = vrot.lane.b32.xlu2 %v2196_v34, %s4112_s21  ;;  %2243 = vrot.lane.b32.xlu1 %v2235_v9, %s4112_s21  ;;  %v677_v34 = vadd.f32 %v6978_v60, %v651_v56  ;;  %v6979_v9 = vld [vmem:[#allocation23_spill] sm:$0xff]  ;;  %v676_v17 = vadd.f32 %v6981_v6, %v650_v62  ;;  %v6984_v56 = vld [vmem:[#allocation34_spill] sm:$0xff]  ;;  %v5483_v49 = vmul.f32 %v2298_v38, %v5372_v28  ;;  %v5503_v6 = vstv %s3946_s29  ;;  %s3963_s29 = sld [smem:[#allocation4 + $0x35]] }
 0x25d   :  { %2203 = vrot.lane.b32.xlu0 %v2194_v16, %s4112_s21  ;;  %v2233_v16 = vsel %vm203_vm4, %v2231_v63, %v2232_v47  ;;  %v649_v50 = vadd.f32 %v6979_v9, %v609_v23  ;;  %v2274_v47 = vrot.slane %v2261_v18, 2  ;;  %v758_v59 = vadd.f32 %v6984_v56, %v718_v21  ;;  %v6990_v9 = vld [vmem:[#allocation37_spill] sm:$0xff]  ;;  %v6994_v56 = vld [vmem:[#allocation31_spill] sm:$0xff] }
 0x25e   :  { %v5435_v22 = vpop.permute.xlu2 %1705  ;;  %v5437_v55 = vpop.permute.xlu1 %1627  ;;  %v717_v37 = vadd.f32 %v6982_v32, %v677_v34  ;;  %v716_v23 = vadd.f32 %v6986_v41, %v676_v17  ;;  %v2280_v62 = vsel %vm236_vm5, %v2277_v31, %v2279_v4  ;;  %v2302_v18 = vmul.f32 %v2298_v38, %v5367_v11  ;;  %v6995_v41 = vld [vmem:[#allocation44_spill] sm:$0xff] }
 0x25f   :  { %v5439_v54 = vpop.permute.xlu0 %1587  ;;  %v675_v61 = vadd.f32 %v6983_v39, %v649_v50  ;;  %v2275_v27 = vsel %vm236_vm5, %v2272_v24, %v2274_v47  ;;  %v2240_v19 = vsel %vm203_vm4, %v2237_v0, %v2239_v51  ;;  %v2262_v60 = vmul.f32 %v5407_v43, %v5367_v11  ;;  %v6988_v24 = vld [vmem:[#allocation35_spill] sm:$0xff]  ;;  %v6992_v47 = vld [vmem:[#allocation50_spill] sm:$0xff] }
 0x260   :  { %v757_v63 = vadd.f32 %v6985_v36, %v717_v37  ;;  %v2311_v0 = vrot.slane %v2299_v2, 3  ;;  %v2312_v32 = vrot.slane %v5483_v49, 3  ;;  %v2316_v43 = vrot.slane %v2302_v18, 3  ;;  %v6993_v39 = vld [vmem:[#allocation54_spill] sm:$0xff] }
 0x261   :  { %v715_v34 = vadd.f32 %v6988_v24, %v675_v61  ;;  %v2276_v51 = vrot.slane %v2262_v60, 2  ;;  %v5513_v36 = vmul.f32 %v5503_v6, %v5372_v28  ;;  %v6998_v60 = vld [vmem:[#allocation53_spill] sm:$0xff] }
 0x262   :  { %v797_v50 = vadd.f32 %v6990_v9, %v757_v63  ;;  %v2341_v63 = vmul.f32 %v5503_v6, %v5374_v12  ;;  %v2313_v2 = vsel %vm269_vm6, %v2311_v0, %v2312_v32 }
 0x264   :  { %2245 = vrot.lane.b32.xlu2 %v2238_v40, %s4112_s21  ;;  %2281 = vrot.lane.b32.xlu1 %v2273_v7, %s4112_s21  ;;  %v2303_v40 = vmul.f32 %v2298_v38, %v5403_v8  ;;  %v6987_v7 = vld [vmem:[#allocation51_spill] sm:$0xff]  ;;  %v837_v61 = vadd.f32 %v6993_v39, %v797_v50  ;;  %v2352_v50 = vrot.slane %v5513_v36, 4  ;;  %v2354_v0 = vrot.slane %v2341_v63, 4 }
 0x265   :  { %2241 = vrot.lane.b32.xlu0 %v2233_v16, %s4112_s21  ;;  %v798_v20 = vadd.f32 %v6987_v7, %v758_v59  ;;  %v6989_v16 = vld [vmem:[#allocation45_spill] sm:$0xff]  ;;  %v755_v59 = vadd.f32 %v6994_v56, %v715_v34  ;;  %v2301_v7 = vmul.f32 %v2298_v38, %v5374_v12  ;;  %v6999_v34 = vld [vmem:[#allocation63_spill] sm:$0xff]  ;;  %v2342_v36 = vmul.f32 %v5503_v6, %v5367_v11 }
 0x266   :  { %v5470_v1 = vpop.permute.xlu2 %1729  ;;  %v5472_v44 = vpop.permute.xlu1 %1665  ;;  %v756_v52 = vadd.f32 %v6989_v16, %v716_v23  ;;  %v2317_v37 = vrot.slane %v2303_v40, 3  ;;  %v2278_v40 = vsel %vm236_vm5, %v2276_v51, %v2277_v31  ;;  %v877_v24 = vadd.f32 %v6998_v60, %v837_v61  ;;  %v7002_v39 = vld [vmem:[#allocation47_spill] sm:$0xff]  ;;  %v7003_v56 = vld [vmem:[#allocation49_spill] sm:$0xff]  ;;  %v7007_v60 = vld [vmem:[#allocation56_spill] sm:$0xff] }
 0x267   :  { %v5474_v13 = vpop.permute.xlu0 %1625  ;;  %v838_v4 = vadd.f32 %v6992_v47, %v798_v20  ;;  %v6997_v20 = vld [vmem:[#allocation48_spill] sm:$0xff]  ;;  %v5538_v51 = vstv %s3947_s30  ;;  %s3964_s30 = sld [smem:[#allocation4 + $0x3c]] }
 0x268   :  { %v796_v23 = vadd.f32 %v6995_v41, %v756_v52  ;;  %v2318_v49 = vsel %vm269_vm6, %v2316_v43, %v2317_v37  ;;  %v7001_v47 = vld [vmem:[#allocation40_spill] sm:$0xff]  ;;  %v7004_v41 = vld [vmem:[#allocation57_spill] sm:$0xff] }
 0x26c   :  { %2283 = vrot.lane.b32.xlu2 %v2275_v27, %s4112_s21  ;;  %2287 = vrot.lane.b32.xlu1 %v2280_v62, %s4112_s21  ;;  %v2304_v27 = vmul.f32 %v2298_v38, %v5442_v25  ;;  %v6996_v62 = vld [vmem:[#allocation46_spill] sm:$0xff]  ;;  %v836_v38 = vadd.f32 %v7001_v47, %v796_v23  ;;  %v5550_v23 = vmul.f32 %v5503_v6, %v5403_v8 }
 0x26d   :  { %2247 = vrot.lane.b32.xlu0 %v2240_v19, %s4112_s21  ;;  %v878_v18 = vadd.f32 %v6996_v62, %v838_v4  ;;  %v795_v19 = vadd.f32 %v6997_v20, %v755_v59  ;;  %v2314_v4 = vrot.slane %v2301_v7, 3  ;;  %v917_v59 = vadd.f32 %v7003_v56, %v877_v24 }
 0x26e   :  { %v5499_v53 = vpop.permute.xlu2 %1767  ;;  %v5501_v21 = vpop.permute.xlu1 %1703  ;;  %v2319_v31 = vrot.slane %v2304_v27, 3  ;;  %v2379_v27 = vmul.f32 %v5538_v51, %v5363_v3  ;;  %v2339_v20 = vmul.f32 %v5503_v6, %v5363_v3 }
 0x26f   :  { %6991 = vst [vmem:[#allocation18_spill] sm:$0xff] %v5499_v53  ;;  %v5505_v17 = vpop.permute.xlu0 %1663  ;;  %v918_v16 = vadd.f32 %v6999_v34, %v878_v18  ;;  %v835_v61 = vadd.f32 %v7002_v39, %v795_v19  ;;  %v2355_v18 = vsel %vm302_vm7, %v2352_v50, %v2354_v0  ;;  %v2315_v7 = vsel %vm269_vm6, %v2312_v32, %v2314_v4  ;;  %v7008_v34 = vld [vmem:[#allocation43_spill] sm:$0xff]  ;;  %v7009_v0 = vld [vmem:[#allocation58_spill] sm:$0xff] }
 0x270   :  { %v2320_v63 = vsel %vm269_vm6, %v2317_v37, %v2319_v31  ;;  %v7006_v37 = vld [vmem:[#allocation66_spill] sm:$0xff]  ;;  %v2356_v32 = vrot.slane %v2342_v36, 4  ;;  %v2357_v4 = vrot.slane %v5550_v23, 4  ;;  %v2391_v56 = vrot.slane %v2379_v27, 5  ;;  %v7014_v23 = vld [vmem:[#allocation52_spill] sm:$0xff] }
 0x271   :  { %v943_v19 = vadd.f32 %v7006_v37, %v917_v59  ;;  %v7011_v59 = vld [vmem:[#allocation75_spill] sm:$0xff]  ;;  %v5580_v37 = vmul.f32 %v5538_v51, %v5403_v8  ;;  %v2384_v36 = vmul.f32 %v5538_v51, %v5442_v25 }
 0x274   :  { %2321 = vrot.lane.b32.xlu2 %v2313_v2, %s4112_s21  ;;  %2325 = vrot.lane.b32.xlu1 %v2318_v49, %s4112_s21  ;;  %v876_v2 = vadd.f32 %v7004_v41, %v836_v38  ;;  %v7005_v49 = vld [vmem:[#allocation62_spill] sm:$0xff] }
 0x275   :  { %2285 = vrot.lane.b32.xlu0 %v2278_v40, %s4112_s21  ;;  %v944_v62 = vadd.f32 %v7005_v49, %v918_v16  ;;  %v2380_v40 = vmul.f32 %v5538_v51, %v5372_v28  ;;  %v875_v16 = vadd.f32 %v7008_v34, %v835_v61  ;;  %v7013_v61 = vld [vmem:[#allocation65_spill] sm:$0xff] }
 0x276   :  { %v5530_v52 = vpop.permute.xlu2 %1773  ;;  %v5532_v9 = vpop.permute.xlu1 %1727  ;;  %v916_v24 = vadd.f32 %v7007_v60, %v876_v2  ;;  %v7012_v2 = vld [vmem:[#allocation60_spill] sm:$0xff]  ;;  %v7015_v60 = vld [vmem:[#allocation74_spill] sm:$0xff] }
 0x277   :  { %7000 = vst [vmem:[#allocation22_spill] sm:$0xff] %v5532_v9  ;;  %v5535_v43 = vpop.permute.xlu0 %1701  ;;  %v984_v31 = vadd.f32 %v7009_v0, %v944_v62  ;;  %v2392_v41 = vrot.slane %v2380_v40, 5  ;;  %v2381_v62 = vmul.f32 %v5538_v51, %v5374_v12  ;;  %v2358_v40 = vsel %vm302_vm7, %v2356_v32, %v2357_v4  ;;  %v7016_v0 = vld [vmem:[#allocation59_spill] sm:$0xff] }
 0x278   :  { %v942_v27 = vadd.f32 %v7014_v23, %v916_v24  ;;  %v7018_v24 = vld [vmem:[#allocation69_spill] sm:$0xff]  ;;  %v2397_v23 = vrot.slane %v5580_v37, 5 }
 0x279   :  { %v1024_v49 = vadd.f32 %v7011_v59, %v984_v31  ;;  %v7017_v59 = vld [vmem:[#allocation61_spill] sm:$0xff] }
 0x27a   :  { %v982_v32 = vadd.f32 %v7018_v24, %v942_v27  ;;  %v7024_v24 = vld [vmem:[#allocation87_spill] sm:$0xff] }
 0x27b   :  { %v1064_v34 = vadd.f32 %v7015_v60, %v1024_v49 }
 0x27c   :  { %2327 = vrot.lane.b32.xlu2 %v2320_v63, %s4112_s21  ;;  %2363 = vrot.lane.b32.xlu1 %v2355_v18, %s4112_s21  ;;  %v2351_v18 = vrot.slane %v2339_v20, 4  ;;  %v915_v63 = vadd.f32 %v7012_v2, %v875_v16  ;;  %v2393_v20 = vsel %vm335_vm8, %v2391_v56, %v2392_v41  ;;  %v2344_v16 = vmul.f32 %v5503_v6, %v5442_v25 }
 0x27d   :  { %2323 = vrot.lane.b32.xlu0 %v2315_v7, %s4112_s21  ;;  %v983_v7 = vadd.f32 %v7013_v61, %v943_v19  ;;  %v2394_v61 = vrot.slane %v2381_v62, 5 }
 0x27e   :  { %v5566_v47 = vpop.permute.xlu2 %1811  ;;  %v5568_v38 = vpop.permute.xlu1 %1733  ;;  %v2353_v19 = vsel %vm302_vm7, %v2351_v18, %v2352_v50  ;;  %v941_v31 = vadd.f32 %v7016_v0, %v915_v63  ;;  %v7020_v18 = vld [vmem:[#allocation78_spill] sm:$0xff]  ;;  %v2359_v60 = vrot.slane %v2344_v16, 4  ;;  %v7022_v0 = vld [vmem:[#allocation55_spill] sm:$0xff]  ;;  %v7025_v16 = vld [vmem:[#allocation77_spill] sm:$0xff] }
 0x27f   :  { %7010 = vst [vmem:[#allocation15_spill] sm:$0xff] %v5566_v47  ;;  %v5570_v39 = vpop.permute.xlu0 %1707  ;;  %v1023_v2 = vadd.f32 %v7017_v59, %v983_v7  ;;  %v2418_v7 = vstv %s3948_s3  ;;  %v7023_v59 = vld [vmem:[#allocation68_spill] sm:$0xff]  ;;  %v2395_v53 = vsel %vm335_vm8, %v2392_v41, %v2394_v61  ;;  %v2382_v41 = vmul.f32 %v5538_v51, %v5367_v11  ;;  %v7032_v51 = vld [vmem:[#allocation81_spill] sm:$0xff]  ;;  %s3965_s3 = sld [smem:[#allocation4 + $0x43]] }
 0x280   :  { %v1022_v27 = vadd.f32 %v7023_v59, %v982_v32  ;;  %v2419_v37 = vmul.f32 %v2418_v7, %v5363_v3  ;;  %v7026_v32 = vld [vmem:[#allocation72_spill] sm:$0xff] }
 0x281   :  { %v1063_v6 = vadd.f32 %v7020_v18, %v1023_v2  ;;  %v2422_v2 = vmul.f32 %v2418_v7, %v5367_v11 }
 0x283   :  { %v1103_v18 = vadd.f32 %v7025_v16, %v1063_v6 }
 0x284   :  { %2365 = vrot.lane.b32.xlu2 %v2358_v40, %s4112_s21  ;;  %2401 = vrot.lane.b32.xlu1 %v2393_v20, %s4112_s21  ;;  %v2399_v40 = vrot.slane %v2384_v36, 5  ;;  %v7021_v20 = vld [vmem:[#allocation70_spill] sm:$0xff]  ;;  %v2420_v36 = vmul.f32 %v2418_v7, %v5372_v28 }
 0x285   :  { %2361 = vrot.lane.b32.xlu0 %v2353_v19, %s4112_s21  ;;  %v1104_v63 = vadd.f32 %v7021_v20, %v1064_v34  ;;  %v981_v19 = vadd.f32 %v7022_v0, %v941_v31  ;;  %v2423_v34 = vmul.f32 %v2418_v7, %v5403_v8  ;;  %v2360_v31 = vsel %vm302_vm7, %v2357_v4, %v2359_v60 }
 0x286   :  { %v5597_v56 = vpop.permute.xlu2 %1849  ;;  %v5599_v49 = vpop.permute.xlu1 %1771  ;;  %v2400_v62 = vsel %vm335_vm8, %v2397_v23, %v2399_v40  ;;  %v7027_v40 = vld [vmem:[#allocation64_spill] sm:$0xff]  ;;  %v2436_v4 = vrot.slane %v2422_v2, 6  ;;  %v2421_v2 = vmul.f32 %v2418_v7, %v5374_v12 }
 0x287   :  { %7019 = vst [vmem:[#allocation33_spill] sm:$0xff] %v5597_v56  ;;  %v5602_v50 = vpop.permute.xlu0 %1731  ;;  %v1144_v56 = vadd.f32 %v7024_v24, %v1104_v63  ;;  %v1021_v61 = vadd.f32 %v7026_v32, %v981_v19  ;;  %v1062_v20 = vadd.f32 %v7027_v40, %v1022_v27  ;;  %v7028_v63 = vld [vmem:[#allocation86_spill] sm:$0xff]  ;;  %v2431_v24 = vrot.slane %v2419_v37, 6  ;;  %v7034_v27 = vld [vmem:[#allocation71_spill] sm:$0xff] }
 0x288   :  { %v2437_v60 = vrot.slane %v2423_v34, 6  ;;  %v2396_v19 = vrot.slane %v2382_v41, 5  ;;  %v7037_v34 = vld [vmem:[#allocation80_spill] sm:$0xff]  ;;  %v7039_v41 = vld [vmem:[#allocation67_spill] sm:$0xff] }
 0x289   :  { %v1184_v0 = vadd.f32 %v7028_v63, %v1144_v56  ;;  %v1102_v16 = vadd.f32 %v7032_v51, %v1062_v20  ;;  %v1061_v32 = vadd.f32 %v7034_v27, %v1021_v61  ;;  %v7035_v56 = vld [vmem:[#allocation90_spill] sm:$0xff]  ;;  %v7038_v51 = vld [vmem:[#allocation99_spill] sm:$0xff]  ;;  %v2434_v27 = vrot.slane %v2421_v2, 6 }
 0x28a   :  { %v7036_v63 = vld [vmem:[#allocation82_spill] sm:$0xff]  ;;  %v2438_v37 = vsel %vm368_vm9, %v2436_v4, %v2437_v60 }
 0x28b   :  { %v1142_v20 = vadd.f32 %v7037_v34, %v1102_v16  ;;  %v1101_v61 = vadd.f32 %v7039_v41, %v1061_v32  ;;  %v5657_v34 = vstv %s3950_s5  ;;  %v7047_v32 = vld [vmem:[#allocation93_spill] sm:$0xff]  ;;  %s3968_s5 = sld [smem:[#allocation4 + $0x58]] }
 0x28c   :  { %2403 = vrot.lane.b32.xlu2 %v2395_v53, %s4112_s21  ;;  %2407 = vrot.lane.b32.xlu1 %v2400_v62, %s4112_s21  ;;  %v2432_v62 = vrot.slane %v2420_v36, 6  ;;  %v2424_v36 = vmul.f32 %v2418_v7, %v5442_v25  ;;  %v2485_v2 = vmul.f32 %v5657_v34, %v5363_v3 }
 0x28d   :  { %2367 = vrot.lane.b32.xlu0 %v2360_v31, %s4112_s21  ;;  %v7033_v31 = vld [vmem:[#allocation73_spill] sm:$0xff] }
 0x28e   :  { %v5625_v59 = vpop.permute.xlu2 %1887  ;;  %v5627_v6 = vpop.permute.xlu1 %1809  ;;  %v1143_v9 = vadd.f32 %v7033_v31, %v1103_v18  ;;  %v2439_v16 = vrot.slane %v2424_v36, 6  ;;  %v2435_v36 = vsel %vm368_vm9, %v2432_v62, %v2434_v27 }
 0x28f   :  { %7029 = vst [vmem:[#allocation27_spill] sm:$0xff] %v5625_v59  ;;  %v5629_v53 = vpop.permute.xlu0 %1769  ;;  %v1210_v59 = vadd.f32 %v7036_v63, %v1184_v0  ;;  %v7040_v0 = vld [vmem:[#allocation89_spill] sm:$0xff]  ;;  %v7045_v63 = vld [vmem:[#allocation76_spill] sm:$0xff] }
 0x290   :  { %7030 = vst [vmem:[#allocation16_spill] sm:$0xff] %v5627_v6  ;;  %v1183_v40 = vadd.f32 %v7035_v56, %v1143_v9  ;;  %v2433_v6 = vsel %vm368_vm9, %v2431_v24, %v2432_v62  ;;  %v2398_v9 = vsel %vm335_vm8, %v2396_v19, %v2397_v23  ;;  %v7046_v23 = vld [vmem:[#allocation98_spill] sm:$0xff] }
 0x291   :  { %7031 = vst [vmem:[#allocation20_spill] sm:$0xff] %v5629_v53  ;;  %v1250_v18 = vadd.f32 %v7038_v51, %v1210_v59  ;;  %v2458_v59 = vstv %s3949_s4  ;;  %s3967_s4 = sld [smem:[#allocation4 + $0x51]] }
 0x292   :  { %v1209_v24 = vadd.f32 %v7040_v0, %v1183_v40  ;;  %v7048_v40 = vld [vmem:[#allocation85_spill] sm:$0xff]  ;;  %v2460_v41 = vmul.f32 %v2458_v59, %v5372_v28  ;;  %v2440_v0 = vsel %vm368_vm9, %v2437_v60, %v2439_v16  ;;  %v7052_v60 = vld [vmem:[#allocation92_spill] sm:$0xff] }
 0x293   :  { %v1290_v19 = vadd.f32 %v7046_v23, %v1250_v18  ;;  %v7051_v23 = vld [vmem:[#allocation94_spill] sm:$0xff] }
 0x294   :  { %2441 = vrot.lane.b32.xlu2 %v2433_v6, %s4112_s21  ;;  %2445 = vrot.lane.b32.xlu1 %v2438_v37, %s4112_s21  ;;  %v7044_v6 = vld [vmem:[#allocation84_spill] sm:$0xff]  ;;  %v1182_v37 = vadd.f32 %v7045_v63, %v1142_v20  ;;  %v2486_v20 = vmul.f32 %v5657_v34, %v5372_v28 }
 0x295   :  { %2405 = vrot.lane.b32.xlu0 %v2398_v9, %s4112_s21  ;;  %v1141_v56 = vadd.f32 %v7044_v6, %v1101_v61  ;;  %v1249_v9 = vadd.f32 %v7048_v40, %v1209_v24  ;;  %v7049_v61 = vld [vmem:[#allocation83_spill] sm:$0xff]  ;;  %v7050_v6 = vld [vmem:[#allocation102_spill] sm:$0xff] }
 0x296   :  { %v5648_v4 = vpop.permute.xlu2 %1893  ;;  %v5650_v31 = vpop.permute.xlu1 %1847  ;;  %v1208_v51 = vadd.f32 %v7047_v32, %v1182_v37  ;;  %v1330_v37 = vadd.f32 %v7051_v23, %v1290_v19  ;;  %v7053_v24 = vld [vmem:[#allocation111_spill] sm:$0xff]  ;;  %v7057_v23 = vld [vmem:[#allocation96_spill] sm:$0xff] }
 0x297   :  { %7041 = vst [vmem:[#allocation29_spill] sm:$0xff] %v5648_v4  ;;  %v5652_v7 = vpop.permute.xlu0 %1807  ;;  %v1181_v18 = vadd.f32 %v7049_v61, %v1141_v56  ;;  %v1289_v63 = vadd.f32 %v7050_v6, %v1249_v9  ;;  %v2497_v56 = vrot.slane %v2485_v2, 1  ;;  %v2498_v9 = vrot.slane %v2486_v20, 1  ;;  %v7055_v19 = vld [vmem:[#allocation79_spill] sm:$0xff]  ;;  %v7059_v20 = vld [vmem:[#allocation110_spill] sm:$0xff] }
 0x298   :  { %7042 = vst [vmem:[#allocation24_spill] sm:$0xff] %v5650_v31  ;;  %v1248_v62 = vadd.f32 %v7052_v60, %v1208_v51  ;;  %v1370_v16 = vadd.f32 %v7053_v24, %v1330_v37  ;;  %v2487_v51 = vmul.f32 %v5657_v34, %v5374_v12  ;;  %v7058_v60 = vld [vmem:[#allocation88_spill] sm:$0xff] }
 0x299   :  { %7043 = vst [vmem:[#allocation36_spill] sm:$0xff] %v5652_v7  ;;  %v1207_v61 = vadd.f32 %v7055_v19, %v1181_v18  ;;  %v2490_v18 = vmul.f32 %v5657_v34, %v5442_v25  ;;  %v2459_v19 = vmul.f32 %v2458_v59, %v5363_v3 }
 0x29a   :  { %v1288_v2 = vadd.f32 %v7058_v60, %v1248_v62  ;;  %v1410_v24 = vadd.f32 %v7059_v20, %v1370_v16  ;;  %v2500_v62 = vrot.slane %v2487_v51, 1  ;;  %v7063_v60 = vld [vmem:[#allocation114_spill] sm:$0xff] }
 0x29b   :  { %v1247_v37 = vadd.f32 %v7057_v23, %v1207_v61  ;;  %v7062_v61 = vld [vmem:[#allocation95_spill] sm:$0xff] }
 0x29c   :  { %2447 = vrot.lane.b32.xlu2 %v2440_v0, %s4112_s21  ;;  %2469 = vrot.lane.b32.xlu1 %v2460_v41, %s4113_s24  ;;  %v7056_v0 = vld [vmem:[#allocation101_spill] sm:$0xff]  ;;  %v2461_v41 = vmul.f32 %v2458_v59, %v5367_v11 }
 0x29d   :  { %2443 = vrot.lane.b32.xlu0 %v2435_v36, %s4112_s21  ;;  %v1329_v6 = vadd.f32 %v7056_v0, %v1289_v63  ;;  %v5689_v36 = vmul.f32 %v5657_v34, %v5403_v8  ;;  %s3936_s21 = sld [smem:[#allocation4 + $0x38]]  ;;  %v2499_v63 = vsel %vm203_vm4, %v2497_v56, %v2498_v9  ;;  %v7060_v0 = vld [vmem:[#allocation105_spill] sm:$0xff]  ;;  %v1287_v23 = vadd.f32 %v7062_v61, %v1247_v37  ;;  %v7064_v56 = vld [vmem:[#allocation106_spill] sm:$0xff] }
 0x29e   :  { %v5676_v27 = vpop.permute.xlu2 %1931  ;;  %v5678_v32 = vpop.permute.xlu1 %1853  ;;  %v1328_v31 = vadd.f32 %v7060_v0, %v1288_v2  ;;  %v1450_v4 = vadd.f32 %v7064_v56, %v1410_v24  ;;  %v2501_v37 = vsel %vm203_vm4, %v2498_v9, %v2500_v62  ;;  %v7071_v9 = vld [vmem:[#allocation108_spill] sm:$0xff] }
 0x29f   :  { %7054 = vst [vmem:[#allocation30_spill] sm:$0xff] %v5676_v27  ;;  %v5680_v40 = vpop.permute.xlu0 %1813  ;;  %v7061_v27 = vld [vmem:[#allocation97_spill] sm:$0xff]  ;;  %v2503_v16 = vrot.slane %v5689_v36, 1 }
 0x2a0   :  { %v1369_v7 = vadd.f32 %v7061_v27, %v1329_v6  ;;  %v2505_v27 = vrot.slane %v2490_v18, 1  ;;  %v1476_v36 = vadd.f32 %v5285_v58, %v1450_v4  ;;  %v7070_v18 = vld [vmem:[#allocation113_spill] sm:$0xff] }
 0x2a2   :  { %v1409_v20 = vadd.f32 %v7063_v60, %v1369_v7  ;;  %v2462_v7 = vmul.f32 %v2458_v59, %v5403_v8  ;;  %v2506_v60 = vsel %vm203_vm4, %v2503_v16, %v2505_v27  ;;  %v2488_v59 = vmul.f32 %v5657_v34, %v5367_v11 }
 0x2a3   :  { %v5721_v24 = vstv %s3936_s21  ;;  %v1516_v27 = vadd.f32 %v5279_v14, %v1476_v36  ;;  %s3970_s21 = sld [smem:[#allocation4 + $0x36]] }
 0x2a4   :  { %2471 = vrot.lane.b32.xlu2 %v2461_v41, %s4113_s24  ;;  %2507 = vrot.lane.b32.xlu1 %v2499_v63, %s4113_s24  ;;  %v2524_v41 = vstv %s3951_s6  ;;  %v7068_v63 = vld [vmem:[#allocation104_spill] sm:$0xff]  ;;  %v1449_v61 = vadd.f32 %v7070_v18, %v1409_v20  ;;  %v2003_v34 = vmul.f32 %v5721_v24, %v5374_v12  ;;  %s3969_s6 = sld [smem:[#allocation4 + $0x5f]] }
 0x2a5   :  { %2467 = vrot.lane.b32.xlu0 %v2459_v19, %s4113_s24  ;;  %v1368_v51 = vadd.f32 %v7068_v63, %v1328_v31  ;;  %v7069_v19 = vld [vmem:[#allocation91_spill] sm:$0xff]  ;;  %v2525_v56 = vmul.f32 %v2524_v41, %v5363_v3  ;;  %v5728_v31 = vmul.f32 %v2524_v41, %v5372_v28  ;;  %v2528_v58 = vmul.f32 %v2524_v41, %v5367_v11 }
 0x2a6   :  { %v5707_v47 = vpop.permute.xlu2 %1969  ;;  %v5709_v2 = vpop.permute.xlu1 %1891  ;;  %v1327_v0 = vadd.f32 %v7069_v19, %v1287_v23  ;;  %v5732_v4 = vmul.f32 %v2524_v41, %v5403_v8  ;;  %v7072_v23 = vld [vmem:[#allocation100_spill] sm:$0xff]  ;;  %v5746_v63 = vmul.f32 %v5721_v24, %v5372_v28  ;;  %v7073_v19 = vld [vmem:[#allocation117_spill] sm:$0xff] }
 0x2a7   :  { %7065 = vst [vmem:[#allocation25_spill] sm:$0xff] %v5707_v47  ;;  %v5713_v6 = vpop.permute.xlu0 %1851  ;;  %v1408_v20 = vadd.f32 %v7072_v23, %v1368_v51  ;;  %v2537_v18 = vrot.slane %v2525_v56, 2  ;;  %v2542_v23 = vrot.slane %v2528_v58, 2  ;;  %v2530_v56 = vmul.f32 %v2524_v41, %v5442_v25 }
 0x2a8   :  { %7066 = vst [vmem:[#allocation32_spill] sm:$0xff] %v5709_v2  ;;  %v1367_v62 = vadd.f32 %v7071_v9, %v1327_v0  ;;  %v7074_v0 = vld [vmem:[#allocation109_spill] sm:$0xff]  ;;  %v2538_v9 = vrot.slane %v5728_v31, 2  ;;  %v2543_v47 = vrot.slane %v5732_v4, 2  ;;  %v2502_v2 = vrot.slane %v2488_v59, 1  ;;  %v7079_v4 = vld [vmem:[#allocation116_spill] sm:$0xff] }
 0x2a9   :  { %7067 = vst [vmem:[#allocation21_spill] sm:$0xff] %v5713_v6  ;;  %v1448_v51 = vadd.f32 %v7073_v19, %v1408_v20  ;;  %v1475_v14 = vadd.f32 %v7074_v0, %v1449_v61  ;;  %v7078_v6 = vld [vmem:[#allocation107_spill] sm:$0xff]  ;;  %v1556_v61 = vadd.f32 %v5223_v46, %v1516_v27  ;;  %v5769_v19 = vstv %s5719_s10  ;;  %s3972_s10 = sld [smem:[#allocation4 + $0x44]] }
 0x2aa   :  { %v1407_v53 = vadd.f32 %v7078_v6, %v1367_v62  ;;  %v2014_v46 = vrot.slane %v5746_v63, 1  ;;  %v2016_v59 = vrot.slane %v2003_v34, 1  ;;  %v2539_v62 = vsel %vm236_vm5, %v2537_v18, %v2538_v9 }
 0x2ab   :  { %v1515_v20 = vadd.f32 %v5329_v35, %v1475_v14  ;;  %v1474_v6 = vadd.f32 %v7079_v4, %v1448_v51  ;;  %v1596_v35 = vadd.f32 %v5439_v54, %v1556_v61  ;;  %v2544_v27 = vsel %vm236_vm5, %v2542_v23, %v2543_v47 }
 0x2ac   :  { %2509 = vrot.lane.b32.xlu2 %v2501_v37, %s4113_s24  ;;  %2513 = vrot.lane.b32.xlu1 %v2506_v60, %s4113_s24  ;;  %v5757_v60 = vstv %s5711_s8  ;;  %v2504_v14 = vsel %vm203_vm4, %v2502_v2, %v2503_v16  ;;  %v5793_v54 = vstv %s5741_s11  ;;  %v2527_v63 = vmul.f32 %v2524_v41, %v5374_v12  ;;  %s3971_s8 = sld [smem:[#allocation4 + $0x3d]] }
 0x2ad   :  { %2473 = vrot.lane.b32.xlu0 %v2462_v7, %s4113_s24  ;;  %v5774_v0 = vmul.f32 %v5757_v60, %v5372_v28  ;;  %v2567_v58 = vmul.f32 %v5757_v60, %v5374_v12  ;;  %v1555_v51 = vadd.f32 %v5324_v26, %v1515_v20  ;;  %v5798_v34 = vmul.f32 %v5769_v19, %v5372_v28  ;;  %s3974_s11 = sld [smem:[#allocation4 + $0x52]] }
 0x2ae   :  { %v5752_v36 = vpop.permute.xlu2 %2201  ;;  %v5754_v37 = vpop.permute.xlu1 %1929  ;;  %v2545_v16 = vrot.slane %v2530_v56, 2  ;;  %v1636_v23 = vadd.f32 %v5437_v55, %v1596_v35  ;;  %v5811_v61 = vmul.f32 %v5769_v19, %v5363_v3  ;;  %v5814_v56 = vsel %vm203_vm4, %v2014_v46, %v2016_v59 }
 0x2af   :  { %7075 = vst [vmem:[#allocation26_spill] sm:$0xff] %v5752_v36  ;;  %v5759_v7 = vpop.permute.xlu0 %1889  ;;  %v2001_v36 = vmul.f32 %v5721_v24, %v5363_v3  ;;  %v2578_v2 = vrot.slane %v5774_v0, 3  ;;  %v2540_v35 = vrot.slane %v2527_v63, 2  ;;  %v5848_v63 = vmul.f32 %v5757_v60, %v5403_v8 }
 0x2b0   :  { %7076 = vst [vmem:[#allocation19_spill] sm:$0xff] %v5754_v37  ;;  %v7080_v37 = vld [vmem:[#allocation103_spill] sm:$0xff]  ;;  %v2546_v59 = vsel %vm236_vm5, %v2543_v47, %v2545_v16  ;;  %v2568_v47 = vmul.f32 %v5757_v60, %v5367_v11 }
 0x2b1   :  { %7077 = vst [vmem:[#allocation39_spill] sm:$0xff] %v5759_v7  ;;  %v1447_v7 = vadd.f32 %v7080_v37, %v1407_v53  ;;  %v2580_v53 = vrot.slane %v2567_v58, 3  ;;  %v7081_v37 = vld [vmem:[#allocation112_spill] sm:$0xff]  ;;  %v2013_v4 = vrot.slane %v2001_v36, 1  ;;  %v5818_v58 = vmul.f32 %v5793_v54, %v5363_v3 }
 0x2b2   :  { %v1514_v18 = vadd.f32 %v7081_v37, %v1474_v6  ;;  %v1595_v6 = vadd.f32 %v5277_v5, %v1555_v51  ;;  %v1676_v51 = vadd.f32 %v5399_v10, %v1636_v23  ;;  %v2541_v37 = vsel %vm236_vm5, %v2538_v9, %v2540_v35 }
 0x2b3   :  { %v1473_v26 = vadd.f32 %v5233_v33, %v1447_v7  ;;  %v5822_v33 = vmul.f32 %v5793_v54, %v5372_v28  ;;  %v2581_v36 = vsel %vm269_vm6, %v2578_v2, %v2580_v53 }
 0x2b4   :  { %2547 = vrot.lane.b32.xlu2 %v2539_v62, %s4113_s24  ;;  %2551 = vrot.lane.b32.xlu1 %v2544_v27, %s4113_s24  ;;  %v1554_v7 = vadd.f32 %v5369_v30, %v1514_v18  ;;  %v5829_v62 = vstv %s5766_s12  ;;  %v5837_v27 = vmul.f32 %v5721_v24, %v5403_v8  ;;  %v1635_v5 = vadd.f32 %v5474_v13, %v1595_v6  ;;  %s3975_s12 = sld [smem:[#allocation4 + $0x59]] }
 0x2b5   :  { %2511 = vrot.lane.b32.xlu0 %v2504_v14, %s4113_s24  ;;  %v2006_v14 = vmul.f32 %v5721_v24, %v5442_v25  ;;  %v1513_v30 = vadd.f32 %v5225_v57, %v1473_v26  ;;  %v2605_v16 = vmul.f32 %v5829_v62, %v5363_v3  ;;  %v5854_v53 = vmul.f32 %v5829_v62, %v5372_v28 }
 0x2b6   :  { %v5805_v20 = vpop.permute.xlu1 %1967  ;;  %v5807_v41 = vpop.permute.xlu2 %2207  ;;  %v2565_v57 = vmul.f32 %v5757_v60, %v5363_v3  ;;  %v1594_v13 = vadd.f32 %v5361_v42, %v1554_v7  ;;  %v1716_v10 = vadd.f32 %v5570_v39, %v1676_v51  ;;  %v2045_v26 = vrot.slane %v5818_v58, 2  ;;  %v7082_v58 = vld [vmem:[#allocation115_spill] sm:$0xff] }
 0x2b7   :  { %v5824_v55 = vpop.permute.xlu0 %1927  ;;  %v5867_v18 = vsel %vm203_vm4, %v2013_v4, %v2014_v46  ;;  %v2046_v23 = vrot.slane %v5822_v33, 2  ;;  %v5873_v42 = vmul.f32 %v5793_v54, %v5403_v8  ;;  %v2038_v39 = vmul.f32 %v5793_v54, %v5442_v25 }
 0x2b8   :  { %v1553_v7 = vadd.f32 %v7082_v58, %v1513_v30  ;;  %v1675_v31 = vadd.f32 %v5472_v44, %v1635_v5  ;;  %v2582_v4 = vrot.slane %v2568_v47, 3  ;;  %v2618_v51 = vrot.slane %v5854_v53, 4 }
 0x2b9   :  { %v1634_v44 = vadd.f32 %v5322_v48, %v1594_v13  ;;  %v1742_v5 = vadd.f32 %v5568_v38, %v1716_v10  ;;  %v2021_v58 = vrot.slane %v2006_v14, 1  ;;  %v2051_v47 = vrot.slane %v5873_v42, 2 }
 0x2ba   :  { %v1593_v30 = vadd.f32 %v5405_v45, %v1553_v7  ;;  %v2053_v46 = vrot.slane %v2038_v39, 2  ;;  %v2607_v53 = vmul.f32 %v5829_v62, %v5374_v12  ;;  %v1715_v45 = vadd.f32 %v5435_v22, %v1675_v31 }
 0x2bb   :  { %v5904_v48 = vmul.f32 %v5829_v62, %v5403_v8  ;;  %v2610_v38 = vmul.f32 %v5829_v62, %v5442_v25  ;;  %v2570_v22 = vmul.f32 %v5757_v60, %v5442_v25  ;;  %v1782_v39 = vadd.f32 %v5530_v52, %v1742_v5 }
 0x2bc   :  { %2553 = vrot.lane.b32.xlu2 %v2546_v59, %s4113_s24  ;;  %2589 = vrot.lane.b32.xlu1 %v2581_v36, %s4113_s24  ;;  %v2583_v59 = vrot.slane %v5848_v63, 3  ;;  %v2617_v36 = vrot.slane %v2605_v16, 4  ;;  %v2004_v16 = vmul.f32 %v5721_v24, %v5367_v11  ;;  %v1741_v10 = vadd.f32 %v5602_v50, %v1715_v45 }
 0x2bd   :  { %2549 = vrot.lane.b32.xlu0 %v2541_v37, %s4113_s24  ;;  %v2577_v37 = vrot.slane %v2565_v57, 3  ;;  %v1674_v57 = vadd.f32 %v5505_v17, %v1634_v44  ;;  %v1633_v17 = vadd.f32 %v5401_v29, %v1593_v30  ;;  %v5925_v0 = vsel %vm236_vm5, %v2045_v26, %v2046_v23 }
 0x2be   :  { %v5879_v6 = vpop.permute.xlu1 %1973  ;;  %v5881_v9 = vpop.permute.xlu2 %2245  ;;  %v2584_v14 = vsel %vm269_vm6, %v2582_v4, %v2583_v59  ;;  %v2619_v24 = vsel %vm302_vm7, %v2617_v36, %v2618_v51  ;;  %v7083_v29 = vrot.slane %v5837_v27, 1  ;;  %v2620_v52 = vrot.slane %v2607_v53, 4 }
 0x2bf   :  { %v5884_v35 = vpop.permute.xlu0 %1933  ;;  %v2579_v13 = vsel %vm269_vm6, %v2577_v37, %v2578_v2  ;;  %v5929_v2 = vmul.f32 %v5769_v19, %v5403_v8  ;;  %v1714_v60 = vadd.f32 %v5501_v21, %v1674_v57  ;;  %v1822_v7 = vadd.f32 %v5680_v40, %v1782_v39 }
 0x2c0   :  { %v5934_v50 = vsel %vm203_vm4, %v7083_v29, %v2021_v58  ;;  %v2623_v4 = vrot.slane %v5904_v48, 4  ;;  %v2625_v36 = vrot.slane %v2610_v38, 4  ;;  %v5947_v37 = vsel %vm236_vm5, %v2051_v47, %v2053_v46 }
 0x2c1   :  { %v2018_v30 = vrot.slane %v2004_v16, 1  ;;  %v5951_v44 = vmul.f32 %v5793_v54, %v5367_v11  ;;  %v5954_v21 = vstv %s5888_s13  ;;  %v1673_v5 = vadd.f32 %v5359_v15, %v1633_v17  ;;  %v7084_v17 = vld [vmem:[#allocation20_spill] sm:$0xff]  ;;  %s3976_s13 = sld [smem:[#allocation4 + $0x60]] }
 0x2c2   :  { %v1781_v58 = vadd.f32 %v5599_v49, %v1741_v10  ;;  %v2585_v53 = vrot.slane %v2570_v22, 3  ;;  %v2644_v57 = vstv %s5893_s14  ;;  %v5965_v46 = vmul.f32 %v5954_v21, %v5367_v11  ;;  %v7085_v10 = vld [vmem:[#allocation15_spill] sm:$0xff]  ;;  %s3977_s14 = sld [smem:[#allocation4 + $0x37]] }
 0x2c3   :  { %v5969_v16 = vmul.f32 %v5954_v21, %v5403_v8  ;;  %v2621_v45 = vsel %vm302_vm7, %v2618_v51, %v2620_v52  ;;  %v2608_v48 = vmul.f32 %v5829_v62, %v5367_v11  ;;  %v1713_v15 = vadd.f32 %v5535_v43, %v1673_v5  ;;  %v7088_v52 = vld [vmem:[#allocation21_spill] sm:$0xff] }
 0x2c4   :  { %2591 = vrot.lane.b32.xlu2 %v2584_v14, %s4113_s24  ;;  %2627 = vrot.lane.b32.xlu1 %v2619_v24, %s4113_s24  ;;  %v1740_v49 = vadd.f32 %v5470_v1, %v1714_v60  ;;  %v1862_v38 = vadd.f32 %v5678_v32, %v1822_v7  ;;  %v2626_v14 = vsel %vm302_vm7, %v2623_v4, %v2625_v36  ;;  %v2050_v39 = vrot.slane %v5951_v44, 2  ;;  %v7089_v7 = vld [vmem:[#allocation29_spill] sm:$0xff] }
 0x2c5   :  { %2587 = vrot.lane.b32.xlu0 %v2579_v13, %s4113_s24  ;;  %v2645_v24 = vmul.f32 %v2644_v57, %v5363_v3  ;;  %v5980_v13 = vmul.f32 %v2644_v57, %v5372_v28  ;;  %v2648_v22 = vmul.f32 %v2644_v57, %v5367_v11  ;;  %v5984_v51 = vmul.f32 %v2644_v57, %v5403_v8 }
 0x2c6   :  { %v5939_v31 = vpop.permute.xlu2 %2283  ;;  %v5941_v26 = vpop.permute.xlu1 %2205  ;;  %v1780_v62 = vadd.f32 %v7084_v17, %v1740_v49  ;;  %v1821_v43 = vadd.f32 %v7085_v10, %v1781_v58  ;;  %v2586_v3 = vsel %vm269_vm6, %v2583_v59, %v2585_v53  ;;  %v5997_v1 = vmul.f32 %v5769_v19, %v5367_v11  ;;  %v7087_v59 = vld [vmem:[#allocation22_spill] sm:$0xff] }
 0x2c7   :  { %v5956_v40 = vpop.permute.xlu0 %1971  ;;  %v7086_v8 = vmov %v7083_v29  ;;  %v2622_v63 = vrot.slane %v2608_v48, 4  ;;  %v1739_v29 = vadd.f32 %v7087_v59, %v1713_v15  ;;  %v1902_v11 = vadd.f32 %v7089_v7, %v1862_v38  ;;  %v7095_v59 = vld [vmem:[#allocation33_spill] sm:$0xff] }
 0x2c8   :  { %v6002_v32 = vsel %vm203_vm4, %v2018_v30, %v7086_v8  ;;  %v1861_v60 = vadd.f32 %v7088_v52, %v1821_v43  ;;  %v2082_v19 = vrot.slane %v5965_v46, 3  ;;  %v2657_v44 = vrot.slane %v2645_v24, 5  ;;  %v7094_v8 = vld [vmem:[#allocation36_spill] sm:$0xff] }
 0x2c9   :  { %v2658_v5 = vrot.slane %v5980_v13, 5  ;;  %v2662_v58 = vrot.slane %v2648_v22, 5  ;;  %v2663_v53 = vrot.slane %v5984_v51, 5  ;;  %v1942_v15 = vadd.f32 %v5884_v35, %v1902_v11  ;;  %v7092_v22 = vld [vmem:[#allocation18_spill] sm:$0xff]  ;;  %v7093_v35 = vld [vmem:[#allocation32_spill] sm:$0xff] }
 0x2ca   :  { %v2083_v49 = vrot.slane %v5969_v16, 3  ;;  %v6024_v38 = vstv %s5961_s15  ;;  %v2035_v46 = vmul.f32 %v5793_v54, %v5374_v12  ;;  %v2067_v24 = vmul.f32 %v5954_v21, %v5374_v12  ;;  %s3978_s15 = sld [smem:[#allocation4 + $0x3e]] }
 0x2cb   :  { %v2624_v13 = vsel %vm302_vm7, %v2622_v63, %v2623_v4  ;;  %v1779_v51 = vadd.f32 %v7092_v22, %v1739_v29  ;;  %v1901_v17 = vadd.f32 %v7093_v35, %v1861_v60  ;;  %v2647_v10 = vmul.f32 %v2644_v57, %v5374_v12 }
 0x2cc   :  { %2629 = vrot.lane.b32.xlu2 %v2621_v45, %s4113_s24  ;;  %2633 = vrot.lane.b32.xlu1 %v2626_v14, %s4113_s24  ;;  %v7091_v45 = vld [vmem:[#allocation16_spill] sm:$0xff]  ;;  %v6030_v14 = vmul.f32 %v5954_v21, %v5372_v28  ;;  %v2659_v54 = vsel %vm335_vm8, %v2657_v44, %v2658_v5  ;;  %v2664_v43 = vsel %vm335_vm8, %v2662_v58, %v2663_v53  ;;  %v6051_v60 = vstv %s5993_s16  ;;  %v7097_v58 = vld [vmem:[#allocation30_spill] sm:$0xff]  ;;  %s3979_s16 = sld [smem:[#allocation4 + $0x45]] }
 0x2cd   :  { %2593 = vrot.lane.b32.xlu0 %v2586_v3, %s4113_s24  ;;  %v1820_v48 = vadd.f32 %v7091_v45, %v1780_v62  ;;  %v2650_v62 = vmul.f32 %v2644_v57, %v5442_v25  ;;  %v6043_v3 = vmul.f32 %v6024_v38, %v5372_v28  ;;  %v2687_v4 = vmul.f32 %v6024_v38, %v5374_v12  ;;  %v7096_v12 = vld [vmem:[#allocation39_spill] sm:$0xff] }
 0x2ce   :  { %v6012_v27 = vpop.permute.xlu2 %2321  ;;  %v6014_v36 = vpop.permute.xlu1 %2243  ;;  %v1819_v63 = vadd.f32 %v7094_v8, %v1779_v51  ;;  %v1982_v52 = vadd.f32 %v5879_v6, %v1942_v15  ;;  %v2048_v57 = vrot.slane %v2035_v46, 2  ;;  %v6830_v7 = vrot.slane %v6030_v14, 3 }
 0x2cf   :  { %7090 = vst [vmem:[#allocation13_spill] sm:$0xff] %v6012_v27  ;;  %v6016_v30 = vpop.permute.xlu0 %2203  ;;  %v1860_v29 = vadd.f32 %v7095_v59, %v1820_v48  ;;  %v2080_v28 = vrot.slane %v2067_v24, 3  ;;  %v6057_v11 = vstv %s6006_s17  ;;  %v1941_v45 = vadd.f32 %v7097_v58, %v1901_v17  ;;  %v7098_v17 = vld [vmem:[#allocation24_spill] sm:$0xff]  ;;  %s3980_s17 = sld [smem:[#allocation4 + $0x4c]] }
 0x2d0   :  { %v2665_v15 = vrot.slane %v2650_v62, 5  ;;  %v2660_v22 = vrot.slane %v2647_v10, 5  ;;  %v6069_v46 = vsel %vm236_vm5, %v2050_v39, %v2051_v47  ;;  %v6074_v24 = vsel %vm269_vm6, %v2082_v19, %v2083_v49  ;;  %v6084_v47 = vld [vmem:[#allocation3 + $0x8] sm:$0xff] }
 0x2d1   :  { %v1900_v44 = vadd.f32 %v7096_v12, %v1860_v29  ;;  %v6831_v51 = vrot.slane %v6043_v3, 6  ;;  %v2700_v35 = vrot.slane %v2687_v4, 6  ;;  %v1859_v62 = vadd.f32 %v7098_v17, %v1819_v63  ;;  %v7099_v4 = vld [vmem:[#allocation19_spill] sm:$0xff]  ;;  %v6118_v29 = vld [vmem:[#allocation3 + $0x18] sm:$0xff]  ;;  %v7101_v17 = vld [vmem:[#allocation25_spill] sm:$0xff] }
 0x2d2   :  { %v1998_v10 = vadd.f32 %v5929_v2, %v1982_v52  ;;  %v1981_v42 = vadd.f32 %v5956_v40, %v1941_v45  ;;  %v6088_v39 = vmul.f32 %v6084_v47, %v6051_v60  ;;  %v6095_v19 = vsel %vm236_vm5, %v2046_v23, %v2048_v57  ;;  %v6122_v57 = vld [vmem:[#allocation3 + $0x20] sm:$0xff] }
 0x2d3   :  { %v6103_v40 = vmul.f32 %v6084_v47, %v6057_v11  ;;  %v1940_v8 = vadd.f32 %v7099_v4, %v1900_v44  ;;  %v6111_v33 = vsel %vm269_vm6, %v6830_v7, %v2080_v28  ;;  %v2666_v23 = vsel %vm335_vm8, %v2663_v53, %v2665_v15  ;;  %v6128_v28 = vld [vmem:[#allocation3] sm:$0xff] }
 0x2d4   :  { %2667 = vrot.lane.b32.xlu2 %v2659_v54, %s4113_s24  ;;  %2671 = vrot.lane.b32.xlu1 %v2664_v43, %s4113_s24  ;;  %v6097_v54 = vld [vmem:[#allocation3 + $0x10] sm:$0x3f]  ;;  %v2070_v43 = vmul.f32 %v5954_v21, %v5442_v25  ;;  %v2661_v63 = vsel %vm335_vm8, %v2658_v5, %v2660_v22  ;;  %v2701_v59 = vsel %vm368_vm9, %v6831_v51, %v2700_v35  ;;  %v7100_v53 = vld [vmem:[#allocation27_spill] sm:$0xff] }
 0x2d5   :  { %2631 = vrot.lane.b32.xlu0 %v2624_v13, %s4113_s24  ;;  %v2099_v2 = vmul.f32 %v6097_v54, %v6051_v60  ;;  %v2688_v52 = vmul.f32 %v6118_v29, %v6024_v38  ;;  %v6126_v12 = vmul.f32 %v6122_v57, %v6024_v38  ;;  %v2685_v5 = vmul.f32 %v6128_v28, %v6024_v38 }
 0x2d6   :  { %v6062_v48 = vpop.permute.xlu2 %2327  ;;  %v6064_v6 = vpop.permute.xlu1 %2281  ;;  %v1899_v44 = vadd.f32 %v7100_v53, %v1859_v62  ;;  %v2030_v58 = vadd.f32 %v5934_v50, %v1998_v10  ;;  %v1997_v45 = vadd.f32 %v5997_v1, %v1981_v42  ;;  %v2085_v22 = vrot.slane %v2070_v43, 3 }
 0x2d7   :  { %v6076_v13 = vpop.permute.xlu0 %2241  ;;  %v6141_v35 = vmul.f32 %v6122_v57, %v6051_v60  ;;  %v2102_v50 = vmul.f32 %v6051_v60, %v5442_v25  ;;  %v6147_v1 = vmul.f32 %v6122_v57, %v6057_v11  ;;  %v1980_v62 = vadd.f32 %v7101_v17, %v1940_v8 }
 0x2d8   :  { %v1939_v10 = vadd.f32 %v5824_v55, %v1899_v44  ;;  %v2112_v42 = vrot.slane %v2099_v2, 4  ;;  %v6153_v43 = vmul.f32 %v6097_v54, %v6057_v11  ;;  %v2702_v53 = vrot.slane %v2688_v52, 6 }
 0x2d9   :  { %v6165_v8 = vstv %s6079_s1  ;;  %v2062_v55 = vadd.f32 %v5947_v37, %v2030_v58  ;;  %v2029_v2 = vadd.f32 %v6002_v32, %v1997_v45  ;;  %v6170_v44 = vstv %s6090_s20  ;;  %s3982_s1 = sld [smem:[#allocation4 + $0x5a]] }
 0x2da   :  { %v2697_v17 = vrot.slane %v2685_v5, 6  ;;  %v2115_v15 = vrot.slane %v6141_v35, 4  ;;  %v2117_v52 = vrot.slane %v2102_v50, 4  ;;  %v2147_v51 = vrot.slane %v6147_v1, 5  ;;  %s3983_s20 = sld [smem:[#allocation4 + $0x61]] }
 0x2db   :  { %v1996_v7 = vadd.f32 %v5798_v34, %v1980_v62  ;;  %v1979_v37 = vadd.f32 %v5805_v20, %v1939_v10  ;;  %v2725_v32 = vmul.f32 %v6128_v28, %v6165_v8  ;;  %v2100_v5 = vmul.f32 %v6118_v29, %v6051_v60 }
 0x2dc   :  { %2673 = vrot.lane.b32.xlu2 %v2666_v23, %s4113_s24  ;;  %2709 = vrot.lane.b32.xlu1 %v2701_v59, %s4113_s24  ;;  %v6187_v16 = vmul.f32 %v6122_v57, %v6170_v44  ;;  %v2061_v20 = vadd.f32 %v6069_v46, %v2029_v2  ;;  %v7103_v50 = vrot.slane %v6043_v3, 6  ;;  %v7104_v62 = vrot.slane %v6088_v39, 4 }
 0x2dd   :  { %2669 = vrot.lane.b32.xlu0 %v2661_v63, %s4113_s24  ;;  %v2134_v63 = vmul.f32 %v6057_v11, %v5442_v25  ;;  %v2086_v25 = vsel %vm269_vm6, %v2083_v49, %v2085_v22  ;;  %v7102_v49 = vrot.slane %v6126_v12, 6  ;;  %v6192_v22 = vld [vmem:[#allocation3 + $0x28] sm:$0x3f]  ;;  %v2028_v3 = vadd.f32 %v5814_v56, %v1996_v7 }
 0x2de   :  { %v6155_v4 = vpop.permute.xlu2 %2365  ;;  %v6157_v23 = vpop.permute.xlu1 %2287  ;;  %v2690_v34 = vmul.f32 %v6192_v22, %v6024_v38  ;;  %v2094_v35 = vadd.f32 %v2086_v25, %v2062_v55  ;;  %v2699_v1 = vsel %vm368_vm9, %v2697_v17, %v7103_v50  ;;  %v6205_v10 = vsel %vm302_vm7, %v7104_v62, %v2112_v42 }
 0x2df   :  { %v6161_v59 = vpop.permute.xlu0 %2247  ;;  %v2149_v58 = vrot.slane %v2134_v63, 5  ;;  %v2704_v45 = vsel %vm368_vm9, %v2702_v53, %v7102_v49  ;;  %v6209_v63 = vmul.f32 %v6084_v47, %v6170_v44  ;;  %v6213_v38 = vmul.f32 %v6097_v54, %v6170_v44 }
 0x2e0   :  { %v2166_v46 = vmul.f32 %v6192_v22, %v6170_v44  ;;  %v1995_v53 = vadd.f32 %v5811_v61, %v1979_v37  ;;  %v2114_v2 = vrot.slane %v2100_v5, 4  ;;  %v2132_v17 = vmul.f32 %v6118_v29, %v6057_v11 }
 0x2e1   :  { %v2065_v25 = vmul.f32 %v6128_v28, %v5954_v21  ;;  %v2150_v49 = vsel %vm335_vm8, %v2147_v51, %v2149_v58  ;;  %v2093_v61 = vadd.f32 %v6074_v24, %v2061_v20  ;;  %v2705_v37 = vrot.slane %v2690_v34, 6 }
 0x2e2   :  { %v2750_v50 = vstv %s6172_s22  ;;  %v2181_v5 = vrot.slane %v2166_v46, 6  ;;  %v2726_v21 = vmul.f32 %v6084_v47, %v6165_v8  ;;  %v2027_v58 = vadd.f32 %v5867_v18, %v1995_v53 }
 0x2e3   :  { %v2116_v24 = vsel %vm302_vm7, %v2114_v2, %v2115_v15  ;;  %v2146_v34 = vrot.slane %v2132_v17, 5  ;;  %v2751_v20 = vmul.f32 %v6128_v28, %v2750_v50  ;;  %v2754_v62 = vmul.f32 %v6118_v29, %v2750_v50 }
 0x2e4   :  { %2711 = vrot.lane.b32.xlu2 %v2704_v45, %s4113_s24  ;;  %2733 = vrot.lane.b32.xlu1 %v2725_v32, %s4114_s9  ;;  %v2118_v32 = vsel %vm302_vm7, %v2115_v15, %v2117_v52  ;;  %v2179_v45 = vrot.slane %v6187_v16, 6  ;;  %v2728_v52 = vmul.f32 %v6122_v57, %v6165_v8  ;;  %v2060_v16 = vadd.f32 %v6095_v19, %v2028_v3 }
 0x2e5   :  { %2707 = vrot.lane.b32.xlu0 %v2699_v1, %s4113_s24  ;;  %v2126_v7 = vadd.f32 %v2118_v32, %v2094_v35  ;;  %v2164_v1 = vmul.f32 %v6118_v29, %v6170_v44  ;;  %v6248_v35 = vmul.f32 %v6084_v47, %v2750_v50  ;;  %v6252_v46 = vmul.f32 %v6122_v57, %v2750_v50 }
 0x2e6   :  { %v6220_v42 = vpop.permute.xlu2 %2403  ;;  %v6222_v55 = vpop.permute.xlu1 %2325  ;;  %v2142_v32 = vrot.slane %v6103_v40, 5  ;;  %v2125_v27 = vadd.f32 %v2116_v24, %v2093_v61  ;;  %v7106_v18 = vrot.slane %v6126_v12, 6  ;;  %v2144_v15 = vrot.slane %v6153_v43, 5 }
 0x2e7   :  { %7105 = vst [vmem:[#allocation23_spill] sm:$0xff] %v6220_v42  ;;  %v6231_v56 = vpop.permute.xlu0 %2285  ;;  %v2158_v42 = vadd.f32 %v2150_v49, %v2126_v7  ;;  %v2077_v3 = vrot.slane %v2065_v25, 3  ;;  %v2097_v53 = vmul.f32 %v6128_v28, %v6051_v60  ;;  %v2182_v2 = vsel %vm368_vm9, %v2179_v45, %v2181_v5 }
 0x2e8   :  { %v2706_v19 = vsel %vm368_vm9, %v7106_v18, %v2705_v37  ;;  %v2059_v17 = vadd.f32 %v5925_v0, %v2027_v58  ;;  %v2092_v49 = vadd.f32 %v6111_v33, %v2060_v16  ;;  %v2148_v61 = vsel %vm335_vm8, %v2146_v34, %v2147_v51 }
 0x2e9   :  { %v2178_v12 = vrot.slane %v2164_v1, 6  ;;  %v2763_v25 = vrot.slane %v2751_v20, 1  ;;  %v2764_v60 = vrot.slane %v6248_v35, 1  ;;  %v2768_v5 = vrot.slane %v2754_v62, 1 }
 0x2ea   :  { %v2190_v0 = vadd.f32 %v2182_v2, %v2158_v42  ;;  %v2157_v58 = vadd.f32 %v2148_v61, %v2125_v27  ;;  %v6278_v33 = vstv %s6235_s23  ;;  %v7107_v51 = vrot.slane %v6030_v14, 3 }
 0x2eb   :  { %v2109_v16 = vrot.slane %v2097_v53, 4  ;;  %v2129_v24 = vmul.f32 %v6128_v28, %v6057_v11  ;;  %v2727_v34 = vmul.f32 %v6118_v29, %v6165_v8  ;;  %v2124_v20 = vadd.f32 %v6205_v10, %v2092_v49 }
 0x2ec   :  { %2735 = vrot.lane.b32.xlu2 %v2726_v21, %s4114_s9  ;;  %2739 = vrot.lane.b32.xlu1 %v2728_v52, %s4114_s9  ;;  %v2769_v21 = vrot.slane %v6252_v46, 1  ;;  %v2174_v52 = vrot.slane %v6209_v63, 6  ;;  %v2079_v1 = vsel %vm269_vm6, %v2077_v3, %v7107_v51  ;;  %v2180_v27 = vsel %vm368_vm9, %v2178_v12, %v2179_v45 }
 0x2ed   :  { %2713 = vrot.lane.b32.xlu0 %v2706_v19, %s4113_s24  ;;  %s6280_s24 = sld [smem:[#allocation4 + $0x49]]  ;;  %v2091_v63 = vadd.f32 %v2079_v1, %v2059_v17  ;;  %v2756_v42 = vmul.f32 %v6192_v22, %v2750_v50  ;;  %v2765_v35 = vsel %vm203_vm4, %v2763_v25, %v2764_v60  ;;  %v6296_v62 = vmul.f32 %v6084_v47, %v6278_v33 }
 0x2ee   :  { %v6268_v7 = vpop.permute.xlu2 %2441  ;;  %v6270_v37 = vpop.permute.xlu1 %2363  ;;  %v2770_v14 = vsel %vm203_vm4, %v2768_v5, %v2769_v21  ;;  %v2793_v11 = vmul.f32 %v6097_v54, %v6278_v33  ;;  %v2176_v8 = vrot.slane %v6213_v38, 6  ;;  %v2216_v10 = vadd.f32 %v5807_v41, %v2190_v0 }
 0x2ef   :  { %v6272_v43 = vpop.permute.xlu0 %2323  ;;  %v2189_v46 = vadd.f32 %v2180_v27, %v2157_v58  ;;  %v2753_v45 = vmul.f32 %v6097_v54, %v2750_v50  ;;  %v2145_v18 = vsel %vm335_vm8, %v2142_v32, %v2144_v15  ;;  %v7108_v19 = vrot.slane %v6088_v39, 4 }
 0x2f0   :  { %v2141_v53 = vrot.slane %v2129_v24, 5  ;;  %v2161_v41 = vmul.f32 %v6128_v28, %v6170_v44  ;;  %v2156_v38 = vadd.f32 %v2145_v18, %v2124_v20  ;;  %v2256_v17 = vadd.f32 %v6161_v59, %v2216_v10 }
 0x2f1   :  { %v2111_v3 = vsel %vm302_vm7, %v2109_v16, %v7108_v19  ;;  %v2771_v61 = vrot.slane %v2756_v42, 1  ;;  %v2804_v39 = vrot.slane %v6296_v62, 2  ;;  %v2806_v12 = vrot.slane %v2793_v11, 2 }
 0x2f2   :  { %v2123_v2 = vadd.f32 %v2111_v3, %v2091_v63  ;;  %v2177_v25 = vsel %vm368_vm9, %v2174_v52, %v2176_v8  ;;  %v2215_v5 = vadd.f32 %v5941_v26, %v2189_v46  ;;  %v2766_v44 = vrot.slane %v2753_v45, 1 }
 0x2f3   :  { %v6323_v0 = vstv %s6280_s24  ;;  %v2143_v59 = vsel %vm335_vm8, %v2141_v53, %v2142_v32  ;;  %v2173_v58 = vrot.slane %v2161_v41, 6  ;;  %v2794_v51 = vmul.f32 %v6118_v29, %v6278_v33  ;;  %v7109_v53 = vld [vmem:[#allocation26_spill] sm:$0xff] }
 0x2f4   :  { %2773 = vrot.lane.b32.xlu2 %v2765_v35, %s4114_s9  ;;  %2777 = vrot.lane.b32.xlu1 %v2770_v14, %s4114_s9  ;;  %v6332_v1 = vmul.f32 %v6122_v57, %v6278_v33  ;;  %v2188_v16 = vadd.f32 %v2177_v25, %v2156_v38  ;;  %v2155_v24 = vadd.f32 %v2143_v59, %v2123_v2 }
 0x2f5   :  { %2737 = vrot.lane.b32.xlu0 %v2727_v34, %s4114_s9  ;;  %v2296_v34 = vadd.f32 %v6157_v23, %v2256_v17  ;;  %v2772_v26 = vsel %vm203_vm4, %v2769_v21, %v2771_v61  ;;  %v2807_v20 = vsel %vm236_vm5, %v2804_v39, %v2806_v12  ;;  %v2831_v40 = vmul.f32 %v6128_v28, %v6323_v0 }
 0x2f6   :  { %v2448_v50 = vpop.permute.xlu2 %2447  ;;  %v6315_v49 = vpop.permute.xlu1 %2401  ;;  %v2832_v32 = vmul.f32 %v6084_v47, %v6323_v0  ;;  %v2791_v63 = vmul.f32 %v6128_v28, %v6278_v33  ;;  %v2214_v27 = vadd.f32 %v6016_v30, %v2188_v16  ;;  %v2255_v42 = vadd.f32 %v5881_v9, %v2215_v5 }
 0x2f7   :  { %v6317_v15 = vpop.permute.xlu0 %2361  ;;  %v2767_v23 = vsel %vm203_vm4, %v2764_v60, %v2766_v44  ;;  %v2175_v21 = vsel %vm368_vm9, %v2173_v58, %v2174_v52  ;;  %v2808_v35 = vrot.slane %v2794_v51, 2  ;;  %v2809_v14 = vrot.slane %v6332_v1, 2 }
 0x2f8   :  { %v2187_v62 = vadd.f32 %v2175_v21, %v2155_v24  ;;  %v2295_v11 = vadd.f32 %v6231_v56, %v2255_v42  ;;  %v2336_v9 = vadd.f32 %v6062_v48, %v2296_v34  ;;  %v2843_v46 = vrot.slane %v2831_v40, 3 }
 0x2f9   :  { %v2844_v45 = vrot.slane %v2832_v32, 3  ;;  %v2803_v18 = vrot.slane %v2791_v63, 2  ;;  %v2254_v60 = vadd.f32 %v6014_v36, %v2214_v27  ;;  %v2810_v19 = vsel %vm236_vm5, %v2808_v35, %v2809_v14  ;;  %v7110_v63 = vld [vmem:[#allocation13_spill] sm:$0xff]  ;;  %v7111_v35 = vld [vmem:[#allocation23_spill] sm:$0xff] }
 0x2fa   :  { %v2833_v3 = vmul.f32 %v6097_v54, %v6323_v0  ;;  %v2213_v41 = vadd.f32 %v7109_v53, %v2187_v62  ;;  %v2335_v56 = vadd.f32 %v6222_v55, %v2295_v11  ;;  %v6361_v48 = vmul.f32 %v6122_v57, %v6323_v0 }
 0x2fb   :  { %v2845_v2 = vsel %vm269_vm6, %v2843_v46, %v2844_v45  ;;  %v2805_v17 = vsel %vm236_vm5, %v2803_v18, %v2804_v39  ;;  %v2836_v36 = vmul.f32 %v6192_v22, %v6323_v0  ;;  %v2796_v61 = vmul.f32 %v6192_v22, %v6278_v33 }
 0x2fc   :  { %2779 = vrot.lane.b32.xlu2 %v2772_v26, %s4114_s9  ;;  %2815 = vrot.lane.b32.xlu1 %v2807_v20, %s4114_s9  ;;  %v2253_v12 = vadd.f32 %v6076_v13, %v2213_v41  ;;  %v2294_v25 = vadd.f32 %v5939_v31, %v2254_v60  ;;  %v2375_v59 = vadd.f32 %v6155_v4, %v2335_v56  ;;  %v2846_v58 = vrot.slane %v2833_v3, 3 }
 0x2fd   :  { %2775 = vrot.lane.b32.xlu0 %v2767_v23, %s4114_s9  ;;  %v2849_v13 = vrot.slane %v6361_v48, 3  ;;  %v2851_v51 = vrot.slane %v2836_v36, 3  ;;  %v2870_v31 = vstv %s3960_s25  ;;  %v2811_v24 = vrot.slane %v2796_v61, 2  ;;  %s3873_s25 = sshll.u32 %s6829_s2, 4  ;;  %s3874_s25 = int_to_ptr.hbm [resolvable:$true] %s3873_s25 }
 0x2fe   :  { %v2472_v8 = vpop.permute.xlu2 %2471  ;;  %v2408_v30 = vpop.permute.xlu1 %2407  ;;  %v2334_v39 = vadd.f32 %v6272_v43, %v2294_v25  ;;  %v2293_v1 = vadd.f32 %v6064_v6, %v2253_v12  ;;  %v2847_v26 = vsel %vm269_vm6, %v2844_v45, %v2846_v58  ;;  %v2871_v4 = vmul.f32 %v6128_v28, %v2870_v31 }
 0x2ff   :  { %v2368_v10 = vpop.permute.xlu0 %2367  ;;  %v2852_v20 = vsel %vm269_vm6, %v2849_v13, %v2851_v51  ;;  %v2872_v40 = vmul.f32 %v6084_v47, %v2870_v31  ;;  %v2874_v32 = vmul.f32 %v6118_v29, %v2870_v31  ;;  %v2875_v6 = vmul.f32 %v6122_v57, %v2870_v31 }
 0x300   :  { %v2376_v52 = vadd.f32 %v2368_v10, %v2336_v9  ;;  %v2374_v43 = vadd.f32 %v6270_v37, %v2334_v39  ;;  %v2333_v27 = vadd.f32 %v7110_v63, %v2293_v1  ;;  %v2812_v37 = vsel %vm236_vm5, %v2809_v14, %v2811_v24 }
 0x301   :  { %v2884_v9 = vrot.slane %v2872_v40, 4  ;;  %v2888_v10 = vrot.slane %v2874_v32, 4  ;;  %v2889_v46 = vrot.slane %v2875_v6, 4  ;;  %v2910_v60 = vstv %s3961_s26 }
 0x302   :  { %v2416_v38 = vadd.f32 %v2408_v30, %v2376_v52  ;;  %v2373_v42 = vadd.f32 %v6317_v15, %v2333_v27  ;;  %v2414_v62 = vadd.f32 %v7111_v35, %v2374_v43  ;;  %v2883_v30 = vrot.slane %v2871_v4, 4 }
 0x303   :  { %v2876_v52 = vmul.f32 %v6192_v22, %v2870_v31  ;;  %v2912_v3 = vmul.f32 %v6084_v47, %v2910_v60  ;;  %v2913_v53 = vmul.f32 %v6097_v54, %v2910_v60  ;;  %v2873_v56 = vmul.f32 %v6097_v54, %v2870_v31 }
 0x304   :  { %2817 = vrot.lane.b32.xlu2 %v2810_v19, %s4114_s9  ;;  %2853 = vrot.lane.b32.xlu1 %v2845_v2, %s4114_s9  ;;  %v6373_v55 = vadd.f32 %v2448_v50, %v2416_v38  ;;  %v2834_v50 = vmul.f32 %v6118_v29, %v6323_v0  ;;  %v2413_v14 = vadd.f32 %v6315_v49, %v2373_v42 }
 0x305   :  { %2813 = vrot.lane.b32.xlu0 %v2805_v17, %s4114_s9  ;;  %v2885_v15 = vsel %vm302_vm7, %v2883_v30, %v2884_v9  ;;  %v2890_v19 = vsel %vm302_vm7, %v2888_v10, %v2889_v46  ;;  %v2891_v36 = vrot.slane %v2876_v52, 4  ;;  %v2924_v61 = vrot.slane %v2912_v3, 5 }
 0x306   :  { %v2510_v5 = vpop.permute.xlu2 %2509  ;;  %v2446_v44 = vpop.permute.xlu1 %2445  ;;  %v2848_v18 = vrot.slane %v2834_v50, 3  ;;  %v2453_v2 = vadd.f32 %v6268_v7, %v2413_v14  ;;  %v2926_v12 = vrot.slane %v2913_v53, 5  ;;  %v2886_v39 = vrot.slane %v2873_v56, 4 }
 0x307   :  { %v2406_v33 = vpop.permute.xlu0 %2405  ;;  %v2914_v58 = vmul.f32 %v6118_v29, %v2910_v60  ;;  %v2911_v1 = vmul.f32 %v6128_v28, %v2910_v60 }
 0x308   :  { %v2415_v16 = vadd.f32 %v2406_v33, %v2375_v59  ;;  %v2850_v41 = vsel %vm269_vm6, %v2848_v18, %v2849_v13  ;;  %v2915_v33 = vmul.f32 %v6122_v57, %v2910_v60  ;;  %v2927_v13 = vsel %vm335_vm8, %v2924_v61, %v2926_v12 }
 0x309   :  { %v2887_v31 = vsel %vm302_vm7, %v2884_v9, %v2886_v39  ;;  %v2928_v43 = vrot.slane %v2914_v58, 5  ;;  %v2923_v32 = vrot.slane %v2911_v1, 5 }
 0x30a   :  { %v2455_v34 = vadd.f32 %v2446_v44, %v2415_v16  ;;  %v2950_v44 = vstv %s3962_s28 }
 0x30b   :  { %v2951_v51 = vmul.f32 %v6128_v28, %v2950_v44  ;;  %v2952_v7 = vmul.f32 %v6084_v47, %v2950_v44  ;;  %v2955_v42 = vmul.f32 %v6122_v57, %v2950_v44 }
 0x30c   :  { %2855 = vrot.lane.b32.xlu2 %v2847_v26, %s4114_s9  ;;  %2859 = vrot.lane.b32.xlu1 %v2852_v20, %s4114_s9  ;;  %v6393_v0 = vadd.f32 %v2472_v8, %v2455_v34  ;;  %v2929_v34 = vrot.slane %v2915_v33, 5 }
 0x30d   :  { %2819 = vrot.lane.b32.xlu0 %v2812_v37, %s4114_s9  ;;  %v2963_v4 = vrot.slane %v2951_v51, 6  ;;  %v2964_v20 = vrot.slane %v2952_v7, 6  ;;  %v2953_v37 = vmul.f32 %v6097_v54, %v2950_v44  ;;  %v2969_v10 = vrot.slane %v2955_v42, 6 }
 0x30e   :  { %v2548_v23 = vpop.permute.xlu2 %2547  ;;  %v2470_v21 = vpop.permute.xlu1 %2469  ;;  %v2930_v63 = vsel %vm335_vm8, %v2928_v43, %v2929_v34 }
 0x30f   :  { %v2444_v11 = vpop.permute.xlu0 %2443  ;;  %v2965_v27 = vsel %vm368_vm9, %v2963_v4, %v2964_v20  ;;  %v2966_v9 = vrot.slane %v2953_v37, 6 }
 0x310   :  { %v2454_v45 = vadd.f32 %v2444_v11, %v2414_v62 }
 0x312   :  { %v2480_v8 = vadd.f32 %v2470_v21, %v2454_v45  ;;  %v2925_v21 = vsel %vm335_vm8, %v2923_v32, %v2924_v61 }
 0x314   :  { %2893 = vrot.lane.b32.xlu2 %v2885_v15, %s4114_s9  ;;  %2897 = vrot.lane.b32.xlu1 %v2890_v19, %s4114_s9  ;;  %v6408_v49 = vadd.f32 %v2510_v5, %v2480_v8  ;;  %v2892_v5 = vsel %vm302_vm7, %v2889_v46, %v2891_v36  ;;  %v2967_v8 = vsel %vm368_vm9, %v2964_v20, %v2966_v9 }
 0x315   :  { %2857 = vrot.lane.b32.xlu0 %v2850_v41, %s4114_s9  ;;  %v2954_v15 = vmul.f32 %v6118_v29, %v2950_v44  ;;  %v2990_v41 = vstv %s3963_s29 }
 0x316   :  { %v2554_v38 = vpop.permute.xlu2 %2553  ;;  %v2508_v48 = vpop.permute.xlu1 %2507  ;;  %v2993_v36 = vmul.f32 %v6118_v29, %v2990_v41  ;;  %v2994_v7 = vmul.f32 %v6122_v57, %v2990_v41 }
 0x317   :  { %v2468_v17 = vpop.permute.xlu0 %2467 }
 0x318   :  { %v2479_v25 = vadd.f32 %v2468_v17, %v2453_v2  ;;  %v2991_v17 = vmul.f32 %v6128_v28, %v2990_v41 }
 0x31a   :  { %v2519_v59 = vadd.f32 %v2508_v48, %v2479_v25  ;;  %v3016_v48 = vstv %s3964_s30 }
 0x31b   :  { %v3018_v61 = vmul.f32 %v6084_v47, %v3016_v48  ;;  %v3019_v12 = vmul.f32 %v6097_v54, %v3016_v48  ;;  %v3020_v1 = vmul.f32 %v6118_v29, %v3016_v48 }
 0x31c   :  { %2899 = vrot.lane.b32.xlu2 %v2892_v5, %s4114_s9  ;;  %2935 = vrot.lane.b32.xlu1 %v2927_v13, %s4114_s9  ;;  %v6422_v16 = vadd.f32 %v2548_v23, %v2519_v59  ;;  %v2956_v23 = vmul.f32 %v6192_v22, %v2950_v44  ;;  %v3056_v13 = vstv %s3965_s3 }
 0x31d   :  { %2895 = vrot.lane.b32.xlu0 %v2887_v31, %s4114_s9  ;;  %v3030_v58 = vrot.slane %v3018_v61, 1  ;;  %v3032_v33 = vrot.slane %v3019_v12, 1  ;;  %v2992_v31 = vmul.f32 %v6084_v47, %v2990_v41  ;;  %v3057_v43 = vmul.f32 %v6128_v28, %v3056_v13 }
 0x31e   :  { %v2592_v24 = vpop.permute.xlu2 %2591  ;;  %v2514_v50 = vpop.permute.xlu1 %2513  ;;  %v2971_v46 = vrot.slane %v2956_v23, 6  ;;  %v3034_v32 = vrot.slane %v3020_v1, 1 }
 0x31f   :  { %v2474_v26 = vpop.permute.xlu0 %2473 }
 0x320   :  { %v2482_v40 = vadd.f32 %v2474_v26, %v6373_v55  ;;  %v2916_v55 = vmul.f32 %v6192_v22, %v2910_v60  ;;  %v2972_v60 = vsel %vm368_vm9, %v2969_v10, %v2971_v46 }
 0x322   :  { %v2522_v6 = vadd.f32 %v2514_v50, %v2482_v40  ;;  %v2931_v18 = vrot.slane %v2916_v55, 5  ;;  %v3021_v50 = vmul.f32 %v6122_v57, %v3016_v48 }
 0x324   :  { %2937 = vrot.lane.b32.xlu2 %v2930_v63, %s4114_s9  ;;  %2973 = vrot.lane.b32.xlu1 %v2965_v27, %s4114_s9  ;;  %v6435_v35 = vadd.f32 %v2554_v38, %v2522_v6  ;;  %v2932_v52 = vsel %vm335_vm8, %v2929_v34, %v2931_v18  ;;  %v2968_v38 = vrot.slane %v2954_v15, 6  ;;  %v3058_v34 = vmul.f32 %v6084_v47, %v3056_v13 }
 0x325   :  { %2933 = vrot.lane.b32.xlu0 %v2925_v21, %s4114_s9  ;;  %v3035_v6 = vrot.slane %v3021_v50, 1  ;;  %v3069_v63 = vrot.slane %v3057_v43, 2  ;;  %v3059_v21 = vmul.f32 %v6097_v54, %v3056_v13 }
 0x326   :  { %v2630_v62 = vpop.permute.xlu2 %2629  ;;  %v2552_v11 = vpop.permute.xlu1 %2551  ;;  %v2970_v25 = vsel %vm368_vm9, %v2968_v38, %v2969_v10  ;;  %v3070_v27 = vrot.slane %v3058_v34, 2 }
 0x327   :  { %v2512_v30 = vpop.permute.xlu0 %2511  ;;  %v3036_v55 = vsel %vm203_vm4, %v3034_v32, %v3035_v6  ;;  %v3072_v18 = vrot.slane %v3059_v21, 2 }
 0x328   :  { %v2521_v45 = vadd.f32 %v2512_v30, %v6393_v0  ;;  %v3062_v30 = vmul.f32 %v6192_v22, %v3056_v13 }
 0x32a   :  { %v2561_v14 = vadd.f32 %v2552_v11, %v2521_v45  ;;  %v3061_v11 = vmul.f32 %v6122_v57, %v3056_v13 }
 0x32c   :  { %2975 = vrot.lane.b32.xlu2 %v2967_v8, %s4114_s9  ;;  %2979 = vrot.lane.b32.xlu1 %v2972_v60, %s4114_s9  ;;  %v6445_v19 = vadd.f32 %v2592_v24, %v2561_v14  ;;  %v3033_v24 = vsel %vm203_vm4, %v3030_v58, %v3032_v33  ;;  %v3075_v8 = vrot.slane %v3061_v11, 2  ;;  %v3077_v60 = vrot.slane %v3062_v30, 2 }
 0x32d   :  { %2939 = vrot.lane.b32.xlu0 %v2932_v52, %s4114_s9 }
 0x32e   :  { %v2668_v0 = vpop.permute.xlu2 %2667  ;;  %v2590_v3 = vpop.permute.xlu1 %2589 }
 0x32f   :  { %v2550_v53 = vpop.permute.xlu0 %2549 }
 0x330   :  { %v2560_v56 = vadd.f32 %v2550_v53, %v6408_v49  ;;  %v3073_v53 = vsel %vm236_vm5, %v3070_v27, %v3072_v18 }
 0x332   :  { %v2600_v2 = vadd.f32 %v2590_v3, %v2560_v56  ;;  %v3078_v56 = vsel %vm236_vm5, %v3075_v8, %v3077_v60 }
 0x334   :  { %2999 = vrot.lane.b32.xlu2 %v2991_v17, %s4115_s0  ;;  %3003 = vrot.lane.b32.xlu1 %v2993_v36, %s4115_s0  ;;  %v6456_v39 = vadd.f32 %v2630_v62, %v2600_v2  ;;  %v3071_v62 = vsel %vm236_vm5, %v3069_v63, %v3070_v27  ;;  %v3060_v17 = vmul.f32 %v6118_v29, %v3056_v13 }
 0x335   :  { %2977 = vrot.lane.b32.xlu0 %v2970_v25, %s4114_s9  ;;  %s3966_s9 = sld [smem:[#allocation4 + $0x4a]] }
 0x336   :  { %v2674_v49 = vpop.permute.xlu2 %2673  ;;  %v2628_v44 = vpop.permute.xlu1 %2627 }
 0x337   :  { %v2588_v59 = vpop.permute.xlu0 %2587 }
 0x338   :  { %v2599_v5 = vadd.f32 %v2588_v59, %v6422_v16  ;;  %v3017_v16 = vmul.f32 %v6128_v28, %v3016_v48 }
 0x33a   :  { %v2639_v51 = vadd.f32 %v2628_v44, %v2599_v5  ;;  %v3029_v42 = vrot.slane %v3017_v16, 1  ;;  %v3074_v5 = vrot.slane %v3060_v17, 2 }
 0x33b   :  { %v3096_v52 = vstv %s3966_s9 }
 0x33c   :  { %3005 = vrot.lane.b32.xlu2 %v2994_v7, %s4115_s0  ;;  %3041 = vrot.lane.b32.xlu1 %v3033_v24, %s4115_s0  ;;  %v6470_v26 = vadd.f32 %v2668_v0, %v2639_v51  ;;  %v3031_v9 = vsel %vm203_vm4, %v3029_v42, %v3030_v58  ;;  %v3097_v41 = vmul.f32 %v6128_v28, %v3096_v52  ;;  %v3136_v51 = vstv %s3967_s4 }
 0x33d   :  { %3001 = vrot.lane.b32.xlu0 %v2992_v31, %s4115_s0  ;;  %v3098_v38 = vmul.f32 %v6084_v47, %v3096_v52  ;;  %v3101_v2 = vmul.f32 %v6122_v57, %v3096_v52  ;;  %v3102_v31 = vmul.f32 %v6192_v22, %v3096_v52  ;;  %v3138_v24 = vmul.f32 %v6084_v47, %v3136_v51 }
 0x33e   :  { %v2712_v4 = vpop.permute.xlu2 %2711  ;;  %v2634_v20 = vpop.permute.xlu1 %2633  ;;  %v3139_v50 = vmul.f32 %v6097_v54, %v3136_v51  ;;  %v3099_v43 = vmul.f32 %v6097_v54, %v3096_v52  ;;  %v3141_v21 = vmul.f32 %v6122_v57, %v3136_v51 }
 0x33f   :  { %v2594_v40 = vpop.permute.xlu0 %2593  ;;  %v3110_v44 = vrot.slane %v3098_v38, 3  ;;  %v3115_v58 = vrot.slane %v3101_v2, 3  ;;  %v3150_v32 = vrot.slane %v3138_v24, 4 }
 0x340   :  { %v2602_v37 = vadd.f32 %v2594_v40, %v6435_v35  ;;  %v3022_v35 = vmul.f32 %v6192_v22, %v3016_v48  ;;  %v3100_v48 = vmul.f32 %v6118_v29, %v3096_v52  ;;  %v3117_v40 = vrot.slane %v3102_v31, 3 }
 0x341   :  { %v3112_v27 = vrot.slane %v3099_v43, 3 }
 0x342   :  { %v2642_v23 = vadd.f32 %v2634_v20, %v2602_v37  ;;  %v3037_v0 = vrot.slane %v3022_v35, 1  ;;  %v3114_v59 = vrot.slane %v3100_v48, 3  ;;  %v3176_v37 = vstv %s3968_s5 }
 0x343   :  { %v3177_v11 = vmul.f32 %v6128_v28, %v3176_v37  ;;  %v3178_v30 = vmul.f32 %v6084_v47, %v3176_v37  ;;  %v3181_v38 = vmul.f32 %v6122_v57, %v3176_v37  ;;  %v3182_v48 = vmul.f32 %v6192_v22, %v3176_v37 }
 0x344   :  { %3043 = vrot.lane.b32.xlu2 %v3036_v55, %s4115_s0  ;;  %3079 = vrot.lane.b32.xlu1 %v3071_v62, %s4115_s0  ;;  %v6483_v10 = vadd.f32 %v2674_v49, %v2642_v23  ;;  %v3109_v49 = vrot.slane %v3097_v41, 3  ;;  %v3116_v1 = vsel %vm269_vm6, %v3114_v59, %v3115_v58  ;;  %v3140_v23 = vmul.f32 %v6118_v29, %v3136_v51 }
 0x345   :  { %3039 = vrot.lane.b32.xlu0 %v3031_v9, %s4115_s0  ;;  %v3118_v55 = vsel %vm269_vm6, %v3115_v58, %v3117_v40  ;;  %v3137_v9 = vmul.f32 %v6128_v28, %v3136_v51  ;;  %v3189_v60 = vrot.slane %v3177_v11, 5  ;;  %v3190_v52 = vrot.slane %v3178_v30, 5 }
 0x346   :  { %v2736_v46 = vpop.permute.xlu2 %2735  ;;  %v2672_v45 = vpop.permute.xlu1 %2671  ;;  %v3111_v13 = vsel %vm269_vm6, %v3109_v49, %v3110_v44  ;;  %v3195_v49 = vrot.slane %v3181_v38, 5  ;;  %v3216_v59 = vstv %s3969_s6  ;;  %v3256_v30 = vstv %s3970_s21 }
 0x347   :  { %v2632_v14 = vpop.permute.xlu0 %2631  ;;  %v3217_v31 = vmul.f32 %v6128_v28, %v3216_v59  ;;  %v3221_v24 = vmul.f32 %v6122_v57, %v3216_v59 }
 0x348   :  { %v2641_v15 = vadd.f32 %v2632_v14, %v6445_v19  ;;  %v3038_v19 = vsel %vm203_vm4, %v3035_v6, %v3037_v0  ;;  %v3152_v6 = vrot.slane %v3139_v50, 4  ;;  %v3154_v14 = vrot.slane %v3140_v23, 4 }
 0x349   :  { %v3149_v0 = vrot.slane %v3137_v9, 4  ;;  %v3180_v50 = vmul.f32 %v6118_v29, %v3176_v37  ;;  %v3219_v23 = vmul.f32 %v6097_v54, %v3216_v59 }
 0x34a   :  { %v2681_v3 = vadd.f32 %v2672_v45, %v2641_v15  ;;  %v3153_v62 = vsel %vm302_vm7, %v3150_v32, %v3152_v6 }
 0x34b   :  { %v3151_v2 = vsel %vm302_vm7, %v3149_v0, %v3150_v32  ;;  %v3235_v32 = vrot.slane %v3221_v24, 6  ;;  %v3194_v6 = vrot.slane %v3180_v50, 5  ;;  %v3232_v9 = vrot.slane %v3219_v23, 6 }
 0x34c   :  { %3081 = vrot.lane.b32.xlu2 %v3073_v53, %s4115_s0  ;;  %3085 = vrot.lane.b32.xlu1 %v3078_v56, %s4115_s0  ;;  %v6497_v36 = vadd.f32 %v2712_v4, %v2681_v3  ;;  %v3179_v53 = vmul.f32 %v6097_v54, %v3176_v37  ;;  %v3191_v56 = vsel %vm335_vm8, %v3189_v60, %v3190_v52 }
 0x34d   :  { %3045 = vrot.lane.b32.xlu0 %v3038_v19, %s4115_s0  ;;  %v3222_v37 = vmul.f32 %v6192_v22, %v3216_v59 }
 0x34e   :  { %v2774_v61 = vpop.permute.xlu2 %2773  ;;  %v2710_v12 = vpop.permute.xlu1 %2709 }
 0x34f   :  { %v2670_v25 = vpop.permute.xlu0 %2669  ;;  %v3237_v11 = vrot.slane %v3222_v37, 6 }
 0x350   :  { %v2680_v33 = vadd.f32 %v2670_v25, %v6456_v39  ;;  %v3076_v39 = vsel %vm236_vm5, %v3074_v5, %v3075_v8  ;;  %v3155_v8 = vrot.slane %v3141_v21, 4 }
 0x351   :  { %v3238_v54 = vsel %vm368_vm9, %v3235_v32, %v3237_v11 }
 0x352   :  { %v2720_v7 = vadd.f32 %v2710_v12, %v2680_v33  ;;  %v3156_v41 = vsel %vm302_vm7, %v3154_v14, %v3155_v8  ;;  %v3192_v12 = vrot.slane %v3179_v53, 5 }
 0x354   :  { %3119 = vrot.lane.b32.xlu2 %v3111_v13, %s4115_s0  ;;  %3123 = vrot.lane.b32.xlu1 %v3116_v1, %s4115_s0  ;;  %v6510_v34 = vadd.f32 %v2736_v46, %v2720_v7  ;;  %v3193_v7 = vsel %vm335_vm8, %v3190_v52, %v3192_v12  ;;  %v3218_v13 = vmul.f32 %v6084_v47, %v3216_v59  ;;  %v3229_v47 = vrot.slane %v3217_v31, 6 }
 0x355   :  { %3083 = vrot.lane.b32.xlu0 %v3076_v39, %s4115_s0  ;;  %v3220_v1 = vmul.f32 %v6118_v29, %v3216_v59 }
 0x356   :  { %v2780_v16 = vpop.permute.xlu2 %2779  ;;  %v2734_v4 = vpop.permute.xlu1 %2733 }
 0x357   :  { %v2708_v20 = vpop.permute.xlu0 %2707  ;;  %v3234_v40 = vrot.slane %v3220_v1, 6 }
 0x358   :  { %v2719_v63 = vadd.f32 %v2708_v20, %v6470_v26  ;;  %v3113_v26 = vsel %vm269_vm6, %v3110_v44, %v3112_v27  ;;  %v3197_v44 = vrot.slane %v3182_v48, 5  ;;  %v3230_v20 = vrot.slane %v3218_v13, 6 }
 0x359   :  { %v3236_v29 = vsel %vm368_vm9, %v3234_v40, %v3235_v32 }
 0x35a   :  { %v2745_v42 = vadd.f32 %v2734_v4, %v2719_v63  ;;  %v3231_v27 = vsel %vm368_vm9, %v3229_v47, %v3230_v20  ;;  %v3233_v52 = vsel %vm368_vm9, %v3230_v20, %v3232_v9 }
 0x35c   :  { %3125 = vrot.lane.b32.xlu2 %v3118_v55, %s4115_s0  ;;  %3161 = vrot.lane.b32.xlu1 %v3153_v62, %s4115_s0  ;;  %v6524_v35 = vadd.f32 %v2774_v61, %v2745_v42  ;;  %v3196_v42 = vsel %vm335_vm8, %v3194_v6, %v3195_v49 }
 0x35d   :  { %3121 = vrot.lane.b32.xlu0 %v3113_v26, %s4115_s0 }
 0x35e   :  { %v2818_v46 = vpop.permute.xlu2 %2817  ;;  %v2740_v45 = vpop.permute.xlu1 %2739 }
 0x35f   :  { %v2714_v18 = vpop.permute.xlu0 %2713 }
 0x360   :  { %v2722_v15 = vadd.f32 %v2714_v18, %v6483_v10  ;;  %v3142_v10 = vmul.f32 %v6192_v22, %v3136_v51  ;;  %v3198_v51 = vsel %vm335_vm8, %v3195_v49, %v3197_v44  ;;  %v6566_v18 = vld [vmem:[#allocation3 + $0x8] sm:$0xff]  ;;  %v6590_v49 = vld [vmem:[#allocation3] sm:$0xff] }
 0x361   :  { %v3258_v14 = vmul.f32 %v6566_v18, %v3256_v30 }
 0x362   :  { %v2748_v3 = vadd.f32 %v2740_v45, %v2722_v15  ;;  %v3157_v33 = vrot.slane %v3142_v10, 4 }
 0x364   :  { %3163 = vrot.lane.b32.xlu2 %v3156_v41, %s4115_s0  ;;  %3199 = vrot.lane.b32.xlu1 %v3191_v56, %s4115_s0  ;;  %v6537_v19 = vadd.f32 %v2780_v16, %v2748_v3 }
 0x365   :  { %3159 = vrot.lane.b32.xlu0 %v3151_v2, %s4115_s0  ;;  %v6582_v2 = vld [vmem:[#allocation3 + $0x10] sm:$0x3f] }
 0x366   :  { %v2856_v17 = vpop.permute.xlu2 %2855  ;;  %v2778_v61 = vpop.permute.xlu1 %2777 }
 0x367   :  { %v2738_v25 = vpop.permute.xlu0 %2737 }
 0x368   :  { %v2747_v58 = vadd.f32 %v2738_v25, %v6497_v36  ;;  %v3158_v36 = vsel %vm302_vm7, %v3155_v8, %v3157_v33 }
 0x36a   :  { %v2787_v5 = vadd.f32 %v2778_v61, %v2747_v58 }
 0x36c   :  { %3201 = vrot.lane.b32.xlu2 %v3193_v7, %s4115_s0  ;;  %3205 = vrot.lane.b32.xlu1 %v3198_v51, %s4115_s0  ;;  %v6551_v39 = vadd.f32 %v2818_v46, %v2787_v5  ;;  %v3282_v46 = vstv %s3971_s8  ;;  %v3322_v51 = vstv %s3972_s10 }
 0x36d   :  { %3165 = vrot.lane.b32.xlu0 %v3158_v36, %s4115_s0  ;;  %v3283_v8 = vmul.f32 %v6128_v28, %v3282_v46  ;;  %v3284_v60 = vmul.f32 %v6566_v18, %v3282_v46  ;;  %v6579_v28 = vld [vmem:[#allocation3 + $0x18] sm:$0xff]  ;;  %v3285_v10 = vmul.f32 %v6582_v2, %v3282_v46  ;;  %v3288_v12 = vmul.f32 %v6192_v22, %v3282_v46 }
 0x36e   :  { %v2894_v43 = vpop.permute.xlu2 %2893  ;;  %v2816_v16 = vpop.permute.xlu1 %2815  ;;  %v3259_v38 = vmul.f32 %v6579_v28, %v3256_v30  ;;  %v3323_v50 = vmul.f32 %v6590_v49, %v3322_v51  ;;  %v3325_v9 = vmul.f32 %v6582_v2, %v3322_v51 }
 0x36f   :  { %v2776_v4 = vpop.permute.xlu0 %2775  ;;  %v3295_v53 = vrot.slane %v3283_v8, 1  ;;  %v3296_v41 = vrot.slane %v3284_v60, 1  ;;  %v3298_v33 = vrot.slane %v3285_v10, 1  ;;  %v3303_v7 = vrot.slane %v3288_v12, 1 }
 0x370   :  { %v2786_v57 = vadd.f32 %v2776_v4, %v6510_v34 }
 0x371   :  { %v3297_v25 = vsel %vm203_vm4, %v3295_v53, %v3296_v41  ;;  %v3299_v1 = vsel %vm203_vm4, %v3296_v41, %v3298_v33 }
 0x372   :  { %v2826_v63 = vadd.f32 %v2816_v16, %v2786_v57  ;;  %v3326_v16 = vmul.f32 %v6579_v28, %v3322_v51  ;;  %v3335_v57 = vrot.slane %v3323_v50, 2 }
 0x374   :  { %3239 = vrot.lane.b32.xlu2 %v3231_v27, %s4115_s0  ;;  %3243 = vrot.lane.b32.xlu1 %v3236_v29, %s4115_s0  ;;  %v6562_v21 = vadd.f32 %v2856_v17, %v2826_v63  ;;  %v6585_v17 = vld [vmem:[#allocation3 + $0x20] sm:$0xff]  ;;  %v3340_v63 = vrot.slane %v3326_v16, 2 }
 0x375   :  { %3203 = vrot.lane.b32.xlu0 %v3196_v42, %s4115_s0  ;;  %v3287_v61 = vmul.f32 %v6585_v17, %v3282_v46  ;;  %v3260_v36 = vmul.f32 %v6585_v17, %v3256_v30  ;;  %v3327_v4 = vmul.f32 %v6585_v17, %v3322_v51 }
 0x376   :  { %v2900_v34 = vpop.permute.xlu2 %2899  ;;  %v2854_v55 = vpop.permute.xlu1 %2853 }
 0x377   :  { %v2814_v62 = vpop.permute.xlu0 %2813  ;;  %v3301_v5 = vrot.slane %v3287_v61, 1  ;;  %v3341_v27 = vrot.slane %v3327_v4, 2 }
 0x378   :  { %v2825_v26 = vadd.f32 %v2814_v62, %v6524_v35 }
 0x379   :  { %v3304_v24 = vsel %vm203_vm4, %v3301_v5, %v3303_v7  ;;  %v3342_v11 = vsel %vm236_vm5, %v3340_v63, %v3341_v27  ;;  %v3442_v63 = vstv %s3975_s12 }
 0x37a   :  { %v2865_v45 = vadd.f32 %v2854_v55, %v2825_v26 }
 0x37c   :  { %3245 = vrot.lane.b32.xlu2 %v3238_v54, %s4115_s0  ;;  %3267 = vrot.lane.b32.xlu1 %v3258_v14, %s4116_s27  ;;  %v6575_v35 = vadd.f32 %v2894_v43, %v2865_v45  ;;  %v3324_v43 = vmul.f32 %v6566_v18, %v3322_v51 }
 0x37d   :  { %3241 = vrot.lane.b32.xlu0 %v3233_v52, %s4115_s0  ;;  %s3973_s0 = sld [smem:[#allocation4 + $0x4b]] }
 0x37e   :  { %v2938_v15 = vpop.permute.xlu2 %2937  ;;  %v2860_v0 = vpop.permute.xlu1 %2859  ;;  %v3336_v6 = vrot.slane %v3324_v43, 2 }
 0x37f   :  { %v2820_v3 = vpop.permute.xlu0 %2819 }
 0x380   :  { %v2828_v56 = vadd.f32 %v2820_v3, %v6537_v19  ;;  %v3257_v19 = vmul.f32 %v6590_v49, %v3256_v30  ;;  %v3337_v62 = vsel %vm236_vm5, %v3335_v57, %v3336_v6  ;;  %v3402_v3 = vstv %s3974_s11 }
 0x381   :  { %v3403_v10 = vmul.f32 %v6590_v49, %v3402_v3  ;;  %v3404_v61 = vmul.f32 %v6566_v18, %v3402_v3  ;;  %v3407_v50 = vmul.f32 %v6585_v17, %v3402_v3 }
 0x382   :  { %v2868_v48 = vadd.f32 %v2860_v0, %v2828_v56  ;;  %v3338_v0 = vrot.slane %v3325_v9, 2 }
 0x383   :  { %v3362_v42 = vstv %s3973_s0  ;;  %v3415_v7 = vrot.slane %v3403_v10, 4  ;;  %v3421_v57 = vrot.slane %v3407_v50, 4 }
 0x384   :  { %3269 = vrot.lane.b32.xlu2 %v3259_v38, %s4116_s27  ;;  %3305 = vrot.lane.b32.xlu1 %v3297_v25, %s4116_s27  ;;  %v6595_v44 = vadd.f32 %v2900_v34, %v2868_v48  ;;  %v6613_v34 = vld [vmem:[#allocation3 + $0x28] sm:$0x3f]  ;;  %v3364_v30 = vmul.f32 %v6566_v18, %v3362_v42  ;;  %v3365_v26 = vmul.f32 %v6582_v2, %v3362_v42 }
 0x385   :  { %3265 = vrot.lane.b32.xlu0 %v3257_v19, %s4116_s27  ;;  %v3328_v55 = vmul.f32 %v6613_v34, %v3322_v51  ;;  %v3366_v41 = vmul.f32 %v6579_v28, %v3362_v42  ;;  %v3367_v56 = vmul.f32 %v6585_v17, %v3362_v42  ;;  %v3363_v12 = vmul.f32 %v6590_v49, %v3362_v42 }
 0x386   :  { %v2976_v59 = vpop.permute.xlu2 %2975  ;;  %v2898_v58 = vpop.permute.xlu1 %2897  ;;  %v3376_v60 = vrot.slane %v3364_v30, 3  ;;  %v3378_v52 = vrot.slane %v3365_v26, 3  ;;  %v3408_v43 = vmul.f32 %v6613_v34, %v3402_v3  ;;  %v3447_v30 = vmul.f32 %v6585_v17, %v3442_v63 }
 0x387   :  { %v2858_v22 = vpop.permute.xlu0 %2857  ;;  %v3343_v8 = vrot.slane %v3328_v55, 2  ;;  %v3380_v33 = vrot.slane %v3366_v41, 3  ;;  %v3375_v51 = vrot.slane %v3363_v12, 3  ;;  %v3406_v26 = vmul.f32 %v6579_v28, %v3402_v3 }
 0x388   :  { %v2867_v31 = vadd.f32 %v2858_v22, %v6551_v39  ;;  %v3286_v39 = vmul.f32 %v6579_v28, %v3282_v46  ;;  %v3379_v48 = vsel %vm269_vm6, %v3376_v60, %v3378_v52  ;;  %v3416_v22 = vrot.slane %v3404_v61, 4 }
 0x389   :  { %v3344_v38 = vsel %vm236_vm5, %v3341_v27, %v3343_v8  ;;  %v3377_v16 = vsel %vm269_vm6, %v3375_v51, %v3376_v60  ;;  %v3461_v52 = vrot.slane %v3447_v30, 5  ;;  %v3548_v30 = vstv %s3978_s15 }
 0x38a   :  { %v2907_v13 = vadd.f32 %v2898_v58, %v2867_v31  ;;  %v3300_v37 = vrot.slane %v3286_v39, 1 }
 0x38c   :  { %3307 = vrot.lane.b32.xlu2 %v3299_v1, %s4116_s27  ;;  %3311 = vrot.lane.b32.xlu1 %v3304_v24, %s4116_s27  ;;  %v6609_v47 = vadd.f32 %v2938_v15, %v2907_v13  ;;  %v3405_v1 = vmul.f32 %v6582_v2, %v3402_v3 }
 0x38d   :  { %3271 = vrot.lane.b32.xlu0 %v3260_v36, %s4116_s27  ;;  %v3417_v36 = vsel %vm302_vm7, %v3415_v7, %v3416_v22 }
 0x38e   :  { %v3000_v20 = vpop.permute.xlu2 %2999  ;;  %v2936_v40 = vpop.permute.xlu1 %2935 }
 0x38f   :  { %v2896_v32 = vpop.permute.xlu0 %2895 }
 0x390   :  { %v2906_v29 = vadd.f32 %v2896_v32, %v6562_v21  ;;  %v3302_v21 = vsel %vm203_vm4, %v3300_v37, %v3301_v5  ;;  %v3381_v5 = vrot.slane %v3367_v56, 3  ;;  %v3448_v56 = vmul.f32 %v6613_v34, %v3442_v63 }
 0x392   :  { %v2946_v23 = vadd.f32 %v2936_v40, %v2906_v29  ;;  %v3382_v24 = vsel %vm269_vm6, %v3380_v33, %v3381_v5  ;;  %v3418_v40 = vrot.slane %v3405_v1, 4 }
 0x394   :  { %3345 = vrot.lane.b32.xlu2 %v3337_v62, %s4116_s27  ;;  %3349 = vrot.lane.b32.xlu1 %v3342_v11, %s4116_s27  ;;  %v6624_v46 = vadd.f32 %v2976_v59, %v2946_v23  ;;  %v3419_v23 = vsel %vm302_vm7, %v3416_v22, %v3418_v40  ;;  %v3444_v62 = vmul.f32 %v6566_v18, %v3442_v63  ;;  %v3522_v40 = vstv %s3977_s14 }
 0x395   :  { %3309 = vrot.lane.b32.xlu0 %v3302_v21, %s4116_s27  ;;  %v3446_v11 = vmul.f32 %v6579_v28, %v3442_v63 }
 0x396   :  { %v3006_v45 = vpop.permute.xlu2 %3005  ;;  %v2974_v14 = vpop.permute.xlu1 %2973  ;;  %v3456_v8 = vrot.slane %v3444_v62, 5 }
 0x397   :  { %v2934_v54 = vpop.permute.xlu0 %2933  ;;  %v3460_v60 = vrot.slane %v3446_v11, 5 }
 0x398   :  { %v2945_v15 = vadd.f32 %v2934_v54, %v6575_v35  ;;  %v3339_v35 = vsel %vm236_vm5, %v3336_v6, %v3338_v0  ;;  %v3423_v6 = vrot.slane %v3408_v43, 4  ;;  %v3420_v0 = vrot.slane %v3406_v26, 4 }
 0x399   :  { %v3524_v26 = vmul.f32 %v6566_v18, %v3522_v40 }
 0x39a   :  { %v2985_v53 = vadd.f32 %v2974_v14, %v2945_v15  ;;  %v3424_v55 = vsel %vm302_vm7, %v3421_v57, %v3423_v6  ;;  %v3422_v61 = vsel %vm302_vm7, %v3420_v0, %v3421_v57 }
 0x39c   :  { %3351 = vrot.lane.b32.xlu2 %v3344_v38, %s4116_s27  ;;  %3387 = vrot.lane.b32.xlu1 %v3379_v48, %s4116_s27  ;;  %v6638_v25 = vadd.f32 %v3000_v20, %v2985_v53  ;;  %v3482_v53 = vstv %s3976_s13  ;;  %v3462_v38 = vsel %vm335_vm8, %v3460_v60, %v3461_v52 }
 0x39d   :  { %3347 = vrot.lane.b32.xlu0 %v3339_v35, %s4116_s27  ;;  %v3484_v48 = vmul.f32 %v6566_v18, %v3482_v53  ;;  %v3485_v10 = vmul.f32 %v6582_v2, %v3482_v53  ;;  %v3486_v1 = vmul.f32 %v6579_v28, %v3482_v53  ;;  %v3483_v50 = vmul.f32 %v6590_v49, %v3482_v53 }
 0x39e   :  { %v3044_v19 = vpop.permute.xlu2 %3043  ;;  %v2980_v59 = vpop.permute.xlu1 %2979 }
 0x39f   :  { %v2940_v58 = vpop.permute.xlu0 %2939  ;;  %v3496_v33 = vrot.slane %v3484_v48, 6  ;;  %v3495_v57 = vrot.slane %v3483_v50, 6  ;;  %v3588_v48 = vstv %s3979_s16 }
 0x3a0   :  { %v2948_v31 = vadd.f32 %v2940_v58, %v6595_v44  ;;  %v3368_v44 = vmul.f32 %v6613_v34, %v3362_v42  ;;  %v3443_v42 = vmul.f32 %v6590_v49, %v3442_v63  ;;  %v3463_v58 = vrot.slane %v3448_v56, 5 }
 0x3a2   :  { %v2988_v13 = vadd.f32 %v2980_v59, %v2948_v31  ;;  %v3383_v29 = vrot.slane %v3368_v44, 3  ;;  %v3455_v54 = vrot.slane %v3443_v42, 5  ;;  %v3464_v51 = vsel %vm335_vm8, %v3461_v52, %v3463_v58 }
 0x3a3   :  { %v3591_v58 = vmul.f32 %v6582_v2, %v3588_v48 }
 0x3a4   :  { %3389 = vrot.lane.b32.xlu2 %v3382_v24, %s4116_s27  ;;  %3425 = vrot.lane.b32.xlu1 %v3417_v36, %s4116_s27  ;;  %v6651_v4 = vadd.f32 %v3006_v45, %v2988_v13  ;;  %v3457_v3 = vsel %vm335_vm8, %v3455_v54, %v3456_v8  ;;  %v3487_v24 = vmul.f32 %v6585_v17, %v3482_v53 }
 0x3a5   :  { %3385 = vrot.lane.b32.xlu0 %v3377_v16, %s4116_s27  ;;  %v3552_v54 = vmul.f32 %v6579_v28, %v3548_v30 }
 0x3a6   :  { %v3082_v39 = vpop.permute.xlu2 %3081  ;;  %v3004_v20 = vpop.permute.xlu1 %3003 }
 0x3a7   :  { %v2978_v32 = vpop.permute.xlu0 %2977  ;;  %v3566_v56 = vrot.slane %v3552_v54, 1 }
 0x3a8   :  { %v2987_v27 = vadd.f32 %v2978_v32, %v6609_v47  ;;  %v3384_v47 = vsel %vm269_vm6, %v3381_v5, %v3383_v29  ;;  %v3498_v5 = vrot.slane %v3485_v10, 6  ;;  %v3497_v29 = vsel %vm368_vm9, %v3495_v57, %v3496_v33 }
 0x3aa   :  { %v3013_v37 = vadd.f32 %v3004_v20, %v2987_v27  ;;  %v3499_v13 = vsel %vm368_vm9, %v3496_v33, %v3498_v5  ;;  %v3501_v20 = vrot.slane %v3487_v24, 6 }
 0x3ac   :  { %3427 = vrot.lane.b32.xlu2 %v3419_v23, %s4116_s27  ;;  %3431 = vrot.lane.b32.xlu1 %v3424_v55, %s4116_s27  ;;  %v6665_v21 = vadd.f32 %v3044_v19, %v3013_v37  ;;  %v3488_v37 = vmul.f32 %v6613_v34, %v3482_v53 }
 0x3ad   :  { %3391 = vrot.lane.b32.xlu0 %v3384_v47, %s4116_s27 }
 0x3ae   :  { %v3120_v9 = vpop.permute.xlu2 %3119  ;;  %v3042_v45 = vpop.permute.xlu1 %3041  ;;  %v3503_v11 = vrot.slane %v3488_v37, 6 }
 0x3af   :  { %v3002_v14 = vpop.permute.xlu0 %3001 }
 0x3b0   :  { %v3012_v15 = vadd.f32 %v3002_v14, %v6624_v46  ;;  %v3445_v46 = vmul.f32 %v6582_v2, %v3442_v63  ;;  %v3523_v63 = vmul.f32 %v6590_v49, %v3522_v40  ;;  %v3550_v14 = vmul.f32 %v6566_v18, %v3548_v30 }
 0x3b2   :  { %v3052_v41 = vadd.f32 %v3042_v45, %v3012_v15  ;;  %v3458_v22 = vrot.slane %v3445_v46, 5  ;;  %v3549_v45 = vmul.f32 %v6590_v49, %v3548_v30  ;;  %v3554_v46 = vmul.f32 %v6613_v34, %v3548_v30 }
 0x3b4   :  { %3465 = vrot.lane.b32.xlu2 %v3457_v3, %s4116_s27  ;;  %3469 = vrot.lane.b32.xlu1 %v3462_v38, %s4116_s27  ;;  %v6678_v35 = vadd.f32 %v3082_v39, %v3052_v41  ;;  %v3459_v36 = vsel %vm335_vm8, %v3456_v8, %v3458_v22  ;;  %v3500_v39 = vrot.slane %v3486_v1, 6  ;;  %v3553_v8 = vmul.f32 %v6585_v17, %v3548_v30 }
 0x3b5   :  { %3429 = vrot.lane.b32.xlu0 %v3422_v61, %s4116_s27  ;;  %v3561_v53 = vrot.slane %v3549_v45, 1  ;;  %v3562_v41 = vrot.slane %v3550_v14, 1  ;;  %v3525_v61 = vmul.f32 %v6579_v28, %v3522_v40 }
 0x3b6   :  { %v3126_v12 = vpop.permute.xlu2 %3125  ;;  %v3080_v19 = vpop.permute.xlu1 %3079  ;;  %v3502_v27 = vsel %vm368_vm9, %v3500_v39, %v3501_v20  ;;  %v3567_v3 = vrot.slane %v3553_v8, 1 }
 0x3b7   :  { %v3040_v59 = vpop.permute.xlu0 %3039 }
 0x3b8   :  { %v3051_v7 = vadd.f32 %v3040_v59, %v6638_v25  ;;  %v3590_v59 = vmul.f32 %v6566_v18, %v3588_v48 }
 0x3ba   :  { %v3091_v31 = vadd.f32 %v3080_v19, %v3051_v7  ;;  %v3568_v19 = vsel %vm203_vm4, %v3566_v56, %v3567_v3 }
 0x3bc   :  { %3471 = vrot.lane.b32.xlu2 %v3464_v51, %s4116_s27  ;;  %3507 = vrot.lane.b32.xlu1 %v3499_v13, %s4116_s27  ;;  %v6690_v43 = vadd.f32 %v3120_v9, %v3091_v31  ;;  %v3526_v9 = vmul.f32 %v6585_v17, %v3522_v40  ;;  %v3569_v31 = vrot.slane %v3554_v46, 1  ;;  %v3602_v51 = vrot.slane %v3590_v59, 2 }
 0x3bd   :  { %3467 = vrot.lane.b32.xlu0 %v3459_v36, %s4116_s27  ;;  %v3604_v13 = vrot.slane %v3591_v58, 2  ;;  %v3628_v36 = vstv %s3980_s17 }
 0x3be   :  { %v3164_v25 = vpop.permute.xlu2 %3163  ;;  %v3086_v16 = vpop.permute.xlu1 %3085  ;;  %v3630_v40 = vmul.f32 %v6566_v18, %v3628_v36  ;;  %v3634_v45 = vmul.f32 %v6613_v34, %v3628_v36  ;;  %v3632_v59 = vmul.f32 %v6579_v28, %v3628_v36 }
 0x3bf   :  { %v3046_v44 = vpop.permute.xlu0 %3045  ;;  %v3605_v39 = vsel %vm236_vm5, %v3602_v51, %v3604_v13 }
 0x3c0   :  { %v3054_v32 = vadd.f32 %v3046_v44, %v6651_v4  ;;  %v3570_v44 = vsel %vm203_vm4, %v3567_v3, %v3569_v31 }
 0x3c2   :  { %v3094_v6 = vadd.f32 %v3086_v16, %v3054_v32  ;;  %v3593_v16 = vmul.f32 %v6585_v17, %v3588_v48  ;;  %v3589_v32 = vmul.f32 %v6590_v49, %v3588_v48 }
 0x3c4   :  { %3509 = vrot.lane.b32.xlu2 %v3502_v27, %s4116_s27  ;;  %3531 = vrot.lane.b32.xlu1 %v3523_v63, %s4117_s7  ;;  %v6700_v23 = vadd.f32 %v3126_v12, %v3094_v6  ;;  %v3563_v12 = vsel %vm203_vm4, %v3561_v53, %v3562_v41  ;;  %v3607_v37 = vrot.slane %v3593_v16, 2  ;;  %v3649_v53 = vrot.slane %v3634_v45, 3 }
 0x3c5   :  { %3505 = vrot.lane.b32.xlu0 %v3497_v29, %s4116_s27 }
 0x3c6   :  { %v3202_v4 = vpop.permute.xlu2 %3201  ;;  %v3124_v42 = vpop.permute.xlu1 %3123 }
 0x3c7   :  { %v3084_v55 = vpop.permute.xlu0 %3083 }
 0x3c8   :  { %v3093_v62 = vadd.f32 %v3084_v55, %v6665_v21  ;;  %v3504_v21 = vsel %vm368_vm9, %v3501_v20, %v3503_v11  ;;  %v3629_v20 = vmul.f32 %v6590_v49, %v3628_v36 }
 0x3ca   :  { %v3133_v47 = vadd.f32 %v3124_v42, %v3093_v62  ;;  %v3642_v42 = vrot.slane %v3630_v40, 3  ;;  %v3601_v62 = vrot.slane %v3589_v32, 2 }
 0x3cc   :  { %3533 = vrot.lane.b32.xlu2 %v3524_v26, %s4117_s7  ;;  %3537 = vrot.lane.b32.xlu1 %v3526_v9, %s4117_s7  ;;  %v6713_v60 = vadd.f32 %v3164_v25, %v3133_v47  ;;  %v3592_v25 = vmul.f32 %v6579_v28, %v3588_v48  ;;  %v3633_v9 = vmul.f32 %v6585_v17, %v3628_v36 }
 0x3cd   :  { %3511 = vrot.lane.b32.xlu0 %v3504_v21, %s4116_s27  ;;  %s3981_s27 = sld [smem:[#allocation4 + $0x53]]  ;;  %v3603_v14 = vsel %vm236_vm5, %v3601_v62, %v3602_v51 }
 0x3ce   :  { %v3240_v52 = vpop.permute.xlu2 %3239  ;;  %v3162_v15 = vpop.permute.xlu1 %3161  ;;  %v3606_v29 = vrot.slane %v3592_v25, 2 }
 0x3cf   :  { %v3122_v0 = vpop.permute.xlu0 %3121 }
 0x3d0   :  { %v3132_v38 = vadd.f32 %v3122_v0, %v6678_v35  ;;  %v3551_v35 = vmul.f32 %v6582_v2, %v3548_v30  ;;  %v3631_v30 = vmul.f32 %v6582_v2, %v3628_v36  ;;  %v3608_v47 = vsel %vm236_vm5, %v3606_v29, %v3607_v37 }
 0x3d1   :  { %v3647_v0 = vrot.slane %v3633_v9, 3 }
 0x3d2   :  { %v3172_v10 = vadd.f32 %v3162_v15, %v3132_v38  ;;  %v3564_v24 = vrot.slane %v3551_v35, 1  ;;  %v3644_v15 = vrot.slane %v3631_v30, 3 }
 0x3d3   :  { %v3650_v46 = vsel %vm269_vm6, %v3647_v0, %v3649_v53 }
 0x3d4   :  { %3571 = vrot.lane.b32.xlu2 %v3563_v12, %s4117_s7  ;;  %3575 = vrot.lane.b32.xlu1 %v3568_v19, %s4117_s7  ;;  %v6726_v33 = vadd.f32 %v3202_v4, %v3172_v10  ;;  %v3641_v4 = vrot.slane %v3629_v20, 3 }
 0x3d5   :  { %3535 = vrot.lane.b32.xlu0 %v3525_v61, %s4117_s7  ;;  %v3645_v61 = vsel %vm269_vm6, %v3642_v42, %v3644_v15 }
 0x3d6   :  { %v3246_v5 = vpop.permute.xlu2 %3245  ;;  %v3200_v7 = vpop.permute.xlu1 %3199  ;;  %v3643_v26 = vsel %vm269_vm6, %v3641_v4, %v3642_v42 }
 0x3d7   :  { %v3160_v22 = vpop.permute.xlu0 %3159 }
 0x3d8   :  { %v3171_v1 = vadd.f32 %v3160_v22, %v6690_v43  ;;  %v3565_v43 = vsel %vm203_vm4, %v3562_v41, %v3564_v24  ;;  %v3668_v41 = vstv %s3981_s27  ;;  %v3646_v24 = vrot.slane %v3632_v59, 3 }
 0x3d9   :  { %v3669_v10 = vmul.f32 %v6590_v49, %v3668_v41  ;;  %v3672_v12 = vmul.f32 %v6579_v28, %v3668_v41  ;;  %v3673_v19 = vmul.f32 %v6585_v17, %v3668_v41  ;;  %v3671_v40 = vmul.f32 %v6582_v2, %v3668_v41 }
 0x3da   :  { %v3211_v50 = vadd.f32 %v3200_v7, %v3171_v1 }
 0x3db   :  { %v3681_v7 = vrot.slane %v3669_v10, 4  ;;  %v3686_v51 = vrot.slane %v3672_v12, 4  ;;  %v3687_v13 = vrot.slane %v3673_v19, 4  ;;  %v3684_v42 = vrot.slane %v3671_v40, 4 }
 0x3dc   :  { %3577 = vrot.lane.b32.xlu2 %v3570_v44, %s4117_s7  ;;  %3613 = vrot.lane.b32.xlu1 %v3605_v39, %s4117_s7  ;;  %v6740_v57 = vadd.f32 %v3240_v52, %v3211_v50  ;;  %v3708_v50 = vstv %s3982_s1  ;;  %v3674_v44 = vmul.f32 %v6613_v34, %v3668_v41 }
 0x3dd   :  { %3573 = vrot.lane.b32.xlu0 %v3565_v43, %s4117_s7  ;;  %v3688_v36 = vsel %vm302_vm7, %v3686_v51, %v3687_v13  ;;  %v3710_v39 = vmul.f32 %v6566_v18, %v3708_v50  ;;  %v3711_v20 = vmul.f32 %v6582_v2, %v3708_v50  ;;  %v3713_v30 = vmul.f32 %v6585_v17, %v3708_v50 }
 0x3de   :  { %v3270_v6 = vpop.permute.xlu2 %3269  ;;  %v3206_v63 = vpop.permute.xlu1 %3205 }
 0x3df   :  { %v3166_v27 = vpop.permute.xlu0 %3165  ;;  %v3722_v29 = vrot.slane %v3710_v39, 5  ;;  %v3727_v15 = vrot.slane %v3713_v30, 5 }
 0x3e0   :  { %v3174_v55 = vadd.f32 %v3166_v27, %v6700_v23  ;;  %v3594_v23 = vmul.f32 %v6613_v34, %v3588_v48  ;;  %v3670_v48 = vmul.f32 %v6566_v18, %v3668_v41  ;;  %v3689_v27 = vrot.slane %v3674_v44, 4 }
 0x3e2   :  { %v3214_v11 = vadd.f32 %v3206_v63, %v3174_v55  ;;  %v3609_v3 = vrot.slane %v3594_v23, 2  ;;  %v3682_v22 = vrot.slane %v3670_v48, 4  ;;  %v3748_v55 = vstv %s3983_s20 }
 0x3e3   :  { %v3749_v9 = vmul.f32 %v6590_v49, %v3748_v55  ;;  %v3750_v45 = vmul.f32 %v6566_v18, %v3748_v55  ;;  %v3753_v48 = vmul.f32 %v6585_v17, %v3748_v55 }
 0x3e4   :  { %3615 = vrot.lane.b32.xlu2 %v3608_v47, %s4117_s7  ;;  %3651 = vrot.lane.b32.xlu1 %v3643_v26, %s4117_s7  ;;  %v6753_v54 = vadd.f32 %v3246_v5, %v3214_v11  ;;  %v3683_v16 = vsel %vm302_vm7, %v3681_v7, %v3682_v22  ;;  %v3712_v11 = vmul.f32 %v6579_v28, %v3708_v50 }
 0x3e5   :  { %3611 = vrot.lane.b32.xlu0 %v3603_v14, %s4117_s7  ;;  %v3690_v47 = vsel %vm302_vm7, %v3687_v13, %v3689_v27  ;;  %v3709_v14 = vmul.f32 %v6590_v49, %v3708_v50  ;;  %v3761_v53 = vrot.slane %v3749_v9, 6  ;;  %v3762_v41 = vrot.slane %v3750_v45, 6 }
 0x3e6   :  { %v3308_v8 = vpop.permute.xlu2 %3307  ;;  %v3244_v21 = vpop.permute.xlu1 %3243  ;;  %v3751_v49 = vmul.f32 %v6582_v2, %v3748_v55  ;;  %v3767_v2 = vrot.slane %v3753_v48, 6  ;;  %v3752_v13 = vmul.f32 %v6579_v28, %v3748_v55 }
 0x3e7   :  { %v3204_v52 = vpop.permute.xlu0 %3203  ;;  %v3763_v10 = vsel %vm368_vm9, %v3761_v53, %v3762_v41 }
 0x3e8   :  { %v3213_v56 = vadd.f32 %v3204_v52, %v6713_v60  ;;  %v3610_v60 = vsel %vm236_vm5, %v3607_v37, %v3609_v3  ;;  %v3724_v37 = vrot.slane %v3711_v20, 5  ;;  %v3726_v52 = vrot.slane %v3712_v11, 5 }
 0x3ea   :  { %v3253_v38 = vadd.f32 %v3244_v21, %v3213_v56  ;;  %v3725_v26 = vsel %vm335_vm8, %v3722_v29, %v3724_v37  ;;  %v3721_v56 = vrot.slane %v3709_v14, 5 }
 0x3ec   :  { %3653 = vrot.lane.b32.xlu2 %v3645_v61, %s4117_s7  ;;  %3657 = vrot.lane.b32.xlu1 %v3650_v46, %s4117_s7  ;;  %v6767_v58 = vadd.f32 %v3270_v6, %v3253_v38  ;;  %v3728_v38 = vsel %vm335_vm8, %v3726_v52, %v3727_v15  ;;  %v3754_v61 = vmul.f32 %v6613_v34, %v3748_v55 }
 0x3ed   :  { %3617 = vrot.lane.b32.xlu0 %v3610_v60, %s4117_s7  ;;  %v3723_v46 = vsel %vm335_vm8, %v3721_v56, %v3722_v29 }
 0x3ee   :  { %v3346_v35 = vpop.permute.xlu2 %3345  ;;  %v3268_v5 = vpop.permute.xlu1 %3267 }
 0x3ef   :  { %v3242_v31 = vpop.permute.xlu0 %3241 }
 0x3f0   :  { %v3252_v1 = vadd.f32 %v3242_v31, %v6726_v33  ;;  %v3648_v33 = vsel %vm269_vm6, %v3646_v24, %v3647_v0 }
 0x3f2   :  { %v3278_v25 = vadd.f32 %v3268_v5, %v3252_v1  ;;  %v3769_v5 = vrot.slane %v3754_v61, 6 }
 0x3f4   :  { %3691 = vrot.lane.b32.xlu2 %v3683_v16, %s4117_s7  ;;  %3695 = vrot.lane.b32.xlu1 %v3688_v36, %s4117_s7  ;;  %v6780_v43 = vadd.f32 %v3308_v8, %v3278_v25  ;;  %v3770_v51 = vsel %vm368_vm9, %v3767_v2, %v3769_v5  ;;  %v3766_v16 = vrot.slane %v3752_v13, 6 }
 0x3f5   :  { %3655 = vrot.lane.b32.xlu0 %v3648_v33, %s4117_s7 }
 0x3f6   :  { %v3352_v32 = vpop.permute.xlu2 %3351  ;;  %v3306_v6 = vpop.permute.xlu1 %3305  ;;  %v3768_v44 = vsel %vm368_vm9, %v3766_v16, %v3767_v2 }
 0x3f7   :  { %v3266_v63 = vpop.permute.xlu0 %3265 }
 0x3f8   :  { %v3277_v4 = vadd.f32 %v3266_v63, %v6740_v57  ;;  %v3685_v57 = vsel %vm302_vm7, %v3682_v22, %v3684_v42 }
 0x3fa   :  { %v3317_v62 = vadd.f32 %v3306_v6, %v3277_v4 }
 0x3fc   :  { %3697 = vrot.lane.b32.xlu2 %v3690_v47, %s4117_s7  ;;  %3733 = vrot.lane.b32.xlu1 %v3725_v26, %s4117_s7  ;;  %v3357_v23 = vadd.f32 %v3346_v35, %v3317_v62  ;;  %v3764_v35 = vrot.slane %v3751_v49, 6 }
 0x3fd   :  { %3693 = vrot.lane.b32.xlu0 %v3685_v57, %s4117_s7 }
 0x3fe   :  { %v3390_v8 = vpop.permute.xlu2 %3389  ;;  %v3312_v21 = vpop.permute.xlu1 %3311  ;;  %v3765_v31 = vsel %vm368_vm9, %v3762_v41, %v3764_v35 }
 0x3ff   :  { %v3272_v0 = vpop.permute.xlu0 %3271 }
 0x400   :  { %v3280_v18 = vadd.f32 %v3272_v0, %v6753_v54  ;;  %v3714_v54 = vmul.f32 %v6613_v34, %v3708_v50 }
 0x402   :  { %v3320_v3 = vadd.f32 %v3312_v21, %v3280_v18  ;;  %v3729_v7 = vrot.slane %v3714_v54, 5 }
 0x404   :  { %3735 = vrot.lane.b32.xlu2 %v3728_v38, %s4117_s7  ;;  %3771 = vrot.lane.b32.xlu1 %v3763_v10, %s4117_s7  ;;  %v3360_v12 = vadd.f32 %v3352_v32, %v3320_v3  ;;  %v3730_v34 = vsel %vm335_vm8, %v3727_v15, %v3729_v7 }
 0x405   :  { %3731 = vrot.lane.b32.xlu0 %v3723_v46, %s4117_s7 }
 0x406   :  { %v3428_v19 = vpop.permute.xlu2 %3427  ;;  %v3350_v60 = vpop.permute.xlu1 %3349 }
 0x407   :  { %v3310_v59 = vpop.permute.xlu0 %3309 }
 0x408   :  { %v3319_v17 = vadd.f32 %v3310_v59, %v6767_v58 }
 0x40a   :  { %v3359_v22 = vadd.f32 %v3350_v60, %v3319_v17 }
 0x40c   :  { %3773 = vrot.lane.b32.xlu2 %v3765_v31, %s4117_s7  ;;  %3777 = vrot.lane.b32.xlu1 %v3770_v51, %s4117_s7  ;;  %v3399_v1 = vadd.f32 %v3390_v8, %v3359_v22 }
 0x40d   :  { %3737 = vrot.lane.b32.xlu0 %v3730_v34, %s4117_s7 }
 0x40e   :  { %v3466_v24 = vpop.permute.xlu2 %3465  ;;  %v3388_v50 = vpop.permute.xlu1 %3387 }
 0x40f   :  { %v3348_v58 = vpop.permute.xlu0 %3347 }
 0x410   :  { %v3358_v25 = vadd.f32 %v3348_v58, %v6780_v43 }
 0x412   :  { %v3398_v36 = vadd.f32 %v3388_v50, %v3358_v25 }
 0x414   :  { %v3438_v39 = vadd.f32 %v3428_v19, %v3398_v36 }
 0x415   :  { %3775 = vrot.lane.b32.xlu0 %v3768_v44, %s4117_s7  ;;  %s4118_s7 = smov [#allocation9]  }
 0x416   :  { %v3472_v20 = vpop.permute.xlu2 %3471  ;;  %v3426_v33 = vpop.permute.xlu1 %3425  ;;  %s3871_s22 = sshll.u32 %s4118_s7, 4  ;;  %s3872_s22 = int_to_ptr.vmem [resolvable:$true] %s3871_s22 }
 0x417   :  { %v3386_v40 = vpop.permute.xlu0 %3385 }
 0x418   :  { %v3397_v32 = vadd.f32 %v3386_v40, %v3357_v23 }
 0x41a   :  { %v3437_v28 = vadd.f32 %v3426_v33, %v3397_v32 }
 0x41c   :  { %v3477_v6 = vadd.f32 %v3466_v24, %v3437_v28 }
 0x41e   :  { %v3510_v63 = vpop.permute.xlu2 %3509  ;;  %v3432_v27 = vpop.permute.xlu1 %3431 }
 0x41f   :  { %v3392_v29 = vpop.permute.xlu0 %3391 }
 0x420   :  { %v3400_v37 = vadd.f32 %v3392_v29, %v3360_v12 }
 0x422   :  { %v3440_v4 = vadd.f32 %v3432_v27, %v3400_v37 }
 0x424   :  { %v3480_v42 = vadd.f32 %v3472_v20, %v3440_v4 }
 0x426   :  { %v3534_v43 = vpop.permute.xlu2 %3533  ;;  %v3470_v55 = vpop.permute.xlu1 %3469 }
 0x427   :  { %v3430_v62 = vpop.permute.xlu0 %3429 }
 0x428   :  { %v3439_v11 = vadd.f32 %v3430_v62, %v3399_v1 }
 0x42a   :  { %v3479_v30 = vadd.f32 %v3470_v55, %v3439_v11 }
 0x42c   :  { %v3519_v47 = vadd.f32 %v3510_v63, %v3479_v30 }
 0x42e   :  { %v3572_v26 = vpop.permute.xlu2 %3571  ;;  %v3508_v9 = vpop.permute.xlu1 %3507 }
 0x42f   :  { %v3468_v45 = vpop.permute.xlu0 %3467 }
 0x430   :  { %v3478_v10 = vadd.f32 %v3468_v45, %v3438_v39 }
 0x432   :  { %v3518_v46 = vadd.f32 %v3508_v9, %v3478_v10 }
 0x434   :  { %v3544_v12 = vadd.f32 %v3534_v43, %v3518_v46 }
 0x436   :  { %v3532_v57 = vpop.permute.xlu1 %3531  ;;  %v3578_v14 = vpop.permute.xlu2 %3577 }
 0x437   :  { %v3506_v23 = vpop.permute.xlu0 %3505 }
 0x438   :  { %v3517_v54 = vadd.f32 %v3506_v23, %v3477_v6 }
 0x43a   :  { %v3543_v35 = vadd.f32 %v3532_v57, %v3517_v54 }
 0x43c   :  { %v3583_v7 = vadd.f32 %v3572_v26, %v3543_v35 }
 0x43e   :  { %v3538_v8 = vpop.permute.xlu1 %3537  ;;  %v3616_v52 = vpop.permute.xlu2 %3615 }
 0x43f   :  { %v3512_v21 = vpop.permute.xlu0 %3511 }
 0x440   :  { %v3520_v17 = vadd.f32 %v3512_v21, %v3480_v42 }
 0x442   :  { %v3546_v13 = vadd.f32 %v3538_v8, %v3520_v17 }
 0x444   :  { %v3586_v16 = vadd.f32 %v3578_v14, %v3546_v13 }
 0x446   :  { %v3576_v15 = vpop.permute.xlu1 %3575  ;;  %v3654_v53 = vpop.permute.xlu2 %3653 }
 0x447   :  { %v3536_v0 = vpop.permute.xlu0 %3535 }
 0x448   :  { %v3545_v25 = vadd.f32 %v3536_v0, %v3519_v47 }
 0x44a   :  { %v3585_v32 = vadd.f32 %v3576_v15, %v3545_v25 }
 0x44c   :  { %v3625_v27 = vadd.f32 %v3616_v52, %v3585_v32 }
 0x44e   :  { %v3614_v41 = vpop.permute.xlu1 %3613  ;;  %v3692_v56 = vpop.permute.xlu2 %3691 }
 0x44f   :  { %v3574_v18 = vpop.permute.xlu0 %3573 }
 0x450   :  { %v3584_v19 = vadd.f32 %v3574_v18, %v3544_v12 }
 0x452   :  { %v3624_v5 = vadd.f32 %v3614_v41, %v3584_v19 }
 0x454   :  { %v3664_v51 = vadd.f32 %v3654_v53, %v3624_v5 }
 0x456   :  { %v3652_v3 = vpop.permute.xlu1 %3651  ;;  %v3698_v48 = vpop.permute.xlu2 %3697 }
 0x457   :  { %v3612_v38 = vpop.permute.xlu0 %3611 }
 0x458   :  { %v3623_v22 = vadd.f32 %v3612_v38, %v3583_v7 }
 0x45a   :  { %v3663_v24 = vadd.f32 %v3652_v3, %v3623_v22 }
 0x45c   :  { %v3703_v20 = vadd.f32 %v3692_v56, %v3663_v24 }
 0x45e   :  { %v3658_v49 = vpop.permute.xlu1 %3657  ;;  %v3736_v2 = vpop.permute.xlu2 %3735 }
 0x45f   :  { %v3618_v61 = vpop.permute.xlu0 %3617 }
 0x460   :  { %v3626_v44 = vadd.f32 %v3618_v61, %v3586_v16 }
 0x462   :  { %v3666_v6 = vadd.f32 %v3658_v49, %v3626_v44 }
 0x464   :  { %v3706_v42 = vadd.f32 %v3698_v48, %v3666_v6 }
 0x466   :  { %v3696_v60 = vpop.permute.xlu1 %3695  ;;  %v3774_v58 = vpop.permute.xlu2 %3773 }
 0x467   :  { %v3656_v59 = vpop.permute.xlu0 %3655 }
 0x468   :  { %v3665_v4 = vadd.f32 %v3656_v59, %v3625_v27 }
 0x46a   :  { %v3705_v30 = vadd.f32 %v3696_v60, %v3665_v4 }
 0x46c   :  { %v3745_v57 = vadd.f32 %v3736_v2, %v3705_v30 }
 0x46e   :  { %v3734_v31 = vpop.permute.xlu1 %3733 }
 0x46f   :  { %v3694_v34 = vpop.permute.xlu0 %3693 }
 0x470   :  { %v3704_v1 = vadd.f32 %v3694_v34, %v3664_v51 }
 0x472   :  { %v3744_v50 = vadd.f32 %v3734_v31, %v3704_v1 }
 0x474   :  { %v3784_v36 = vadd.f32 %v3774_v58, %v3744_v50 }
 0x476   :  { %v3985_v39 = vmul.f32 -1.442695, %v3784_v36  ;;  %v3772_v33 = vpop.permute.xlu1 %3771 }
 0x477   :  { %v3732_v40 = vpop.permute.xlu0 %3731 }
 0x478   :  { %4001 = vpow2.f32 %v3985_v39  ;;  %v3743_v28 = vadd.f32 %v3732_v40, %v3703_v20 }
 0x47a   :  { %v3783_v63 = vadd.f32 %v3772_v33, %v3743_v28 }
 0x47c   :  { %v3984_v29 = vmul.f32 -1.442695, %v3783_v63 }
 0x47e   :  { %v4002_v37 = vpop.eup %4001  ;;  %4003 = vpow2.f32 %v3984_v29  ;;  %v3778_v11 = vpop.permute.xlu1 %3777 }
 0x47f   :  { %v3800_v43 = vadd.f32 1.0, %v4002_v37  ;;  %v3738_v55 = vpop.permute.xlu0 %3737 }
 0x480   :  { %v3746_v62 = vadd.f32 %v3738_v55, %v3706_v42 }
 0x481   :  { %4005 = vrcp.f32 %v3800_v43  ;;  %v3829_v0 = vand.u32 2147483648, %v3800_v43  ;;  %v3827_v18 = vand.u32 2147483647, %v3800_v43  ;;  %vm3823_vm11 = vweird.f32 %v3800_v43 }
 0x482   :  { %v3786_v47 = vadd.f32 %v3778_v11, %v3746_v62 }
 0x483   :  { %v3830_v49 = vor.u32 1.1754944e-38, %v3829_v0  ;;  %vm3828_vm13 = vcmp.eq.f32.partialorder %v3827_v18, 8.507059e+37 }
 0x484   :  { %v4004_v26 = vpop.eup %4003  ;;  %v3987_v9 = vmul.f32 -1.442695, %v3786_v47 }
 0x485   :  { %v3799_v45 = vadd.f32 1.0, %v4004_v26 }
 0x486   :  { %4007 = vpow2.f32 %v3987_v9 }
 0x487   :  { %v4006_v14 = vpop.eup %4005  ;;  %4009 = vrcp.f32 %v3799_v45  ;;  %v3776_v23 = vpop.permute.xlu0 %3775  ;;  %v3814_v46 = vand.u32 2147483648, %v3799_v45  ;;  %v3812_v60 = vand.u32 2147483647, %v3799_v45  ;;  %vm3808_vm15 = vweird.f32 %v3799_v45 }
 0x488   :  { %v3819_v8 = vmul.f32 %v4006_v14, %v3800_v43  ;;  %v3785_v21 = vadd.f32 %v3776_v23, %v3745_v57  ;;  %vm3824_vm10 = vweird.f32 %v4006_v14 }
 0x489   :  { %vm3825_vm12 = vmor %vm3823_vm11, %vm3824_vm10  ;;  %v3815_v5 = vor.u32 1.1754944e-38, %v3814_v46  ;;  %vm3813_vm2 = vcmp.eq.f32.partialorder %v3812_v60, 8.507059e+37 }
 0x48a   :  { %v3986_v52 = vmul.f32 -1.442695, %v3785_v21  ;;  %v3820_v15 = vsub.f32 1.0, %v3819_v8 }
 0x48c   :  { %v4008_v53 = vpop.eup %4007  ;;  %4011 = vpow2.f32 %v3986_v52  ;;  %v3821_v41 = vmul.f32 %v4006_v14, %v3820_v15 }
 0x48d   :  { %v4010_v56 = vpop.eup %4009  ;;  %v3802_v3 = vadd.f32 1.0, %v4008_v53 }
 0x48e   :  { %v3804_v38 = vmul.f32 %v4010_v56, %v3799_v45  ;;  %v3822_v10 = vadd.f32 %v4006_v14, %v3821_v41  ;;  %vm3809_vm14 = vweird.f32 %v4010_v56 }
 0x48f   :  { %4013 = vrcp.f32 %v3802_v3  ;;  %vm3810_vm1 = vmor %vm3808_vm15, %vm3809_vm14  ;;  %v3859_v51 = vand.u32 2147483648, %v3802_v3  ;;  %v3857_v13 = vand.u32 2147483647, %v3802_v3  ;;  %vm3853_vm4 = vweird.f32 %v3802_v3 }
 0x490   :  { %v3805_v48 = vsub.f32 1.0, %v3804_v38  ;;  %v3826_v61 = vsel %vm3825_vm12, %v4006_v14, %v3822_v10 }
 0x491   :  { %v3831_v54 = vsel %vm3828_vm13, %v3830_v49, %v3826_v61  ;;  %v3860_v58 = vor.u32 1.1754944e-38, %v3859_v51  ;;  %vm3858_vm6 = vcmp.eq.f32.partialorder %v3857_v13, 8.507059e+37 }
 0x492   :  { %v4012_v12 = vpop.eup %4011  ;;  %v3806_v19 = vmul.f32 %v4010_v56, %v3805_v48  ;;  %3864 = vst.msk [vmem:[#allocation9 + $0x8] sm:$0xff] %vm57_vm0, %v3831_v54 }
 0x493   :  { %v3801_v59 = vadd.f32 1.0, %v4012_v12 }
 0x494   :  { %v3807_v35 = vadd.f32 %v4010_v56, %v3806_v19 }
 0x495   :  { %v4014_v2 = vpop.eup %4013  ;;  %4015 = vrcp.f32 %v3801_v59  ;;  %v3844_v36 = vand.u32 2147483648, %v3801_v59  ;;  %v3842_v20 = vand.u32 2147483647, %v3801_v59  ;;  %vm3838_vm8 = vweird.f32 %v3801_v59 }
 0x496   :  { %v3849_v17 = vmul.f32 %v4014_v2, %v3802_v3  ;;  %v3811_v7 = vsel %vm3810_vm1, %v4010_v56, %v3807_v35  ;;  %vm3854_vm3 = vweird.f32 %v4014_v2 }
 0x497   :  { %v3816_v22 = vsel %vm3813_vm2, %v3815_v5, %v3811_v7  ;;  %vm3855_vm5 = vmor %vm3853_vm4, %vm3854_vm3  ;;  %v3845_v40 = vor.u32 1.1754944e-38, %v3844_v36  ;;  %vm3843_vm10 = vcmp.eq.f32.partialorder %v3842_v20, 8.507059e+37 }
 0x498   :  { %v3850_v31 = vsub.f32 1.0, %v3849_v17  ;;  %3863 = vst.msk [vmem:[#allocation9] sm:$0xff] %vm57_vm0, %v3816_v22 }
 0x49a   :  { %v3851_v34 = vmul.f32 %v4014_v2, %v3850_v31 }
 0x49b   :  { %v4016_v1 = vpop.eup %4015 }
 0x49c   :  { %v3834_v24 = vmul.f32 %v4016_v1, %v3801_v59  ;;  %v3852_v50 = vadd.f32 %v4014_v2, %v3851_v34  ;;  %vm3839_vm7 = vweird.f32 %v4016_v1 }
 0x49d   :  { %vm3840_vm9 = vmor %vm3838_vm8, %vm3839_vm7 }
 0x49e   :  { %v3835_v25 = vsub.f32 1.0, %v3834_v24  ;;  %v3856_v16 = vsel %vm3855_vm5, %v4014_v2, %v3852_v50 }
 0x49f   :  { %v3861_v44 = vsel %vm3858_vm6, %v3860_v58, %v3856_v16 }
 0x4a0   :  { %v3836_v39 = vmul.f32 %v4016_v1, %v3835_v25  ;;  %3866 = vst.msk [vmem:[#allocation9 + $0x18] sm:$0xff] %vm57_vm0, %v3861_v44 }
 0x4a2   :  { %v3837_v33 = vadd.f32 %v4016_v1, %v3836_v39 }
 0x4a4   :  { %v3841_v32 = vsel %vm3840_vm9, %v4016_v1, %v3837_v33 }
 0x4a5   :  { %v3846_v28 = vsel %vm3843_vm10, %v3845_v40, %v3841_v32 }
 0x4a6   :  { %3865 = vst.msk [vmem:[#allocation9 + $0x10] sm:$0xff] %vm57_vm0, %v3846_v28 }
 0x4a7   :  { %3879 = dma.vmem_to_hbm [thread:$0]  %s3872_s22, 512, %s3874_s25, [#allocation6], %s4108_s18, %s4108_s18, %s4109_s19  }
 0x4a8   :  { %4104 = dma.done.wait [#allocation6], 512  }
 0x4a9   :  { %4105 = vsyncadd [#allocation6], 4294966784 }
 0x4aa   :  { %3884 = vsyncpa [#allocation5], 1 }
 0x4ab   :  { %3885 = vsyncpa [#allocation6], 1 }
 0x4ac   :  { %3886 = vsyncpa [#allocation7], 1 }

</bundles_post_ra>
